<compile_context>
chip_gen: v5e
topology: v5e:2x2
jax: 0.10.0
libtpu: 0.0.40
codegen_flags: <defaults>
</compile_context>

<pallas_src>
import functools

import jax
import jax.numpy as jnp
from jax.experimental import pallas as pl
from jax.experimental.pallas import tpu as pltpu

INPUT_FEATURE = 512      # == input_feature in the PyTorch module
NUM_CLASSES = 10
PADDED_CLASSES = 128     # lane-dense logits tile; sliced back to 10 outside


def _vmem_budget_bytes():
    """~75% of per-core VMEM, capped at 100 MiB (96 MiB v5e/v6e, 48 MiB v7x)."""
    cap = 64 * 1024 * 1024
    try:
        info = pltpu.get_tpu_info()
        cap = int(getattr(info, "vmem_capacity_bytes", cap) or cap)
    except Exception:
        pass
    return min((cap * 3) // 4, 100 * 1024 * 1024)


def _vmem_estimate(tb, c_in, s_tile):
    """Rough VMEM footprint (bytes) for one grid step with double-buffering."""
    bf16, f32 = 2, 4
    x_blk = 2 * tb * c_in * s_tile * bf16                    # x, double-buffered
    bias = 2 * INPUT_FEATURE * s_tile * f32                  # lane-dense bias
    wbb = 2 * INPUT_FEATURE * c_in * bf16                     # backbone weight
    wfc = 2 * INPUT_FEATURE * PADDED_CLASSES * f32            # fc weight
    out = 2 * tb * PADDED_CLASSES * f32                       # logits block
    acc = tb * INPUT_FEATURE * 128 * f32                      # pooling accumulator
    feat = 2 * INPUT_FEATURE * s_tile * f32                   # live per-batch intermediate
    return x_blk + bias + wbb + wfc + out + acc + feat


def _select_spatial_tile(tb, c_in, S, budget):
    candidates = [c for c in (2048, 1024, 512, 256, 128) if S % c == 0]
    if not candidates:
        candidates = [S]                 # e.g. S not a multiple of 128
    for st in candidates:                # largest first
        if _vmem_estimate(tb, c_in, st) <= budget:
            return st
    return candidates[-1]


def _head_kernel(x_ref, wbbT_ref, bbb_ref, wfc_ref, bfc_ref, o_ref, acc_ref,
                 *, inv_spatial, n_lane_chunks, lane_chunk):
    # x_ref:    (TB, C_in, S_TILE) bf16   channels-first, spatial on the lane axis
    # wbbT_ref: (512, C_in) bf16          synthetic backbone 1x1-conv weight (transposed)
    # bbb_ref:  (512, S_TILE) f32         backbone bias, pre-broadcast lane-dense
    # wfc_ref:  (512, 128) f32            fc1 weight, zero-padded 10 -> 128 classes
    # bfc_ref:  (1, 128) f32              fc1 bias, zero-padded
    # o_ref:    (TB, 128) f32             padded logits (written at last spatial step)
    # acc_ref:  (TB, 512, lane_chunk) f32 lane-aligned running spatial partial sums
    s = pl.program_id(1)

    @pl.when(s == 0)
    def _init():
        acc_ref[...] = jnp.zeros_like(acc_ref)

    w = wbbT_ref[...]          # (512, C_in) bf16, weight-stationary across the batch loop
    bias = bbb_ref[...]        # (512, S_TILE) f32, plain aligned VPU add
    tb = x_ref.shape[0]

    for b in range(tb):        # static unroll: plain 2D MXU matmuls sharing the weight
        feat = jnp.dot(w, x_ref[b],
                       preferred_element_type=jnp.float32)    # (512, S_TILE) f32
        feat = jnp.maximum(feat + bias, 0.0)                  # bias + ReLU (VPU)
        # lane-aligned partial pooling: VPU adds of 128-lane chunks (no XLU per step)
        partial = feat[:, 0:lane_chunk]
        for c in range(1, n_lane_chunks):
            partial = partial + feat[:, c * lane_chunk:(c + 1) * lane_chunk]
        acc_ref[b] += partial                                  # (512, lane_chunk)

    @pl.when(s == pl.num_programs(1) - 1)
    def _finalize():
        # single cross-lane reduce for the whole kernel, then fc head (f32)
        pooled = jnp.sum(acc_ref[...], axis=2) * inv_spatial   # (TB, 512)
        logits = jnp.dot(pooled, wfc_ref[...],
                         preferred_element_type=jnp.float32)   # (TB, 128)
        o_ref[...] = logits + bfc_ref[...]


def uniqlo_price_cls_forward(x_nchw, w_bb, b_bb, w_fc, b_fc):
    """x_nchw: [B, C_in, H, W] f32.  w_bb: [C_in, 512], b_bb: [512],
    w_fc: [512, 10], b_fc: [10].  Returns logits [B, 10] f32."""
    B, C_in, H, W = x_nchw.shape
    S = H * W

    # channels-first flatten (free reshape) + bf16 cast of the only large HBM stream
    x_bcs = x_nchw.reshape(B, C_in, S).astype(jnp.bfloat16)

    # TB: multiple of 8 dividing B, or full B (keeps (TB,128) output block legal)
    TB = 8 if (B % 8 == 0) else B

    budget = _vmem_budget_bytes()
    S_TILE = _select_spatial_tile(TB, C_in, S, budget)
    lane_chunk = 128 if (S_TILE % 128 == 0) else S_TILE
    n_chunks = S_TILE // lane_chunk

    # tiny one-time parameter reshapes / padding (negligible)
    w_bb_t = jnp.transpose(w_bb, (1, 0)).astype(jnp.bfloat16)            # (512, C_in)
    b_bb2 = jnp.broadcast_to(b_bb.astype(jnp.float32)[:, None],
                             (INPUT_FEATURE, S_TILE))                     # lane-dense bias
    w_fc_pad = jnp.zeros((INPUT_FEATURE, PADDED_CLASSES), jnp.float32)
    w_fc_pad = w_fc_pad.at[:, :NUM_CLASSES].set(w_fc.astype(jnp.float32))
    b_fc_pad = jnp.zeros((1, PADDED_CLASSES), jnp.float32)
    b_fc_pad = b_fc_pad.at[0, :NUM_CLASSES].set(b_fc.astype(jnp.float32))

    kernel = functools.partial(_head_kernel, inv_spatial=1.0 / float(S),
                               n_lane_chunks=n_chunks, lane_chunk=lane_chunk)

    grid_spec = pltpu.PrefetchScalarGridSpec(
        num_scalar_prefetch=0,
        grid=(B // TB, S // S_TILE),
        in_specs=[
            pl.BlockSpec((TB, C_in, S_TILE), lambda b, s: (b, 0, s)),
            pl.BlockSpec((INPUT_FEATURE, C_in), lambda b, s: (0, 0)),
            pl.BlockSpec((INPUT_FEATURE, S_TILE), lambda b, s: (0, 0)),
            pl.BlockSpec((INPUT_FEATURE, PADDED_CLASSES), lambda b, s: (0, 0)),
            pl.BlockSpec((1, PADDED_CLASSES), lambda b, s: (0, 0)),
        ],
        out_specs=pl.BlockSpec((TB, PADDED_CLASSES), lambda b, s: (b, 0)),
        scratch_shapes=[pltpu.VMEM((TB, INPUT_FEATURE, lane_chunk), jnp.float32)],
    )

    out_pad = pl.pallas_call(
        kernel,
        out_shape=jax.ShapeDtypeStruct((B, PADDED_CLASSES), jnp.float32),
        grid_spec=grid_spec,
        compiler_params=pltpu.CompilerParams(
            dimension_semantics=("parallel", "arbitrary"),
            vmem_limit_bytes=budget,
        ),
    )(x_bcs, w_bb_t, b_bb2, w_fc_pad, b_fc_pad)

    return out_pad[:, :NUM_CLASSES]


if __name__ == "__main__":
    key = jax.random.PRNGKey(0)
    k_x, k_wbb, k_bbb, k_wfc, k_bfc = jax.random.split(key, 5)

    # Small deterministic example: batch=2, channels=4, spatial=16x16
    B, C_in, H, W = 2, 4, 16, 16
    x = jax.random.normal(k_x, (B, C_in, H, W), dtype=jnp.float32)

    # Deterministic parameter init (synthetic; not loaded from a checkpoint)
    # TODO(synk): real backbone is an injected module; modeled as 1x1 conv + ReLU.
    w_bb = jax.random.normal(k_wbb, (C_in, INPUT_FEATURE), dtype=jnp.float32) * 0.05
    b_bb = jax.random.normal(k_bbb, (INPUT_FEATURE,), dtype=jnp.float32) * 0.01
    w_fc = jax.random.normal(k_wfc, (INPUT_FEATURE, NUM_CLASSES), dtype=jnp.float32) * 0.05
    b_fc = jax.random.normal(k_bfc, (NUM_CLASSES,), dtype=jnp.float32) * 0.01

    out = uniqlo_price_cls_forward(x, w_bb, b_bb, w_fc, b_fc)
    out = jax.block_until_ready(out)

    # Pure-JAX f32 reference of the same forward (kernel uses bf16 inputs for
    # the backbone matmul, so tolerance is relaxed accordingly).
    feat = jnp.maximum(
        jnp.einsum("bchw,cf->bfhw", x, w_bb) + b_bb[None, :, None, None], 0.0)
    pooled = jnp.mean(feat, axis=(2, 3))                  # AdaptiveAvgPool2d + flatten
    ref = pooled @ w_fc + b_fc                            # fc1
    assert out.shape == (B, NUM_CLASSES)
    assert jnp.allclose(out, ref, atol=1e-2, rtol=1e-2), "mismatch vs reference"

    print("KERNEL_OK")
</pallas_src>

<mosaic_0001>
module attributes {stable_mosaic.version = 11 : i64} {
  func.func @_head_kernel(%arg0: i32, %arg1: i32, %arg2: memref<2x4x256xbf16, #tpu.memory_space<vmem>>, %arg3: memref<512x4xbf16, #tpu.memory_space<vmem>>, %arg4: memref<512x256xf32, #tpu.memory_space<vmem>>, %arg5: memref<512x128xf32, #tpu.memory_space<vmem>>, %arg6: memref<1x128xf32, #tpu.memory_space<vmem>>, %arg7: memref<2x128xf32, #tpu.memory_space<vmem>>, %arg8: memref<2x512x128xf32, #tpu.memory_space<vmem>>) attributes {dimension_semantics = [#tpu.dimension_semantics<parallel>, #tpu.dimension_semantics<arbitrary>], iteration_bounds = array<i64: 1, 1>, scalar_prefetch = 0 : i64, scratch_operands = 1 : i64, tpu.core_type = #tpu.core_type<tc>, window_params = [{transform_indices = @transform_0, window_bounds = array<i64: 2, 4, 256>}, {pipeline_mode = #tpu.pipeline_mode<synchronous>, transform_indices = @transform_1, window_bounds = array<i64: 512, 4>}, {pipeline_mode = #tpu.pipeline_mode<synchronous>, transform_indices = @transform_2, window_bounds = array<i64: 512, 256>}, {pipeline_mode = #tpu.pipeline_mode<synchronous>, transform_indices = @transform_3, window_bounds = array<i64: 512, 128>}, {pipeline_mode = #tpu.pipeline_mode<synchronous>, transform_indices = @transform_4, window_bounds = array<i64: 1, 128>}, {transform_indices = @transform_5, window_bounds = array<i64: 2, 128>}]} {
    %c0_i32 = arith.constant 0 : i32
    %0 = arith.cmpi eq, %arg1, %c0_i32 : i32
    %1 = arith.extui %0 : i1 to i32
    %c0_i32_0 = arith.constant 0 : i32
    %2 = arith.cmpi ne, %1, %c0_i32_0 : i32
    scf.if %2 {
      %cst_26 = arith.constant 0.000000e+00 : f32
      %38 = vector.broadcast %cst_26 : f32 to vector<2x512x128xf32>
      %c0_27 = arith.constant 0 : index
      %c0_28 = arith.constant 0 : index
      %c0_29 = arith.constant 0 : index
      %39 = vector.load %arg8[%c0_27, %c0_28, %c0_29] : memref<2x512x128xf32, #tpu.memory_space<vmem>>, vector<2x512x128xf32>
      tpu.vector_store %arg8[%c0_27, %c0_28, %c0_29], %38 {strides = array<i32>} : memref<2x512x128xf32, #tpu.memory_space<vmem>>, vector<2x512x128xf32>,
    } else {
    }
    %c0 = arith.constant 0 : index
    %c0_1 = arith.constant 0 : index
    %3 = vector.load %arg3[%c0, %c0_1] : memref<512x4xbf16, #tpu.memory_space<vmem>>, vector<512x4xbf16>
    %c0_2 = arith.constant 0 : index
    %c0_3 = arith.constant 0 : index
    %4 = vector.load %arg4[%c0_2, %c0_3] : memref<512x256xf32, #tpu.memory_space<vmem>>, vector<512x256xf32>
    %c0_4 = arith.constant 0 : index
    %c0_5 = arith.constant 0 : index
    %c0_6 = arith.constant 0 : index
    %5 = vector.load %arg2[%c0_4, %c0_5, %c0_6] : memref<2x4x256xbf16, #tpu.memory_space<vmem>>, vector<1x4x256xbf16>
    %6 = vector.shape_cast %5 : vector<1x4x256xbf16> to vector<4x256xbf16>
    %cst = arith.constant dense<0.000000e+00> : vector<512x256xf32>
    %7 = tpu.matmul %3, %6, %cst {dimension_numbers = #tpu.dot_dimension_numbers<[1], [0], [0], [1], [0, 0, 1, 1], [], []>} : vector<512x4xbf16>, vector<4x256xbf16>, vector<512x256xf32> -> vector<512x256xf32>
    %8 = arith.addf %7, %4 : vector<512x256xf32>
    %cst_7 = arith.constant 0.000000e+00 : f32
    %9 = vector.broadcast %cst_7 : f32 to vector<512x256xf32>
    %10 = arith.maximumf %8, %9 : vector<512x256xf32>
    %11 = vector.extract_strided_slice %10 {offsets = [0, 0], sizes = [512, 128], strides = [1, 1]} : vector<512x256xf32> to vector<512x128xf32>
    %12 = vector.extract_strided_slice %10 {offsets = [0, 128], sizes = [512, 128], strides = [1, 1]} : vector<512x256xf32> to vector<512x128xf32>
    %13 = arith.addf %11, %12 : vector<512x128xf32>
    %c0_8 = arith.constant 0 : index
    %c0_9 = arith.constant 0 : index
    %c0_10 = arith.constant 0 : index
    %14 = vector.load %arg8[%c0_8, %c0_9, %c0_10] : memref<2x512x128xf32, #tpu.memory_space<vmem>>, vector<1x512x128xf32>
    %15 = vector.shape_cast %14 : vector<1x512x128xf32> to vector<512x128xf32>
    %16 = arith.addf %15, %13 : vector<512x128xf32>
    %c0_11 = arith.constant 0 : index
    %c0_12 = arith.constant 0 : index
    %c0_13 = arith.constant 0 : index
    %17 = vector.load %arg8[%c0_11, %c0_12, %c0_13] : memref<2x512x128xf32, #tpu.memory_space<vmem>>, vector<1x512x128xf32>
    %18 = vector.shape_cast %17 : vector<1x512x128xf32> to vector<512x128xf32>
    %19 = vector.shape_cast %16 : vector<512x128xf32> to vector<1x512x128xf32>
    tpu.vector_store %arg8[%c0_11, %c0_12, %c0_13], %19 {strides = array<i32>} : memref<2x512x128xf32, #tpu.memory_space<vmem>>, vector<1x512x128xf32>,
    %c1 = arith.constant 1 : index
    %c0_14 = arith.constant 0 : index
    %c0_15 = arith.constant 0 : index
    %20 = vector.load %arg2[%c1, %c0_14, %c0_15] : memref<2x4x256xbf16, #tpu.memory_space<vmem>>, vector<1x4x256xbf16>
    %21 = vector.shape_cast %20 : vector<1x4x256xbf16> to vector<4x256xbf16>
    %cst_16 = arith.constant dense<0.000000e+00> : vector<512x256xf32>
    %22 = tpu.matmul %3, %21, %cst_16 {dimension_numbers = #tpu.dot_dimension_numbers<[1], [0], [0], [1], [0, 0, 1, 1], [], []>} : vector<512x4xbf16>, vector<4x256xbf16>, vector<512x256xf32> -> vector<512x256xf32>
    %23 = arith.addf %22, %4 : vector<512x256xf32>
    %cst_17 = arith.constant 0.000000e+00 : f32
    %24 = vector.broadcast %cst_17 : f32 to vector<512x256xf32>
    %25 = arith.maximumf %23, %24 : vector<512x256xf32>
    %26 = vector.extract_strided_slice %25 {offsets = [0, 0], sizes = [512, 128], strides = [1, 1]} : vector<512x256xf32> to vector<512x128xf32>
    %27 = vector.extract_strided_slice %25 {offsets = [0, 128], sizes = [512, 128], strides = [1, 1]} : vector<512x256xf32> to vector<512x128xf32>
    %28 = arith.addf %26, %27 : vector<512x128xf32>
    %c1_18 = arith.constant 1 : index
    %c0_19 = arith.constant 0 : index
    %c0_20 = arith.constant 0 : index
    %29 = vector.load %arg8[%c1_18, %c0_19, %c0_20] : memref<2x512x128xf32, #tpu.memory_space<vmem>>, vector<1x512x128xf32>
    %30 = vector.shape_cast %29 : vector<1x512x128xf32> to vector<512x128xf32>
    %31 = arith.addf %30, %28 : vector<512x128xf32>
    %c1_21 = arith.constant 1 : index
    %c0_22 = arith.constant 0 : index
    %c0_23 = arith.constant 0 : index
    %32 = vector.load %arg8[%c1_21, %c0_22, %c0_23] : memref<2x512x128xf32, #tpu.memory_space<vmem>>, vector<1x512x128xf32>
    %33 = vector.shape_cast %32 : vector<1x512x128xf32> to vector<512x128xf32>
    %34 = vector.shape_cast %31 : vector<512x128xf32> to vector<1x512x128xf32>
    tpu.vector_store %arg8[%c1_21, %c0_22, %c0_23], %34 {strides = array<i32>} : memref<2x512x128xf32, #tpu.memory_space<vmem>>, vector<1x512x128xf32>,
    %c0_i32_24 = arith.constant 0 : i32
    %35 = arith.cmpi eq, %arg1, %c0_i32_24 : i32
    %36 = arith.extui %35 : i1 to i32
    %c0_i32_25 = arith.constant 0 : i32
    %37 = arith.cmpi ne, %36, %c0_i32_25 : i32
    scf.if %37 {
      %c0_26 = arith.constant 0 : index
      %c0_27 = arith.constant 0 : index
      %c0_28 = arith.constant 0 : index
      %38 = vector.load %arg8[%c0_26, %c0_27, %c0_28] : memref<2x512x128xf32, #tpu.memory_space<vmem>>, vector<2x512x128xf32>
      %cst_29 = arith.constant dense<0.000000e+00> : vector<2x512xf32>
      %39 = vector.multi_reduction <add>, %38, %cst_29 [2] : vector<2x512x128xf32> to vector<2x512xf32>
      %cst_30 = arith.constant 3.906250e-03 : f32
      %40 = vector.broadcast %cst_30 : f32 to vector<2x512xf32>
      %41 = arith.mulf %39, %40 : vector<2x512xf32>
      %c0_31 = arith.constant 0 : index
      %c0_32 = arith.constant 0 : index
      %42 = vector.load %arg5[%c0_31, %c0_32] : memref<512x128xf32, #tpu.memory_space<vmem>>, vector<512x128xf32>
      %cst_33 = arith.constant dense<0.000000e+00> : vector<2x128xf32>
      %43 = tpu.matmul %41, %42, %cst_33 {dimension_numbers = #tpu.dot_dimension_numbers<[1], [0], [0], [1], [0, 0, 1, 1], [], []>} : vector<2x512xf32>, vector<512x128xf32>, vector<2x128xf32> -> vector<2x128xf32>
      %c0_34 = arith.constant 0 : index
      %c0_35 = arith.constant 0 : index
      %44 = vector.load %arg6[%c0_34, %c0_35] : memref<1x128xf32, #tpu.memory_space<vmem>>, vector<1x128xf32>
      %45 = vector.broadcast %44 : vector<1x128xf32> to vector<2x128xf32>
      %46 = arith.addf %43, %45 : vector<2x128xf32>
      %c0_36 = arith.constant 0 : index
      %c0_37 = arith.constant 0 : index
      %47 = vector.load %arg7[%c0_36, %c0_37] : memref<2x128xf32, #tpu.memory_space<vmem>>, vector<2x128xf32>
      tpu.vector_store %arg7[%c0_36, %c0_37], %46 {strides = array<i32>} : memref<2x128xf32, #tpu.memory_space<vmem>>, vector<2x128xf32>,
    } else {
    }
    return
  }
  func.func @transform_0(%arg0: i32, %arg1: i32) -> (i32, i32, i32) {
    %c0_i32 = arith.constant 0 : i32
    %c0_i32_0 = arith.constant 0 : i32
    return %arg0, %c0_i32, %arg1 : i32, i32, i32
  }
  func.func @transform_1(%arg0: i32, %arg1: i32) -> (i32, i32) {
    %c0_i32 = arith.constant 0 : i32
    %c0_i32_0 = arith.constant 0 : i32
    %c0_i32_1 = arith.constant 0 : i32
    return %c0_i32, %c0_i32_0 : i32, i32
  }
  func.func @transform_2(%arg0: i32, %arg1: i32) -> (i32, i32) {
    %c0_i32 = arith.constant 0 : i32
    %c0_i32_0 = arith.constant 0 : i32
    %c0_i32_1 = arith.constant 0 : i32
    return %c0_i32, %c0_i32_0 : i32, i32
  }
  func.func @transform_3(%arg0: i32, %arg1: i32) -> (i32, i32) {
    %c0_i32 = arith.constant 0 : i32
    %c0_i32_0 = arith.constant 0 : i32
    %c0_i32_1 = arith.constant 0 : i32
    return %c0_i32, %c0_i32_0 : i32, i32
  }
  func.func @transform_4(%arg0: i32, %arg1: i32) -> (i32, i32) {
    %c0_i32 = arith.constant 0 : i32
    %c0_i32_0 = arith.constant 0 : i32
    %c0_i32_1 = arith.constant 0 : i32
    return %c0_i32, %c0_i32_0 : i32, i32
  }
  func.func @transform_5(%arg0: i32, %arg1: i32) -> (i32, i32) {
    %c0_i32 = arith.constant 0 : i32
    %c0_i32_0 = arith.constant 0 : i32
    return %arg0, %c0_i32 : i32, i32
  }
}

</mosaic_0001>

<bundles_post_ra>
// kernel: tpu_custom_call.1
= control target key start
LH: loop header
LB: loop body
LE: loop exit
PB: predicated region body
PF: predicated region fallthrough
CT: control target
= control target key end

     0   :  { %10 = vsyncpa [#allocation4], 0  ;;  %s4441_s0 = inlined_call_operand.vmem [shape: bf16[2,4,256], index: 0, kind: input, shape index: {}]   ;;  %s4442_s1 = inlined_call_operand.vmem [shape: bf16[512,4], index: 1, kind: input, shape index: {}]   ;;  %s4443_s2 = inlined_call_operand.hbm [shape: f32[512,256], index: 2, kind: input, shape index: {}]   ;;  %s4444_s3 = inlined_call_operand.hbm [shape: f32[512,128], index: 3, kind: input, shape index: {}]   ;;  %s4445_s4 = inlined_call_operand.vmem [shape: f32[1,128], index: 4, kind: input, shape index: {}]   ;;  %s4446_s5 = inlined_call_operand.hbm [shape: f32[2,128], index: 5, kind: output, shape index: {}]  }
   0x1   :  { %11 = vsyncpa [#allocation7], 0 }
   0x2   :  { %12 = vsyncpa [#allocation5], 0  ;;  %s21_s20 = sshll.u32 %s4443_s2, 4  ;;  %s3574_s21 = smov [#allocation3]   ;;  %s22_s20 = int_to_ptr.hbm [resolvable:$true] %s21_s20 }
   0x3   :  { %s23_s22 = sshll.u32 %s3574_s21, 4  ;;  %s34_s25 = sshll.u32 %s4444_s3, 4  ;;  %s24_s22 = int_to_ptr.vmem [resolvable:$true] %s23_s22  ;;  %s35_s25 = int_to_ptr.hbm [resolvable:$true] %s34_s25 }
   0x4   :  { %s3575_s26 = smov 256   ;;  %s3576_s27 = smov 16  }
   0x5   :  { %29 = dma.hbm_to_vmem [thread:$0]  %s22_s20, 16384, %s24_s22, [#allocation4], %s3575_s26, %s3575_s26, %s3576_s27  }
   0x6   :  { %s3577_s28 = smov [#allocation6]   ;;  %s3578_s30 = smov 128  }
   0x7   :  { %s36_s29 = sshll.u32 %s3577_s28, 4  ;;  %s3579_s6 = smov 8   ;;  %s37_s29 = int_to_ptr.vmem [resolvable:$true] %s36_s29 }
   0x8   :  { %42 = dma.hbm_to_vmem [thread:$0]  %s35_s25, 8192, %s37_s29, [#allocation7], %s3578_s30, %s3578_s30, %s3579_s6  }
   0x9   :  { %3568 = dma.done.wait [#allocation4], 16384  }
   0xa   :  { %3569 = vsyncadd [#allocation4], 4294950912 }
   0xb   :  { %3570 = dma.done.wait [#allocation7], 8192  }
   0xc   :  { %3571 = vsyncadd [#allocation7], 4294959104  ;;  %v378_v0 = vld [vmem:[%s4441_s0] sm:$0xf]  ;;  %vm640_vm0 = vcmask 1041408   ;;  %vm543_vm1 = vcmask 31744  }
   0xd   :  { %540 = vst [vmem:[#allocation1] ss:$4 sm:$0xff] %v378_v0  ;;  %v3391_v1 = vld [vmem:[%s4441_s0 + $0x4] sm:$0xf]  ;;  %v3457_v11 = vld [vmem:[%s4442_s1 + $0x8] sm:$0xff]  ;;  %v3458_v12 = vld [vmem:[%s4442_s1 + $0x10] sm:$0xff] }
   0xe   :  { %v3456_v6 = vld [vmem:[%s4442_s1] sm:$0xff]  ;;  %v3459_v13 = vld [vmem:[%s4442_s1 + $0x18] sm:$0xff]  ;;  %v3461_v15 = vld [vmem:[%s4442_s1 + $0x28] sm:$0xff]  ;;  %vm2816_vm2 = vcmask 130112   ;;  %vm2820_vm3 = vcmask 195712   ;;  %vm2824_vm4 = vcmask 261312  }
   0xf   :  { %v3460_v14 = vld [vmem:[%s4442_s1 + $0x20] sm:$0xff]  ;;  %v3462_v16 = vld [vmem:[%s4442_s1 + $0x30] sm:$0xff]  ;;  %v3463_v17 = vld [vmem:[%s4442_s1 + $0x38] sm:$0xff]  ;;  %vm2828_vm5 = vcmask 326912   ;;  %vm2832_vm6 = vcmask 392512   ;;  %vm2836_vm7 = vcmask 458112  }
  0x10   :  { %v250_v18 = vld [vmem:[#allocation3] sm:$0xff]  ;;  %v251_v19 = vld [vmem:[#allocation3 + $0x8] sm:$0xff]  ;;  %v3464_v20 = vld [vmem:[%s4442_s1 + $0x40] sm:$0xff]  ;;  %vm2840_vm8 = vcmask 523712   ;;  %vm2844_vm9 = vcmask 589312   ;;  %vm2848_vm10 = vcmask 654912  }
  0x11   :  { %v252_v28 = vld [vmem:[#allocation3 + $0x10] sm:$0xff]  ;;  %v253_v29 = vld [vmem:[#allocation3 + $0x18] sm:$0xff]  ;;  %v254_v39 = vld [vmem:[#allocation3 + $0x20] sm:$0xff]  ;;  %vm2852_vm11 = vcmask 720512   ;;  %vm4447_vm12 = vcmask 786112   ;;  %vm2860_vm13 = vcmask 851712  }
  0x12   :  { %v255_v40 = vld [vmem:[#allocation3 + $0x28] sm:$0xff]  ;;  %v3465_v43 = vld [vmem:[%s4442_s1 + $0x48] sm:$0xff]  ;;  %v256_v62 = vld [vmem:[#allocation3 + $0x30] sm:$0xff]  ;;  %vm2864_vm14 = vcmask 917312   ;;  %vm2868_vm15 = vcmask 982912   ;;  %s3580_s17 = smov [#allocation8]  }
  0x13   :  { %v257_v63 = vld [vmem:[#allocation3 + $0x38] sm:$0xff]  ;;  %s3186_s18 = sshll.u32 %s3580_s17, 4  ;;  %s3188_s21 = sshll.u32 %s4446_s5, 4  ;;  %s3187_s18 = int_to_ptr.vmem [resolvable:$true] %s3186_s18  ;;  %s3189_s21 = int_to_ptr.hbm [resolvable:$true] %s3188_s21 }
  0x14   :  { %v541_v2 = vld.sshfl [vmem:[#allocation1] sm:$0xff pattern:$0x73625140]  ;;  %v542_v3 = vld.sshfl [vmem:[#allocation1 + $0x8] sm:$0xff pattern:$0x73625140] }
  0x15   :  { %v641_v4 = vsel %vm640_vm0, %v541_v2, 0  ;;  %v643_v5 = vsel %vm640_vm0, %v542_v3, 0  ;;  %1370 = vst [vmem:[#allocation1] ss:$4 sm:$0xff] %v3391_v1 }
  0x16   :  { %652 = vmatpush.bf16.msra.mxu0 %v641_v4  ;;  %821 = vmatpush.bf16.msra.mxu1 %v643_v5  ;;  %v258_v5 = vld [vmem:[#allocation3 + $0x40] sm:$0xff] }
  0x19   :  { %3327 = vmatmul.msk.bf16.vlgmr.msra.gmra.mxu0 %vm543_vm1, %v3456_v6  ;;  %3359 = vmatmul.msk.bf16.vlgmr.msra.gmra.mxu1 %vm543_vm1, %v3456_v6 }
  0x1c   :  { %v1371_v7 = vld.sshfl [vmem:[#allocation1] sm:$0xff pattern:$0x73625140]  ;;  %v1372_v8 = vld.sshfl [vmem:[#allocation1 + $0x8] sm:$0xff pattern:$0x73625140] }
  0x1d   :  { %v1373_v9 = vsel %vm640_vm0, %v1371_v7, 0  ;;  %v1375_v10 = vsel %vm640_vm0, %v1372_v8, 0  ;;  %vm2872_vm0 = vcmask 1048512  }
  0x1e   :  { %1384 = vmatpush.bf16.msra.mxu2 %v1373_v9  ;;  %1553 = vmatpush.bf16.msra.mxu3 %v1375_v10  ;;  %v3466_v9 = vld [vmem:[%s4442_s1 + $0x50] sm:$0xff] }
  0x21   :  { %3392 = vmatmul.msk.bf16.vlgmr.msra.gmra.mxu2 %vm543_vm1, %v3456_v6  ;;  %3424 = vmatmul.msk.bf16.vlgmr.msra.gmra.mxu3 %vm543_vm1, %v3456_v6  ;;  %v259_v6 = vld [vmem:[#allocation3 + $0x48] sm:$0xff] }
  0x29   :  { %3328 = vmatmul.msk.bf16.gmra.mxu0 %vm543_vm1, %v3457_v11  ;;  %3360 = vmatmul.msk.bf16.gmra.mxu1 %vm543_vm1, %v3457_v11 }
  0x31   :  { %3393 = vmatmul.msk.bf16.gmra.mxu2 %vm543_vm1, %v3457_v11  ;;  %3425 = vmatmul.msk.bf16.gmra.mxu3 %vm543_vm1, %v3457_v11 }
  0x39   :  { %3329 = vmatmul.msk.bf16.gmra.mxu0 %vm543_vm1, %v3458_v12  ;;  %3361 = vmatmul.msk.bf16.gmra.mxu1 %vm543_vm1, %v3458_v12 }
  0x41   :  { %3394 = vmatmul.msk.bf16.gmra.mxu2 %vm543_vm1, %v3458_v12  ;;  %3426 = vmatmul.msk.bf16.gmra.mxu3 %vm543_vm1, %v3458_v12 }
  0x49   :  { %3330 = vmatmul.msk.bf16.gmra.mxu0 %vm543_vm1, %v3459_v13  ;;  %3362 = vmatmul.msk.bf16.gmra.mxu1 %vm543_vm1, %v3459_v13 }
  0x51   :  { %3395 = vmatmul.msk.bf16.gmra.mxu2 %vm543_vm1, %v3459_v13  ;;  %3427 = vmatmul.msk.bf16.gmra.mxu3 %vm543_vm1, %v3459_v13 }
  0x59   :  { %3331 = vmatmul.msk.bf16.gmra.mxu0 %vm543_vm1, %v3460_v14  ;;  %3363 = vmatmul.msk.bf16.gmra.mxu1 %vm543_vm1, %v3460_v14 }
  0x61   :  { %3396 = vmatmul.msk.bf16.gmra.mxu2 %vm543_vm1, %v3460_v14  ;;  %3428 = vmatmul.msk.bf16.gmra.mxu3 %vm543_vm1, %v3460_v14 }
  0x69   :  { %3332 = vmatmul.msk.bf16.gmra.mxu0 %vm543_vm1, %v3461_v15  ;;  %3364 = vmatmul.msk.bf16.gmra.mxu1 %vm543_vm1, %v3461_v15 }
  0x71   :  { %3397 = vmatmul.msk.bf16.gmra.mxu2 %vm543_vm1, %v3461_v15  ;;  %3429 = vmatmul.msk.bf16.gmra.mxu3 %vm543_vm1, %v3461_v15 }
  0x79   :  { %3333 = vmatmul.msk.bf16.gmra.mxu0 %vm543_vm1, %v3462_v16  ;;  %3365 = vmatmul.msk.bf16.gmra.mxu1 %vm543_vm1, %v3462_v16 }
  0x81   :  { %3398 = vmatmul.msk.bf16.gmra.mxu2 %vm543_vm1, %v3462_v16  ;;  %3430 = vmatmul.msk.bf16.gmra.mxu3 %vm543_vm1, %v3462_v16 }
  0x89   :  { %3334 = vmatmul.msk.bf16.gmra.mxu0 %vm543_vm1, %v3463_v17  ;;  %3366 = vmatmul.msk.bf16.gmra.mxu1 %vm543_vm1, %v3463_v17 }
  0x91   :  { %3399 = vmatmul.msk.bf16.gmra.mxu2 %vm543_vm1, %v3463_v17  ;;  %3431 = vmatmul.msk.bf16.gmra.mxu3 %vm543_vm1, %v3463_v17 }
  0x96   :  { %v654_v21 = vpop.f32.mrf.mxu0  ;;  %v823_v22 = vpop.f32.mrf.mxu1 }
  0x97   :  { %v655_v23 = vadd.f32 %v654_v21, %v250_v18  ;;  %v824_v24 = vadd.f32 %v823_v22, %v251_v19 }
  0x99   :  { %v983_v25 = vmax.f32 %v655_v23, 0.0  ;;  %v984_v26 = vmax.f32 %v824_v24, 0.0  ;;  %3335 = vmatmul.msk.bf16.gmra.mxu0 %vm543_vm1, %v3464_v20  ;;  %3367 = vmatmul.msk.bf16.gmra.mxu1 %vm543_vm1, %v3464_v20 }
  0x9b   :  { %v1111_v27 = vadd.f32 %v984_v26, %v983_v25 }
  0x9d   :  { %2231 = vadd.xlane.f32.xlu0 %v1111_v27 }
  0x9e   :  { %v656_v30 = vpop.f32.mrf.mxu0  ;;  %v825_v31 = vpop.f32.mrf.mxu1 }
  0x9f   :  { %v657_v32 = vadd.f32 %v656_v30, %v252_v28  ;;  %v826_v33 = vadd.f32 %v825_v31, %v253_v29  ;;  %v262_v31 = vld [vmem:[#allocation3 + $0x60] sm:$0xff] }
  0xa1   :  { %v985_v34 = vmax.f32 %v657_v32, 0.0  ;;  %v986_v35 = vmax.f32 %v826_v33, 0.0  ;;  %3400 = vmatmul.msk.bf16.gmra.mxu2 %vm543_vm1, %v3464_v20  ;;  %3432 = vmatmul.msk.bf16.gmra.mxu3 %vm543_vm1, %v3464_v20  ;;  %v263_v32 = vld [vmem:[#allocation3 + $0x68] sm:$0xff] }
  0xa3   :  { %v1112_v36 = vadd.f32 %v986_v35, %v985_v34  ;;  %v260_v35 = vld [vmem:[#allocation3 + $0x50] sm:$0xff] }
  0xa4   :  { %v1386_v37 = vpop.f32.mrf.mxu2  ;;  %v1555_v38 = vpop.f32.mrf.mxu3 }
  0xa5   :  { %v1387_v41 = vadd.f32 %v1386_v37, %v250_v18  ;;  %v1556_v42 = vadd.f32 %v1555_v38, %v251_v19  ;;  %2233 = vadd.xlane.f32.xlu0 %v1112_v36  ;;  %v261_v36 = vld [vmem:[#allocation3 + $0x58] sm:$0xff] }
  0xa6   :  { %v659_v44 = vpop.f32.mrf.mxu0  ;;  %v828_v45 = vpop.f32.mrf.mxu1 }
  0xa7   :  { %v1715_v46 = vmax.f32 %v1387_v41, 0.0  ;;  %v1716_v47 = vmax.f32 %v1556_v42, 0.0  ;;  %v660_v48 = vadd.f32 %v659_v44, %v254_v39  ;;  %v829_v49 = vadd.f32 %v828_v45, %v255_v40 }
  0xa9   :  { %v987_v50 = vmax.f32 %v660_v48, 0.0  ;;  %v988_v51 = vmax.f32 %v829_v49, 0.0  ;;  %3336 = vmatmul.msk.bf16.gmra.mxu0 %vm543_vm1, %v3465_v43  ;;  %3368 = vmatmul.msk.bf16.gmra.mxu1 %vm543_vm1, %v3465_v43  ;;  %v1843_v53 = vadd.f32 %v1716_v47, %v1715_v46 }
  0xab   :  { %v1113_v52 = vadd.f32 %v988_v51, %v987_v50 }
  0xac   :  { %v1388_v54 = vpop.f32.mrf.mxu2  ;;  %v1557_v55 = vpop.f32.mrf.mxu3 }
  0xad   :  { %v1389_v56 = vadd.f32 %v1388_v54, %v252_v28  ;;  %v1558_v57 = vadd.f32 %v1557_v55, %v253_v29  ;;  %2235 = vadd.xlane.f32.xlu1 %v1113_v52  ;;  %2359 = vadd.xlane.f32.xlu0 %v1843_v53 }
  0xae   :  { %v661_v58 = vpop.f32.mrf.mxu0  ;;  %v830_v59 = vpop.f32.mrf.mxu1 }
  0xaf   :  { %v1717_v60 = vmax.f32 %v1389_v56, 0.0  ;;  %v1718_v61 = vmax.f32 %v1558_v57, 0.0  ;;  %v662_v0 = vadd.f32 %v661_v58, %v256_v62  ;;  %v831_v1 = vadd.f32 %v830_v59, %v257_v63  ;;  %v264_v57 = vld [vmem:[#allocation3 + $0x70] sm:$0xff]  ;;  %v265_v58 = vld [vmem:[#allocation3 + $0x78] sm:$0xff] }
  0xb1   :  { %3401 = vmatmul.msk.bf16.gmra.mxu2 %vm543_vm1, %v3465_v43  ;;  %3433 = vmatmul.msk.bf16.gmra.mxu3 %vm543_vm1, %v3465_v43  ;;  %v1844_v2 = vadd.f32 %v1718_v61, %v1717_v60  ;;  %v989_v10 = vmax.f32 %v662_v0, 0.0  ;;  %v990_v11 = vmax.f32 %v831_v1, 0.0 }
  0xb3   :  { %v1114_v21 = vadd.f32 %v990_v11, %v989_v10 }
  0xb4   :  { %v1391_v3 = vpop.f32.mrf.mxu2  ;;  %v1560_v4 = vpop.f32.mrf.mxu3 }
  0xb5   :  { %v1392_v7 = vadd.f32 %v1391_v3, %v254_v39  ;;  %v1561_v8 = vadd.f32 %v1560_v4, %v255_v40  ;;  %2361 = vadd.xlane.f32.xlu1 %v1844_v2  ;;  %v3467_v39 = vld [vmem:[%s4442_s1 + $0x58] sm:$0xff] }
  0xb6   :  { %v664_v12 = vpop.f32.mrf.mxu0  ;;  %v833_v13 = vpop.f32.mrf.mxu1 }
  0xb7   :  { %v1719_v14 = vmax.f32 %v1392_v7, 0.0  ;;  %v1720_v15 = vmax.f32 %v1561_v8, 0.0  ;;  %v665_v16 = vadd.f32 %v664_v12, %v258_v5  ;;  %v834_v17 = vadd.f32 %v833_v13, %v259_v6  ;;  %v266_v7 = vld [vmem:[#allocation3 + $0x80] sm:$0xff]  ;;  %v267_v8 = vld [vmem:[#allocation3 + $0x88] sm:$0xff]  ;;  %v3468_v13 = vld [vmem:[%s4442_s1 + $0x60] sm:$0xff] }
  0xb9   :  { %3337 = vmatmul.msk.bf16.gmra.mxu0 %vm543_vm1, %v3466_v9  ;;  %3369 = vmatmul.msk.bf16.gmra.mxu1 %vm543_vm1, %v3466_v9  ;;  %v1845_v18 = vadd.f32 %v1720_v15, %v1719_v14  ;;  %v991_v19 = vmax.f32 %v665_v16, 0.0  ;;  %v992_v20 = vmax.f32 %v834_v17, 0.0 }
  0xbb   :  { %2363 = vadd.xlane.f32.xlu2 %v1845_v18  ;;  %v1115_v26 = vadd.f32 %v992_v20, %v991_v19 }
  0xbc   :  { %v1393_v22 = vpop.f32.mrf.mxu2  ;;  %v1562_v23 = vpop.f32.mrf.mxu3 }
  0xbd   :  { %2237 = vadd.xlane.f32.xlu1 %v1114_v21  ;;  %v1394_v27 = vadd.f32 %v1393_v22, %v256_v62  ;;  %v1563_v28 = vadd.f32 %v1562_v23, %v257_v63 }
  0xbe   :  { %v666_v24 = vpop.f32.mrf.mxu0  ;;  %v835_v25 = vpop.f32.mrf.mxu1 }
  0xbf   :  { %v1721_v33 = vmax.f32 %v1394_v27, 0.0  ;;  %v1722_v34 = vmax.f32 %v1563_v28, 0.0  ;;  %v667_v46 = vadd.f32 %v666_v24, %v260_v35  ;;  %v836_v47 = vadd.f32 %v835_v25, %v261_v36  ;;  %v269_v27 = vld [vmem:[#allocation3 + $0x98] sm:$0xff] }
  0xc1   :  { %3402 = vmatmul.msk.bf16.gmra.mxu2 %vm543_vm1, %v3466_v9  ;;  %3434 = vmatmul.msk.bf16.gmra.mxu3 %vm543_vm1, %v3466_v9  ;;  %v1846_v50 = vadd.f32 %v1722_v34, %v1721_v33  ;;  %v993_v53 = vmax.f32 %v667_v46, 0.0  ;;  %v994_v54 = vmax.f32 %v836_v47, 0.0  ;;  %v3469_v47 = vld [vmem:[%s4442_s1 + $0x68] sm:$0xff] }
  0xc3   :  { %2239 = vadd.xlane.f32.xlu2 %v1115_v26  ;;  %v1116_v63 = vadd.f32 %v994_v54, %v993_v53  ;;  %v268_v26 = vld [vmem:[#allocation3 + $0x90] sm:$0xff] }
  0xc4   :  { %v1396_v29 = vpop.f32.mrf.mxu2  ;;  %v1565_v30 = vpop.f32.mrf.mxu3 }
  0xc5   :  { %v1397_v37 = vadd.f32 %v1396_v29, %v258_v5  ;;  %v1566_v38 = vadd.f32 %v1565_v30, %v259_v6 }
  0xc6   :  { %v669_v40 = vpop.f32.mrf.mxu0  ;;  %v838_v41 = vpop.f32.mrf.mxu1 }
  0xc7   :  { %v1723_v42 = vmax.f32 %v1397_v37, 0.0  ;;  %v1724_v43 = vmax.f32 %v1566_v38, 0.0  ;;  %v670_v44 = vadd.f32 %v669_v40, %v262_v31  ;;  %v839_v45 = vadd.f32 %v838_v41, %v263_v32 }
  0xc9   :  { %v995_v48 = vmax.f32 %v670_v44, 0.0  ;;  %v996_v49 = vmax.f32 %v839_v45, 0.0  ;;  %3338 = vmatmul.msk.bf16.gmra.mxu0 %vm543_vm1, %v3467_v39  ;;  %3370 = vmatmul.msk.bf16.gmra.mxu1 %vm543_vm1, %v3467_v39  ;;  %v1847_v51 = vadd.f32 %v1724_v43, %v1723_v42  ;;  %v270_v43 = vld [vmem:[#allocation3 + $0xa0] sm:$0xff]  ;;  %v271_v44 = vld [vmem:[#allocation3 + $0xa8] sm:$0xff] }
  0xcb   :  { %2365 = vadd.xlane.f32.xlu2 %v1846_v50  ;;  %2367 = vadd.xlane.f32.xlu1 %v1847_v51  ;;  %v1117_v52 = vadd.f32 %v996_v49, %v995_v48 }
  0xcc   :  { %v1398_v55 = vpop.f32.mrf.mxu2  ;;  %v1567_v56 = vpop.f32.mrf.mxu3 }
  0xcd   :  { %2243 = vadd.xlane.f32.xlu0 %v1117_v52  ;;  %v1399_v0 = vadd.f32 %v1398_v55, %v260_v35  ;;  %v1568_v1 = vadd.f32 %v1567_v56, %v261_v36 }
  0xce   :  { %v671_v59 = vpop.f32.mrf.mxu0  ;;  %v840_v60 = vpop.f32.mrf.mxu1 }
  0xcf   :  { %v672_v61 = vadd.f32 %v671_v59, %v264_v57  ;;  %v841_v62 = vadd.f32 %v840_v60, %v265_v58  ;;  %v1725_v9 = vmax.f32 %v1399_v0, 0.0  ;;  %v1726_v10 = vmax.f32 %v1568_v1, 0.0  ;;  %v272_v60 = vld [vmem:[#allocation3 + $0xb0] sm:$0xff] }
  0xd1   :  { %v997_v2 = vmax.f32 %v672_v61, 0.0  ;;  %v998_v3 = vmax.f32 %v841_v62, 0.0  ;;  %3403 = vmatmul.msk.bf16.gmra.mxu2 %vm543_vm1, %v3467_v39  ;;  %3435 = vmatmul.msk.bf16.gmra.mxu3 %vm543_vm1, %v3467_v39  ;;  %v1848_v20 = vadd.f32 %v1726_v10, %v1725_v9  ;;  %v273_v61 = vld [vmem:[#allocation3 + $0xb8] sm:$0xff] }
  0xd3   :  { %2241 = vadd.xlane.f32.xlu2 %v1116_v63  ;;  %v1118_v4 = vadd.f32 %v998_v3, %v997_v2 }
  0xd4   :  { %v1401_v5 = vpop.f32.mrf.mxu2  ;;  %v1570_v6 = vpop.f32.mrf.mxu3 }
  0xd5   :  { %v1402_v11 = vadd.f32 %v1401_v5, %v262_v31  ;;  %v1571_v12 = vadd.f32 %v1570_v6, %v263_v32  ;;  %2245 = vadd.xlane.f32.xlu1 %v1118_v4 }
  0xd6   :  { %v674_v14 = vpop.f32.mrf.mxu0  ;;  %v843_v15 = vpop.f32.mrf.mxu1 }
  0xd7   :  { %v1727_v16 = vmax.f32 %v1402_v11, 0.0  ;;  %v1728_v17 = vmax.f32 %v1571_v12, 0.0  ;;  %v675_v18 = vadd.f32 %v674_v14, %v266_v7  ;;  %v844_v19 = vadd.f32 %v843_v15, %v267_v8  ;;  %v274_v12 = vld [vmem:[#allocation3 + $0xc0] sm:$0xff] }
  0xd9   :  { %3339 = vmatmul.msk.bf16.gmra.mxu0 %vm543_vm1, %v3468_v13  ;;  %3371 = vmatmul.msk.bf16.gmra.mxu1 %vm543_vm1, %v3468_v13  ;;  %v1849_v21 = vadd.f32 %v1728_v17, %v1727_v16  ;;  %v999_v22 = vmax.f32 %v675_v18, 0.0  ;;  %v1000_v23 = vmax.f32 %v844_v19, 0.0  ;;  %v3470_v16 = vld [vmem:[%s4442_s1 + $0x70] sm:$0xff] }
  0xdb   :  { %2369 = vadd.xlane.f32.xlu2 %v1848_v20  ;;  %2371 = vadd.xlane.f32.xlu0 %v1849_v21  ;;  %v1119_v32 = vadd.f32 %v1000_v23, %v999_v22 }
  0xdc   :  { %v1403_v24 = vpop.f32.mrf.mxu2  ;;  %v1572_v25 = vpop.f32.mrf.mxu3 }
  0xdd   :  { %v1404_v28 = vadd.f32 %v1403_v24, %v264_v57  ;;  %v1573_v29 = vadd.f32 %v1572_v25, %v265_v58 }
  0xde   :  { %v676_v30 = vpop.f32.mrf.mxu0  ;;  %v845_v31 = vpop.f32.mrf.mxu1 }
  0xdf   :  { %v1729_v33 = vmax.f32 %v1404_v28, 0.0  ;;  %v1730_v34 = vmax.f32 %v1573_v29, 0.0  ;;  %v677_v35 = vadd.f32 %v676_v30, %v268_v26  ;;  %v846_v36 = vadd.f32 %v845_v31, %v269_v27  ;;  %v276_v29 = vld [vmem:[#allocation3 + $0xd0] sm:$0xff]  ;;  %v277_v30 = vld [vmem:[#allocation3 + $0xd8] sm:$0xff] }
  0xe1   :  { %v1001_v37 = vmax.f32 %v677_v35, 0.0  ;;  %v1002_v38 = vmax.f32 %v846_v36, 0.0  ;;  %3404 = vmatmul.msk.bf16.gmra.mxu2 %vm543_vm1, %v3468_v13  ;;  %3436 = vmatmul.msk.bf16.gmra.mxu3 %vm543_vm1, %v3468_v13  ;;  %v1850_v39 = vadd.f32 %v1730_v34, %v1729_v33  ;;  %v275_v13 = vld [vmem:[#allocation3 + $0xc8] sm:$0xff]  ;;  %v2662_v33 = vld [vmem:[#allocation6 + $0x178] sm:$0xff] }
  0xe2   :  { %3140 = vmatpush.msrb.mxu2 %v2662_v33 }
  0xe3   :  { %2247 = vadd.xlane.f32.xlu2 %v1119_v32  ;;  %2373 = vadd.xlane.f32.xlu1 %v1850_v39  ;;  %v1120_v40 = vadd.f32 %v1002_v38, %v1001_v37 }
  0xe4   :  { %v1406_v41 = vpop.f32.mrf.mxu2  ;;  %v1575_v42 = vpop.f32.mrf.mxu3 }
  0xe5   :  { %v1407_v45 = vadd.f32 %v1406_v41, %v266_v7  ;;  %v1576_v46 = vadd.f32 %v1575_v42, %v267_v8  ;;  %2249 = vadd.xlane.f32.xlu0 %v1120_v40  ;;  %v2630_v40 = vld [vmem:[#allocation6 + $0x78] sm:$0xff] }
  0xe6   :  { %v679_v48 = vpop.f32.mrf.mxu0  ;;  %v848_v49 = vpop.f32.mrf.mxu1  ;;  %v2678_v41 = vld [vmem:[#allocation6 + $0x1f8] sm:$0xff]  ;;  %3100 = vmatpush.msrb.mxu0 %v2630_v40 }
  0xe7   :  { %v1731_v50 = vmax.f32 %v1407_v45, 0.0  ;;  %v1732_v51 = vmax.f32 %v1576_v46, 0.0  ;;  %v680_v52 = vadd.f32 %v679_v48, %v270_v43  ;;  %v849_v53 = vadd.f32 %v848_v49, %v271_v44  ;;  %3160 = vmatpush.msrb.mxu3 %v2678_v41  ;;  %v2646_v45 = vld [vmem:[#allocation6 + $0xf8] sm:$0xff]  ;;  %v278_v49 = vld [vmem:[#allocation3 + $0xe0] sm:$0xff] }
  0xe8   :  { %3120 = vmatpush.msrb.mxu1 %v2646_v45  ;;  %v284_v45 = vld [vmem:[#allocation3 + $0x110] sm:$0xff] }
  0xe9   :  { %v1003_v54 = vmax.f32 %v680_v52, 0.0  ;;  %v1004_v55 = vmax.f32 %v849_v53, 0.0  ;;  %3340 = vmatmul.msk.bf16.gmra.mxu0 %vm543_vm1, %v3469_v47  ;;  %3372 = vmatmul.msk.bf16.gmra.mxu1 %vm543_vm1, %v3469_v47  ;;  %v1851_v56 = vadd.f32 %v1732_v51, %v1731_v50  ;;  %v279_v50 = vld [vmem:[#allocation3 + $0xe8] sm:$0xff]  ;;  %v3471_v53 = vld [vmem:[%s4442_s1 + $0x78] sm:$0xff] }
  0xeb   :  { %2375 = vadd.xlane.f32.xlu2 %v1851_v56  ;;  %v1121_v57 = vadd.f32 %v1004_v55, %v1003_v54 }
  0xec   :  { %v1408_v58 = vpop.f32.mrf.mxu2  ;;  %v1577_v59 = vpop.f32.mrf.mxu3 }
  0xed   :  { %v1409_v62 = vadd.f32 %v1408_v58, %v268_v26  ;;  %v1578_v63 = vadd.f32 %v1577_v59, %v269_v27  ;;  %2251 = vadd.xlane.f32.xlu1 %v1121_v57 }
  0xee   :  { %v681_v0 = vpop.f32.mrf.mxu0  ;;  %v850_v1 = vpop.f32.mrf.mxu1 }
  0xef   :  { %v1733_v2 = vmax.f32 %v1409_v62, 0.0  ;;  %v1734_v3 = vmax.f32 %v1578_v63, 0.0  ;;  %v682_v4 = vadd.f32 %v681_v0, %v272_v60  ;;  %v851_v5 = vadd.f32 %v850_v1, %v273_v61 }
  0xf1   :  { %v1005_v6 = vmax.f32 %v682_v4, 0.0  ;;  %v1006_v7 = vmax.f32 %v851_v5, 0.0  ;;  %3405 = vmatmul.msk.bf16.gmra.mxu2 %vm543_vm1, %v3469_v47  ;;  %3437 = vmatmul.msk.bf16.gmra.mxu3 %vm543_vm1, %v3469_v47  ;;  %v1852_v8 = vadd.f32 %v1734_v3, %v1733_v2  ;;  %v280_v2 = vld [vmem:[#allocation3 + $0xf0] sm:$0xff]  ;;  %v281_v3 = vld [vmem:[#allocation3 + $0xf8] sm:$0xff] }
  0xf3   :  { %2377 = vadd.xlane.f32.xlu0 %v1852_v8  ;;  %v1122_v9 = vadd.f32 %v1006_v7, %v1005_v6  ;;  %v2811_v8 = vlaneseq }
  0xf4   :  { %v1411_v10 = vpop.f32.mrf.mxu2  ;;  %v1580_v11 = vpop.f32.mrf.mxu3 }
  0xf5   :  { %v1412_v14 = vadd.f32 %v1411_v10, %v270_v43  ;;  %v1581_v15 = vadd.f32 %v1580_v11, %v271_v44  ;;  %2253 = vadd.xlane.f32.xlu2 %v1122_v9 }
  0xf6   :  { %v684_v17 = vpop.f32.mrf.mxu0  ;;  %v853_v18 = vpop.f32.mrf.mxu1 }
  0xf7   :  { %v1735_v19 = vmax.f32 %v1412_v14, 0.0  ;;  %v1736_v20 = vmax.f32 %v1581_v15, 0.0  ;;  %v685_v21 = vadd.f32 %v684_v17, %v274_v12  ;;  %v854_v22 = vadd.f32 %v853_v18, %v275_v13 }
  0xf8   :  { %v3739_v17 = vand.u32 127, %v2811_v8 }
  0xf9   :  { %v1007_v23 = vmax.f32 %v685_v21, 0.0  ;;  %v1008_v24 = vmax.f32 %v854_v22, 0.0  ;;  %3341 = vmatmul.msk.bf16.gmra.mxu0 %vm543_vm1, %v3470_v16  ;;  %3373 = vmatmul.msk.bf16.gmra.mxu1 %vm543_vm1, %v3470_v16  ;;  %v1853_v25 = vadd.f32 %v1736_v20, %v1735_v19  ;;  %v3741_v21 = vld [vmem:[#allocation3 + $0x100] sm:$0xff]  ;;  %v3743_v22 = vld [vmem:[#allocation3 + $0x108] sm:$0xff] }
  0xfb   :  { %2379 = vadd.xlane.f32.xlu1 %v1853_v25  ;;  %v1123_v26 = vadd.f32 %v1008_v24, %v1007_v23  ;;  %v3472_v25 = vld [vmem:[%s4442_s1 + $0x80] sm:$0xff] }
  0xfc   :  { %v1413_v27 = vpop.f32.mrf.mxu2  ;;  %v1582_v28 = vpop.f32.mrf.mxu3 }
  0xfd   :  { %v1414_v31 = vadd.f32 %v1413_v27, %v272_v60  ;;  %v1583_v32 = vadd.f32 %v1582_v28, %v273_v61  ;;  %2255 = vadd.xlane.f32.xlu0 %v1123_v26 }
  0xfe   :  { %v686_v34 = vpop.f32.mrf.mxu0  ;;  %v855_v35 = vpop.f32.mrf.mxu1 }
  0xff   :  { %v1737_v36 = vmax.f32 %v1414_v31, 0.0  ;;  %v1738_v37 = vmax.f32 %v1583_v32, 0.0  ;;  %v687_v38 = vadd.f32 %v686_v34, %v276_v29  ;;  %v856_v39 = vadd.f32 %v855_v35, %v277_v30 }
 0x101   :  { %v1009_v42 = vmax.f32 %v687_v38, 0.0  ;;  %v1010_v43 = vmax.f32 %v856_v39, 0.0  ;;  %3406 = vmatmul.msk.bf16.gmra.mxu2 %vm543_vm1, %v3470_v16  ;;  %3438 = vmatmul.msk.bf16.gmra.mxu3 %vm543_vm1, %v3470_v16  ;;  %v1854_v44 = vadd.f32 %v1738_v37, %v1737_v36 }
 0x103   :  { %2381 = vadd.xlane.f32.xlu2 %v1854_v44  ;;  %v1124_v46 = vadd.f32 %v1010_v43, %v1009_v42  ;;  %v2661_v42 = vld [vmem:[#allocation6 + $0x170] sm:$0xff] }
 0x104   :  { %v1416_v47 = vpop.f32.mrf.mxu2  ;;  %v1585_v48 = vpop.f32.mrf.mxu3  ;;  %3141 = vmatpush.msrb.mxu2 %v2661_v42 }
 0x105   :  { %v1417_v51 = vadd.f32 %v1416_v47, %v274_v12  ;;  %v1586_v52 = vadd.f32 %v1585_v48, %v275_v13  ;;  %2257 = vadd.xlane.f32.xlu1 %v1124_v46  ;;  %v285_v46 = vld [vmem:[#allocation3 + $0x118] sm:$0xff] }
 0x106   :  { %v689_v54 = vpop.f32.mrf.mxu0  ;;  %v858_v55 = vpop.f32.mrf.mxu1 }
 0x107   :  { %v1739_v56 = vmax.f32 %v1417_v51, 0.0  ;;  %v1740_v57 = vmax.f32 %v1586_v52, 0.0  ;;  %v690_v58 = vadd.f32 %v689_v54, %v278_v49  ;;  %v859_v59 = vadd.f32 %v858_v55, %v279_v50 }
 0x108   :  { %v3759_v52 = vadd.s32 4294967280, %v3739_v17 }
 0x109   :  { %v1011_v60 = vmax.f32 %v690_v58, 0.0  ;;  %v1012_v61 = vmax.f32 %v859_v59, 0.0  ;;  %3342 = vmatmul.msk.bf16.gmra.mxu0 %vm543_vm1, %v3471_v53  ;;  %3374 = vmatmul.msk.bf16.gmra.mxu1 %vm543_vm1, %v3471_v53  ;;  %v1855_v62 = vadd.f32 %v1740_v57, %v1739_v56  ;;  %v2629_v57 = vld [vmem:[#allocation6 + $0x70] sm:$0xff] }
 0x10a   :  { %v2677_v58 = vld [vmem:[#allocation6 + $0x1f0] sm:$0xff]  ;;  %3101 = vmatpush.msrb.mxu0 %v2629_v57 }
 0x10b   :  { %2383 = vadd.xlane.f32.xlu0 %v1855_v62  ;;  %v1125_v63 = vadd.f32 %v1012_v61, %v1011_v60  ;;  %3161 = vmatpush.msrb.mxu3 %v2677_v58 }
 0x10c   :  { %v1418_v0 = vpop.f32.mrf.mxu2  ;;  %v1587_v1 = vpop.f32.mrf.mxu3 }
 0x10d   :  { %v1419_v4 = vadd.f32 %v1418_v0, %v276_v29  ;;  %v1588_v5 = vadd.f32 %v1587_v1, %v277_v30  ;;  %2259 = vadd.xlane.f32.xlu2 %v1125_v63  ;;  %v3749_v29 = vadd.s32 4294967288, %v3739_v17 }
 0x10e   :  { %v691_v6 = vpop.f32.mrf.mxu0  ;;  %v860_v7 = vpop.f32.mrf.mxu1 }
 0x10f   :  { %v1741_v9 = vmax.f32 %v1419_v4, 0.0  ;;  %v1742_v10 = vmax.f32 %v1588_v5, 0.0  ;;  %v692_v11 = vadd.f32 %v691_v6, %v280_v2  ;;  %v861_v12 = vadd.f32 %v860_v7, %v281_v3  ;;  %v2645_v5 = vld [vmem:[#allocation6 + $0xf0] sm:$0xff] }
 0x110   :  { %v2232_v13 = vpop.xlane.xlu0 %2231  ;;  %3121 = vmatpush.msrb.mxu1 %v2645_v5 }
 0x111   :  { %v1013_v14 = vmax.f32 %v692_v11, 0.0  ;;  %v1014_v15 = vmax.f32 %v861_v12, 0.0  ;;  %3407 = vmatmul.msk.bf16.gmra.mxu2 %vm543_vm1, %v3471_v53  ;;  %3439 = vmatmul.msk.bf16.gmra.mxu3 %vm543_vm1, %v3471_v53  ;;  %v1856_v16 = vadd.f32 %v1742_v10, %v1741_v9  ;;  %v2487_v26 = vmul.f32 0.00390625, %v2232_v13  ;;  %v286_v9 = vld [vmem:[#allocation3 + $0x120] sm:$0xff]  ;;  %v287_v10 = vld [vmem:[#allocation3 + $0x128] sm:$0xff] }
 0x112   :  { %v3473_v11 = vld [vmem:[%s4442_s1 + $0x88] sm:$0xff] }
 0x113   :  { %2385 = vadd.xlane.f32.xlu1 %v1856_v16  ;;  %v1126_v18 = vadd.f32 %v1014_v15, %v1013_v14  ;;  %v2813_v39 = vperm.slane %v2487_v26, %v3739_v17 }
 0x114   :  { %v1421_v19 = vpop.f32.mrf.mxu2  ;;  %v1590_v20 = vpop.f32.mrf.mxu3 }
 0x115   :  { %v1422_v23 = vadd.f32 %v1421_v19, %v278_v49  ;;  %v1591_v24 = vadd.f32 %v1590_v20, %v279_v50  ;;  %2261 = vadd.xlane.f32.xlu0 %v1126_v18 }
 0x116   :  { %v694_v27 = vpop.f32.mrf.mxu0  ;;  %v863_v28 = vpop.f32.mrf.mxu1 }
 0x117   :  { %v1743_v30 = vmax.f32 %v1422_v23, 0.0  ;;  %v1744_v31 = vmax.f32 %v1591_v24, 0.0  ;;  %v695_v32 = vadd.f32 %v694_v27, %v3741_v21  ;;  %v864_v33 = vadd.f32 %v863_v28, %v3743_v22 }
 0x118   :  { %v2234_v34 = vpop.xlane.xlu0 %2233 }
 0x119   :  { %v1015_v35 = vmax.f32 %v695_v32, 0.0  ;;  %v1016_v36 = vmax.f32 %v864_v33, 0.0  ;;  %v2488_v37 = vmul.f32 0.00390625, %v2234_v34  ;;  %3343 = vmatmul.msk.bf16.gmra.mxu0 %vm543_vm1, %v3472_v25  ;;  %3375 = vmatmul.msk.bf16.gmra.mxu1 %vm543_vm1, %v3472_v25  ;;  %v1857_v38 = vadd.f32 %v1744_v31, %v1743_v30  ;;  %v288_v33 = vld [vmem:[#allocation3 + $0x130] sm:$0xff] }
 0x11b   :  { %v2815_v40 = vperm.slane %v2488_v37, %v3749_v29  ;;  %2387 = vadd.xlane.f32.xlu2 %v1857_v38  ;;  %v1127_v41 = vadd.f32 %v1016_v36, %v1015_v35  ;;  %v289_v36 = vld [vmem:[#allocation3 + $0x138] sm:$0xff] }
 0x11c   :  { %v1423_v43 = vpop.f32.mrf.mxu2  ;;  %v1592_v44 = vpop.f32.mrf.mxu3 }
 0x11d   :  { %v2817_v47 = vsel %vm2816_vm2, %v2815_v40, %v2813_v39  ;;  %v1424_v48 = vadd.f32 %v1423_v43, %v280_v2  ;;  %v1593_v49 = vadd.f32 %v1592_v44, %v281_v3  ;;  %2263 = vadd.xlane.f32.xlu1 %v1127_v41  ;;  %v3776_v41 = vadd.s32 4294967272, %v3739_v17 }
 0x11e   :  { %v696_v50 = vpop.f32.mrf.mxu0  ;;  %v865_v51 = vpop.f32.mrf.mxu1 }
 0x11f   :  { %v1745_v53 = vmax.f32 %v1424_v48, 0.0  ;;  %v1746_v54 = vmax.f32 %v1593_v49, 0.0  ;;  %v697_v55 = vadd.f32 %v696_v50, %v284_v45  ;;  %v866_v56 = vadd.f32 %v865_v51, %v285_v46 }
 0x120   :  { %v2236_v59 = vpop.xlane.xlu1 %2235  ;;  %v2360_v1 = vpop.xlane.xlu0 %2359 }
 0x121   :  { %v1017_v60 = vmax.f32 %v697_v55, 0.0  ;;  %v1018_v61 = vmax.f32 %v866_v56, 0.0  ;;  %v2489_v62 = vmul.f32 0.00390625, %v2236_v59  ;;  %3408 = vmatmul.msk.bf16.gmra.mxu2 %vm543_vm1, %v3472_v25  ;;  %3440 = vmatmul.msk.bf16.gmra.mxu3 %vm543_vm1, %v3472_v25  ;;  %v1858_v63 = vadd.f32 %v1746_v54, %v1745_v53  ;;  %v3785_v55 = vld [vmem:[#allocation3 + $0x140] sm:$0xff] }
 0x122   :  { %v2551_v14 = vmul.f32 0.00390625, %v2360_v1  ;;  %v3788_v56 = vadd.s32 4294967264, %v3739_v17 }
 0x123   :  { %v2819_v0 = vperm.slane %v2489_v62, %v3759_v52  ;;  %v1128_v2 = vadd.f32 %v1018_v61, %v1017_v60  ;;  %2389 = vadd.xlane.f32.xlu0 %v1858_v63  ;;  %v3791_v61 = vld [vmem:[#allocation3 + $0x148] sm:$0xff] }
 0x124   :  { %v1426_v3 = vpop.f32.mrf.mxu2  ;;  %v1595_v4 = vpop.f32.mrf.mxu3  ;;  %v3474_v62 = vld [vmem:[%s4442_s1 + $0x90] sm:$0xff] }
 0x125   :  { %v2821_v6 = vsel %vm2820_vm3, %v2819_v0, %v2817_v47  ;;  %v1427_v7 = vadd.f32 %v1426_v3, %v3741_v21  ;;  %v1596_v8 = vadd.f32 %v1595_v4, %v3743_v22  ;;  %2265 = vadd.xlane.f32.xlu2 %v1128_v2  ;;  %v2967_v22 = vperm.slane %v2551_v14, %v3739_v17 }
 0x126   :  { %v699_v12 = vpop.f32.mrf.mxu0  ;;  %v868_v13 = vpop.f32.mrf.mxu1 }
 0x127   :  { %v1747_v15 = vmax.f32 %v1427_v7, 0.0  ;;  %v1748_v16 = vmax.f32 %v1596_v8, 0.0  ;;  %v700_v18 = vadd.f32 %v699_v12, %v286_v9  ;;  %v869_v19 = vadd.f32 %v868_v13, %v287_v10 }
 0x128   :  { %v2362_v20 = vpop.xlane.xlu1 %2361 }
 0x129   :  { %v2552_v23 = vmul.f32 0.00390625, %v2362_v20  ;;  %3344 = vmatmul.msk.bf16.gmra.mxu0 %vm543_vm1, %v3473_v11  ;;  %3376 = vmatmul.msk.bf16.gmra.mxu1 %vm543_vm1, %v3473_v11  ;;  %v1859_v21 = vadd.f32 %v1748_v16, %v1747_v15  ;;  %v1019_v25 = vmax.f32 %v700_v18, 0.0  ;;  %v1020_v26 = vmax.f32 %v869_v19, 0.0  ;;  %v3804_v18 = vld [vmem:[#allocation3 + $0x150] sm:$0xff]  ;;  %v2660_v19 = vld [vmem:[#allocation6 + $0x168] sm:$0xff] }
 0x12a   :  { %3142 = vmatpush.msrb.mxu2 %v2660_v19  ;;  %v3842_v19 = vld [vmem:[#allocation3 + $0x178] sm:$0xff] }
 0x12b   :  { %v2968_v24 = vperm.slane %v2552_v23, %v3749_v29  ;;  %2391 = vadd.xlane.f32.xlu0 %v1859_v21  ;;  %v1129_v44 = vadd.f32 %v1020_v26, %v1019_v25  ;;  %v3806_v23 = vld [vmem:[#allocation3 + $0x158] sm:$0xff] }
 0x12c   :  { %v1428_v27 = vpop.f32.mrf.mxu2  ;;  %v1597_v28 = vpop.f32.mrf.mxu3 }
 0x12d   :  { %v2969_v30 = vsel %vm2816_vm2, %v2968_v24, %v2967_v22  ;;  %v1429_v31 = vadd.f32 %v1428_v27, %v284_v45  ;;  %v1598_v32 = vadd.f32 %v1597_v28, %v285_v46 }
 0x12e   :  { %v2364_v34 = vpop.xlane.xlu2 %2363  ;;  %v701_v35 = vpop.f32.mrf.mxu0 }
 0x12f   :  { %v1749_v37 = vmax.f32 %v1429_v31, 0.0  ;;  %v1750_v38 = vmax.f32 %v1598_v32, 0.0  ;;  %v2553_v39 = vmul.f32 0.00390625, %v2364_v34  ;;  %v870_v40 = vpop.f32.mrf.mxu1  ;;  %v702_v42 = vadd.f32 %v701_v35, %v288_v33  ;;  %v2676_v31 = vld [vmem:[#allocation6 + $0x1e8] sm:$0xff] }
 0x130   :  { %v2238_v43 = vpop.xlane.xlu1 %2237  ;;  %v871_v48 = vadd.f32 %v870_v40, %v289_v36  ;;  %3162 = vmatpush.msrb.mxu3 %v2676_v31  ;;  %v2644_v40 = vld [vmem:[#allocation6 + $0xe8] sm:$0xff]  ;;  %v3850_v31 = vadd.s32 4294967240, %v3739_v17 }
 0x131   :  { %v2970_v47 = vperm.slane %v2553_v39, %v3759_v52  ;;  %v2490_v49 = vmul.f32 0.00390625, %v2238_v43  ;;  %3409 = vmatmul.msk.bf16.gmra.mxu2 %vm543_vm1, %v3473_v11  ;;  %3441 = vmatmul.msk.bf16.gmra.mxu3 %vm543_vm1, %v3473_v11  ;;  %v1860_v45 = vadd.f32 %v1750_v38, %v1749_v37  ;;  %v1021_v51 = vmax.f32 %v702_v42, 0.0 }
 0x132   :  { %v1022_v57 = vmax.f32 %v871_v48, 0.0  ;;  %v3820_v48 = vadd.s32 4294967256, %v3739_v17  ;;  %3122 = vmatpush.msrb.mxu1 %v2644_v40 }
 0x133   :  { %v3782_v46 = vsel %vm2820_vm3, %v2970_v47, %v2969_v30  ;;  %v2823_v50 = vperm.slane %v2490_v49, %v3776_v41  ;;  %2393 = vadd.xlane.f32.xlu1 %v1860_v45  ;;  %2267 = vadd.xlane.f32.xlu0 %v1129_v44  ;;  %v2628_v30 = vld [vmem:[#allocation6 + $0x68] sm:$0xff]  ;;  %v3817_v47 = vld [vmem:[#allocation3 + $0x160] sm:$0xff]  ;;  %v3823_v49 = vadd.s32 4294967248, %v3739_v17 }
 0x134   :  { %v1431_v53 = vpop.f32.mrf.mxu2  ;;  %v1600_v54 = vpop.f32.mrf.mxu3  ;;  %3102 = vmatpush.msrb.mxu0 %v2628_v30 }
 0x135   :  { %v2825_v58 = vsel %vm2824_vm4, %v2823_v50, %v2821_v6  ;;  %v1432_v59 = vadd.f32 %v1431_v53, %v286_v9  ;;  %v1601_v60 = vadd.f32 %v1600_v54, %v287_v10  ;;  %v1130_v9 = vadd.f32 %v1022_v57, %v1021_v51  ;;  %v295_v54 = vld [vmem:[#allocation3 + $0x168] sm:$0xff]  ;;  %v3475_v57 = vld [vmem:[%s4442_s1 + $0x98] sm:$0xff] }
 0x136   :  { %v704_v63 = vpop.f32.mrf.mxu0  ;;  %v2240_v0 = vpop.xlane.xlu2 %2239 }
 0x137   :  { %v1751_v1 = vmax.f32 %v1432_v59, 0.0  ;;  %v1752_v2 = vmax.f32 %v1601_v60, 0.0  ;;  %v705_v3 = vadd.f32 %v704_v63, %v3785_v55  ;;  %v873_v4 = vpop.f32.mrf.mxu1  ;;  %v2491_v5 = vmul.f32 0.00390625, %v2240_v0 }
 0x138   :  { %v874_v7 = vadd.f32 %v873_v4, %v3791_v61 }
 0x139   :  { %v2827_v6 = vperm.slane %v2491_v5, %v3788_v56  ;;  %3345 = vmatmul.msk.bf16.gmra.mxu0 %vm543_vm1, %v3474_v62  ;;  %3377 = vmatmul.msk.bf16.gmra.mxu1 %vm543_vm1, %v3474_v62  ;;  %v1861_v8 = vadd.f32 %v1752_v2, %v1751_v1  ;;  %v1023_v10 = vmax.f32 %v705_v3, 0.0 }
 0x13a   :  { %v1024_v11 = vmax.f32 %v874_v7, 0.0 }
 0x13b   :  { %v3802_v12 = vsel %vm2828_vm5, %v2827_v6, %v2825_v58  ;;  %2395 = vadd.xlane.f32.xlu2 %v1861_v8  ;;  %2269 = vadd.xlane.f32.xlu1 %v1130_v9 }
 0x13c   :  { %v1433_v13 = vpop.f32.mrf.mxu2  ;;  %v1602_v14 = vpop.f32.mrf.mxu3  ;;  %v1131_v28 = vadd.f32 %v1024_v11, %v1023_v10 }
 0x13d   :  { %v1434_v15 = vadd.f32 %v1433_v13, %v288_v33  ;;  %v1603_v16 = vadd.f32 %v1602_v14, %v289_v36 }
 0x13e   :  { %v706_v20 = vpop.f32.mrf.mxu0  ;;  %v2366_v21 = vpop.xlane.xlu2 %2365 }
 0x13f   :  { %v1753_v22 = vmax.f32 %v1434_v15, 0.0  ;;  %v1754_v24 = vmax.f32 %v1603_v16, 0.0  ;;  %v875_v25 = vpop.f32.mrf.mxu1  ;;  %v2554_v26 = vmul.f32 0.00390625, %v2366_v21  ;;  %v2368_v27 = vpop.xlane.xlu1 %2367  ;;  %v707_v32 = vadd.f32 %v706_v20, %v3804_v18  ;;  %v3840_v15 = vld [vmem:[#allocation3 + $0x170] sm:$0xff] }
 0x140   :  { %v2555_v33 = vmul.f32 0.00390625, %v2368_v27  ;;  %v876_v34 = vadd.f32 %v875_v25, %v3806_v23  ;;  %v2244_v37 = vpop.xlane.xlu0 %2243 }
 0x141   :  { %v2972_v35 = vperm.slane %v2554_v26, %v3776_v41  ;;  %3410 = vmatmul.msk.bf16.gmra.mxu2 %vm543_vm1, %v3474_v62  ;;  %3442 = vmatmul.msk.bf16.gmra.mxu3 %vm543_vm1, %v3474_v62  ;;  %v1862_v36 = vadd.f32 %v1754_v24, %v1753_v22  ;;  %v2493_v45 = vmul.f32 0.00390625, %v2244_v37  ;;  %v1025_v50 = vmax.f32 %v707_v32, 0.0 }
 0x142   :  { %v2974_v38 = vperm.slane %v2555_v33, %v3788_v56  ;;  %v1026_v51 = vmax.f32 %v876_v34, 0.0 }
 0x143   :  { %v2973_v39 = vsel %vm2824_vm4, %v2972_v35, %v3782_v46  ;;  %2271 = vadd.xlane.f32.xlu2 %v1131_v28  ;;  %2397 = vadd.xlane.f32.xlu0 %v1862_v36  ;;  %v2835_v3 = vperm.slane %v2493_v45, %v3823_v49 }
 0x144   :  { %v2975_v42 = vsel %vm2828_vm5, %v2974_v38, %v2973_v39  ;;  %v1436_v43 = vpop.f32.mrf.mxu2  ;;  %v1605_v44 = vpop.f32.mrf.mxu3  ;;  %v1132_v4 = vadd.f32 %v1026_v51, %v1025_v50  ;;  %v3857_v38 = vld [vmem:[#allocation3 + $0x180] sm:$0xff]  ;;  %v3860_v39 = vadd.s32 4294967232, %v3739_v17  ;;  %v3863_v50 = vld [vmem:[#allocation3 + $0x188] sm:$0xff] }
 0x145   :  { %v1437_v46 = vadd.f32 %v1436_v43, %v3785_v55  ;;  %v1606_v53 = vadd.f32 %v1605_v44, %v3791_v61 }
 0x146   :  { %v709_v58 = vpop.f32.mrf.mxu0  ;;  %v2242_v59 = vpop.xlane.xlu2 %2241 }
 0x147   :  { %v1755_v60 = vmax.f32 %v1437_v46, 0.0  ;;  %v1756_v62 = vmax.f32 %v1606_v53, 0.0  ;;  %v710_v63 = vadd.f32 %v709_v58, %v3817_v47  ;;  %v878_v0 = vpop.f32.mrf.mxu1  ;;  %v2492_v1 = vmul.f32 0.00390625, %v2242_v59 }
 0x148   :  { %v879_v2 = vadd.f32 %v878_v0, %v295_v54  ;;  %v2246_v11 = vpop.xlane.xlu1 %2245 }
 0x149   :  { %v2831_v55 = vperm.slane %v2492_v1, %v3820_v48  ;;  %3346 = vmatmul.msk.bf16.gmra.mxu0 %vm543_vm1, %v3475_v57  ;;  %3378 = vmatmul.msk.bf16.gmra.mxu1 %vm543_vm1, %v3475_v57  ;;  %v1863_v61 = vadd.f32 %v1756_v62, %v1755_v60  ;;  %v1027_v5 = vmax.f32 %v710_v63, 0.0  ;;  %v2494_v32 = vmul.f32 0.00390625, %v2246_v11 }
 0x14a   :  { %v1028_v7 = vmax.f32 %v879_v2, 0.0 }
 0x14b   :  { %v2833_v6 = vsel %vm2832_vm6, %v2831_v55, %v3802_v12  ;;  %2399 = vadd.xlane.f32.xlu1 %v1863_v61  ;;  %2273 = vadd.xlane.f32.xlu0 %v1132_v4  ;;  %v2839_v51 = vperm.slane %v2494_v32, %v3850_v31  ;;  %v2643_v32 = vld [vmem:[#allocation6 + $0xe0] sm:$0xff] }
 0x14c   :  { %v2837_v8 = vsel %vm2836_vm7, %v2835_v3, %v2833_v6  ;;  %v1438_v9 = vpop.f32.mrf.mxu2  ;;  %v1607_v10 = vpop.f32.mrf.mxu3  ;;  %v1133_v26 = vadd.f32 %v1028_v7, %v1027_v5  ;;  %3123 = vmatpush.msrb.mxu1 %v2643_v32 }
 0x14d   :  { %v1439_v13 = vadd.f32 %v1438_v9, %v3804_v18  ;;  %v1608_v14 = vadd.f32 %v1607_v10, %v3806_v23  ;;  %v2841_v55 = vsel %vm2840_vm8, %v2839_v51, %v2837_v8  ;;  %v2659_v8 = vld [vmem:[#allocation6 + $0x160] sm:$0xff]  ;;  %v303_v51 = vld [vmem:[#allocation3 + $0x1a8] sm:$0xff] }
 0x14e   :  { %v711_v16 = vpop.f32.mrf.mxu0  ;;  %v2370_v20 = vpop.xlane.xlu2 %2369  ;;  %3143 = vmatpush.msrb.mxu2 %v2659_v8 }
 0x14f   :  { %v1757_v21 = vmax.f32 %v1439_v13, 0.0  ;;  %v1758_v22 = vmax.f32 %v1608_v14, 0.0  ;;  %v880_v12 = vpop.f32.mrf.mxu1  ;;  %v2556_v24 = vmul.f32 0.00390625, %v2370_v20  ;;  %v2372_v25 = vpop.xlane.xlu0 %2371  ;;  %v712_v27 = vadd.f32 %v711_v16, %v3840_v15  ;;  %v300_v16 = vld [vmem:[#allocation3 + $0x190] sm:$0xff] }
 0x150   :  { %v2557_v28 = vmul.f32 0.00390625, %v2372_v25  ;;  %v881_v30 = vadd.f32 %v880_v12, %v3842_v19 }
 0x151   :  { %v2976_v18 = vperm.slane %v2556_v24, %v3820_v48  ;;  %3411 = vmatmul.msk.bf16.gmra.mxu2 %vm543_vm1, %v3475_v57  ;;  %3443 = vmatmul.msk.bf16.gmra.mxu3 %vm543_vm1, %v3475_v57  ;;  %v1864_v23 = vadd.f32 %v1758_v22, %v1757_v21  ;;  %v1029_v40 = vmax.f32 %v712_v27, 0.0  ;;  %v3870_v57 = vadd.s32 4294967224, %v3739_v17  ;;  %v301_v21 = vld [vmem:[#allocation3 + $0x198] sm:$0xff]  ;;  %v2627_v27 = vld [vmem:[#allocation6 + $0x60] sm:$0xff] }
 0x152   :  { %v2978_v33 = vperm.slane %v2557_v28, %v3823_v49  ;;  %v1030_v43 = vmax.f32 %v881_v30, 0.0  ;;  %v2675_v28 = vld [vmem:[#allocation6 + $0x1e0] sm:$0xff]  ;;  %3103 = vmatpush.msrb.mxu0 %v2627_v27 }
 0x153   :  { %v2977_v34 = vsel %vm2832_vm6, %v2976_v18, %v2975_v42  ;;  %2401 = vadd.xlane.f32.xlu2 %v1864_v23  ;;  %2275 = vadd.xlane.f32.xlu1 %v1133_v26  ;;  %v3476_v42 = vld [vmem:[%s4442_s1 + $0xa0] sm:$0xff] }
 0x154   :  { %v3855_v35 = vsel %vm2836_vm7, %v2978_v33, %v2977_v34  ;;  %v1441_v36 = vpop.f32.mrf.mxu2  ;;  %v1610_v37 = vpop.f32.mrf.mxu3  ;;  %v1134_v2 = vadd.f32 %v1030_v43, %v1029_v40  ;;  %3163 = vmatpush.msrb.mxu3 %v2675_v28 }
 0x155   :  { %v1442_v44 = vadd.f32 %v1441_v36, %v3817_v47  ;;  %v1611_v45 = vadd.f32 %v1610_v37, %v295_v54  ;;  %v302_v37 = vld [vmem:[#allocation3 + $0x1a0] sm:$0xff] }
 0x156   :  { %v714_v46 = vpop.f32.mrf.mxu0  ;;  %v2248_v53 = vpop.xlane.xlu2 %2247 }
 0x157   :  { %v1759_v58 = vmax.f32 %v1442_v44, 0.0  ;;  %v1760_v59 = vmax.f32 %v1611_v45, 0.0  ;;  %v715_v60 = vadd.f32 %v714_v46, %v3857_v38  ;;  %v883_v47 = vpop.f32.mrf.mxu1  ;;  %v2495_v54 = vmul.f32 0.00390625, %v2248_v53  ;;  %v2374_v10 = vpop.xlane.xlu1 %2373 }
 0x158   :  { %v884_v62 = vadd.f32 %v883_v47, %v3863_v50  ;;  %v2250_v63 = vpop.xlane.xlu0 %2249  ;;  %v2558_v30 = vmul.f32 0.00390625, %v2374_v10  ;;  %v305_v10 = vld [vmem:[#allocation3 + $0x1b8] sm:$0xff] }
 0x159   :  { %v2843_v0 = vperm.slane %v2495_v54, %v3860_v39  ;;  %v2496_v1 = vmul.f32 0.00390625, %v2250_v63  ;;  %3347 = vmatmul.msk.bf16.gmra.mxu0 %vm543_vm1, %v3476_v42  ;;  %3379 = vmatmul.msk.bf16.gmra.mxu1 %vm543_vm1, %v3476_v42  ;;  %v1865_v3 = vadd.f32 %v1760_v59, %v1759_v58  ;;  %v1031_v61 = vmax.f32 %v715_v60, 0.0 }
 0x15a   :  { %v1032_v4 = vmax.f32 %v884_v62, 0.0  ;;  %v2980_v33 = vperm.slane %v2558_v30, %v3850_v31 }
 0x15b   :  { %v2845_v5 = vsel %vm2844_vm9, %v2843_v0, %v2841_v55  ;;  %v2847_v7 = vperm.slane %v2496_v1, %v3870_v57  ;;  %2277 = vadd.xlane.f32.xlu2 %v1134_v2  ;;  %2403 = vadd.xlane.f32.xlu0 %v1865_v3 }
 0x15c   :  { %v1443_v6 = vpop.f32.mrf.mxu2  ;;  %v1612_v9 = vpop.f32.mrf.mxu3  ;;  %v1135_v26 = vadd.f32 %v1032_v4, %v1031_v61  ;;  %v2981_v63 = vsel %vm2840_vm8, %v2980_v33, %v3855_v35 }
 0x15d   :  { %v3881_v11 = vsel %vm2848_vm10, %v2847_v7, %v2845_v5  ;;  %v1444_v13 = vadd.f32 %v1443_v6, %v3840_v15  ;;  %v1613_v14 = vadd.f32 %v1612_v9, %v3842_v19  ;;  %v304_v6 = vld [vmem:[#allocation3 + $0x1b0] sm:$0xff] }
 0x15e   :  { %v716_v20 = vpop.f32.mrf.mxu0  ;;  %v2376_v25 = vpop.xlane.xlu2 %2375 }
 0x15f   :  { %v1761_v22 = vmax.f32 %v1444_v13, 0.0  ;;  %v1762_v12 = vmax.f32 %v1613_v14, 0.0  ;;  %v885_v24 = vpop.f32.mrf.mxu1  ;;  %v717_v18 = vadd.f32 %v716_v20, %v300_v16  ;;  %v2559_v19 = vmul.f32 0.00390625, %v2376_v25 }
 0x160   :  { %v886_v23 = vadd.f32 %v885_v24, %v301_v21  ;;  %v3905_v25 = vpop.xlane.xlu1 %2251 }
 0x161   :  { %3412 = vmatmul.msk.bf16.gmra.mxu2 %vm543_vm1, %v3476_v42  ;;  %3444 = vmatmul.msk.bf16.gmra.mxu3 %vm543_vm1, %v3476_v42  ;;  %v1866_v15 = vadd.f32 %v1762_v12, %v1761_v22  ;;  %v1033_v40 = vmax.f32 %v717_v18, 0.0  ;;  %v3477_v42 = vld [vmem:[%s4442_s1 + $0xa8] sm:$0xff]  ;;  %v2982_v46 = vperm.slane %v2559_v19, %v3860_v39 }
 0x162   :  { %v1034_v43 = vmax.f32 %v886_v23, 0.0  ;;  %v307_v23 = vld [vmem:[#allocation3 + $0x1c8] sm:$0xff] }
 0x163   :  { %2405 = vadd.xlane.f32.xlu1 %v1866_v15  ;;  %2279 = vadd.xlane.f32.xlu0 %v1135_v26  ;;  %v2983_v2 = vsel %vm2844_vm9, %v2982_v46, %v2981_v63  ;;  %v306_v26 = vld [vmem:[#allocation3 + $0x1c0] sm:$0xff]  ;;  %v3478_v15 = vld [vmem:[%s4442_s1 + $0xb0] sm:$0xff]  ;;  %v309_v63 = vld [vmem:[#allocation3 + $0x1d8] sm:$0xff] }
 0x164   :  { %v1446_v34 = vpop.f32.mrf.mxu2  ;;  %v1615_v36 = vpop.f32.mrf.mxu3  ;;  %v1136_v1 = vadd.f32 %v1034_v43, %v1033_v40 }
 0x165   :  { %v1447_v44 = vadd.f32 %v1446_v34, %v3857_v38  ;;  %v1616_v45 = vadd.f32 %v1615_v36, %v3863_v50 }
 0x166   :  { %v719_v53 = vpop.f32.mrf.mxu0  ;;  %v2378_v58 = vpop.xlane.xlu0 %2377 }
 0x167   :  { %v1763_v59 = vmax.f32 %v1447_v44, 0.0  ;;  %v1764_v60 = vmax.f32 %v1616_v45, 0.0  ;;  %v720_v47 = vadd.f32 %v719_v53, %v302_v37  ;;  %v888_v54 = vpop.f32.mrf.mxu1  ;;  %v2560_v62 = vmul.f32 0.00390625, %v2378_v58 }
 0x168   :  { %v889_v38 = vadd.f32 %v888_v54, %v303_v51  ;;  %v3910_v32 = vpop.xlane.xlu2 %2253  ;;  %v3914_v54 = vld [vmem:[#allocation3 + $0x1d0] sm:$0xff] }
 0x169   :  { %v2984_v50 = vperm.slane %v2560_v62, %v3870_v57  ;;  %3348 = vmatmul.msk.bf16.gmra.mxu0 %vm543_vm1, %v3477_v42  ;;  %3380 = vmatmul.msk.bf16.gmra.mxu1 %vm543_vm1, %v3477_v42  ;;  %v1867_v0 = vadd.f32 %v1764_v60, %v1763_v59  ;;  %v1035_v3 = vmax.f32 %v720_v47, 0.0  ;;  %v2658_v60 = vld [vmem:[#allocation6 + $0x158] sm:$0xff] }
 0x16a   :  { %v1036_v55 = vmax.f32 %v889_v38, 0.0  ;;  %3144 = vmatpush.msrb.mxu2 %v2658_v60 }
 0x16b   :  { %v3901_v61 = vsel %vm2848_vm10, %v2984_v50, %v2983_v2  ;;  %2407 = vadd.xlane.f32.xlu2 %v1867_v0  ;;  %2281 = vadd.xlane.f32.xlu1 %v1136_v1 }
 0x16c   :  { %v1448_v4 = vpop.f32.mrf.mxu2  ;;  %v1617_v35 = vpop.f32.mrf.mxu3  ;;  %v1137_v20 = vadd.f32 %v1036_v55, %v1035_v3  ;;  %v2626_v3 = vld [vmem:[#allocation6 + $0x58] sm:$0xff] }
 0x16d   :  { %v1449_v5 = vadd.f32 %v1448_v4, %v300_v16  ;;  %v1618_v7 = vadd.f32 %v1617_v35, %v301_v21  ;;  %v2674_v55 = vld [vmem:[#allocation6 + $0x1d8] sm:$0xff]  ;;  %3104 = vmatpush.msrb.mxu0 %v2626_v3 }
 0x16e   :  { %v721_v9 = vpop.f32.mrf.mxu0  ;;  %v2380_v45 = vpop.xlane.xlu1 %2379  ;;  %3164 = vmatpush.msrb.mxu3 %v2674_v55 }
 0x16f   :  { %v1765_v13 = vmax.f32 %v1449_v5, 0.0  ;;  %v1766_v14 = vmax.f32 %v1618_v7, 0.0  ;;  %v890_v8 = vpop.f32.mrf.mxu1  ;;  %v722_v22 = vadd.f32 %v721_v9, %v304_v6  ;;  %v2642_v7 = vld [vmem:[#allocation6 + $0xd8] sm:$0xff] }
 0x170   :  { %v891_v12 = vadd.f32 %v890_v8, %v305_v10  ;;  %v2256_v47 = vpop.xlane.xlu0 %2255  ;;  %3124 = vmatpush.msrb.mxu1 %v2642_v7 }
 0x171   :  { %3413 = vmatmul.msk.bf16.gmra.mxu2 %vm543_vm1, %v3477_v42  ;;  %3445 = vmatmul.msk.bf16.gmra.mxu3 %vm543_vm1, %v3477_v42  ;;  %v1868_v24 = vadd.f32 %v1766_v14, %v1765_v13  ;;  %v1037_v27 = vmax.f32 %v722_v22, 0.0  ;;  %v3921_v13 = vld [vmem:[#allocation3 + $0x1e0] sm:$0xff] }
 0x172   :  { %v1038_v28 = vmax.f32 %v891_v12, 0.0  ;;  %v3923_v12 = vld [vmem:[#allocation3 + $0x1e8] sm:$0xff] }
 0x173   :  { %2283 = vadd.xlane.f32.xlu2 %v1137_v20  ;;  %2409 = vadd.xlane.f32.xlu0 %v1868_v24  ;;  %v3479_v24 = vld [vmem:[%s4442_s1 + $0xb8] sm:$0xff] }
 0x174   :  { %v1451_v16 = vpop.f32.mrf.mxu2  ;;  %v1620_v21 = vpop.f32.mrf.mxu3 }
 0x175   :  { %v1452_v30 = vadd.f32 %v1451_v16, %v302_v37  ;;  %v1621_v18 = vadd.f32 %v1620_v21, %v303_v51  ;;  %v1138_v37 = vadd.f32 %v1038_v28, %v1037_v27 }
 0x176   :  { %v724_v19 = vpop.f32.mrf.mxu0  ;;  %v2382_v38 = vpop.xlane.xlu2 %2381 }
 0x177   :  { %v1767_v33 = vmax.f32 %v1452_v30, 0.0  ;;  %v1768_v34 = vmax.f32 %v1621_v18, 0.0  ;;  %v725_v36 = vadd.f32 %v724_v19, %v306_v26  ;;  %v893_v40 = vpop.f32.mrf.mxu1  ;;  %v3930_v19 = vadd.s32 4294967216, %v3739_v17 }
 0x178   :  { %v894_v43 = vadd.f32 %v893_v40, %v307_v23  ;;  %v2498_v40 = vmul.f32 0.00390625, %v3910_v32 }
 0x179   :  { %3349 = vmatmul.msk.bf16.gmra.mxu0 %vm543_vm1, %v3478_v15  ;;  %3381 = vmatmul.msk.bf16.gmra.mxu1 %vm543_vm1, %v3478_v15  ;;  %v1869_v44 = vadd.f32 %v1768_v34, %v1767_v33  ;;  %v1039_v51 = vmax.f32 %v725_v36, 0.0  ;;  %v3937_v36 = vadd.s32 4294967208, %v3739_v17 }
 0x17a   :  { %v1040_v42 = vmax.f32 %v894_v43, 0.0  ;;  %v2561_v43 = vmul.f32 0.00390625, %v2380_v45 }
 0x17b   :  { %2411 = vadd.xlane.f32.xlu1 %v1869_v44  ;;  %2285 = vadd.xlane.f32.xlu0 %v1138_v37  ;;  %v3941_v44 = vadd.s32 4294967200, %v3739_v17  ;;  %v2499_v37 = vmul.f32 0.00390625, %v2256_v47  ;;  %v2855_v60 = vperm.slane %v2498_v40, %v3937_v36 }
 0x17c   :  { %v1453_v46 = vpop.f32.mrf.mxu2  ;;  %v1622_v53 = vpop.f32.mrf.mxu3  ;;  %v1139_v2 = vadd.f32 %v1040_v42, %v1039_v51  ;;  %v2986_v47 = vperm.slane %v2561_v43, %v3930_v19 }
 0x17d   :  { %v1454_v58 = vadd.f32 %v1453_v46, %v304_v6  ;;  %v1623_v59 = vadd.f32 %v1622_v53, %v305_v10  ;;  %v3919_v6 = vpop.xlane.xlu1 %2257  ;;  %v2562_v53 = vmul.f32 0.00390625, %v2382_v38  ;;  %v2859_v3 = vperm.slane %v2499_v37, %v3941_v44 }
 0x17e   :  { %v726_v62 = vpop.f32.mrf.mxu0  ;;  %v2384_v16 = vpop.xlane.xlu0 %2383 }
 0x17f   :  { %v1769_v50 = vmax.f32 %v1454_v58, 0.0  ;;  %v1770_v0 = vmax.f32 %v1623_v59, 0.0  ;;  %v895_v1 = vpop.f32.mrf.mxu1  ;;  %v727_v4 = vadd.f32 %v726_v62, %v3914_v54  ;;  %v3948_v62 = vadd.s32 4294967192, %v3739_v17 }
 0x180   :  { %v896_v35 = vadd.f32 %v895_v1, %v309_v63  ;;  %v2260_v27 = vpop.xlane.xlu2 %2259  ;;  %v3953_v1 = vld [vmem:[#allocation3 + $0x1f0] sm:$0xff]  ;;  %v2988_v7 = vperm.slane %v2562_v53, %v3937_v36 }
 0x181   :  { %3414 = vmatmul.msk.bf16.gmra.mxu2 %vm543_vm1, %v3478_v15  ;;  %3446 = vmatmul.msk.bf16.gmra.mxu3 %vm543_vm1, %v3478_v15  ;;  %v1870_v5 = vadd.f32 %v1770_v0, %v1769_v50  ;;  %v1041_v14 = vmax.f32 %v727_v4, 0.0  ;;  %v3951_v50 = vadd.s32 4294967184, %v3739_v17 }
 0x182   :  { %v1042_v8 = vmax.f32 %v896_v35, 0.0 }
 0x183   :  { %2413 = vadd.xlane.f32.xlu2 %v1870_v5  ;;  %2287 = vadd.xlane.f32.xlu1 %v1139_v2  ;;  %v3955_v2 = vld [vmem:[#allocation3 + $0x1f8] sm:$0xff] }
 0x184   :  { %v1456_v9 = vpop.f32.mrf.mxu2  ;;  %v1625_v10 = vpop.f32.mrf.mxu3  ;;  %v1140_v33 = vadd.f32 %v1042_v8, %v1041_v14 }
 0x185   :  { %v1457_v20 = vadd.f32 %v1456_v9, %v306_v26  ;;  %v1626_v22 = vadd.f32 %v1625_v10, %v307_v23  ;;  %v2497_v26 = vmul.f32 0.00390625, %v3905_v25  ;;  %v2500_v9 = vmul.f32 0.00390625, %v3919_v6 }
 0x186   :  { %v729_v21 = vpop.f32.mrf.mxu0  ;;  %v2386_v42 = vpop.xlane.xlu1 %2385  ;;  %v2563_v10 = vmul.f32 0.00390625, %v2384_v16  ;;  %v3971_v16 = vadd.s32 4294967176, %v3739_v17 }
 0x187   :  { %v1771_v28 = vmax.f32 %v1457_v20, 0.0  ;;  %v1772_v30 = vmax.f32 %v1626_v22, 0.0  ;;  %v730_v18 = vadd.f32 %v729_v21, %v3921_v13  ;;  %v898_v15 = vpop.f32.mrf.mxu1  ;;  %v2851_v46 = vperm.slane %v2497_v26, %v3930_v19 }
 0x188   :  { %v899_v23 = vadd.f32 %v898_v15, %v3923_v12  ;;  %v2262_v0 = vpop.xlane.xlu0 %2261  ;;  %v2501_v21 = vmul.f32 0.00390625, %v2260_v27  ;;  %v2863_v15 = vperm.slane %v2500_v9, %v3948_v62  ;;  %v2990_v27 = vperm.slane %v2563_v10, %v3941_v44 }
 0x189   :  { %3350 = vmatmul.msk.bf16.gmra.mxu0 %vm543_vm1, %v3479_v24  ;;  %3382 = vmatmul.msk.bf16.gmra.mxu1 %vm543_vm1, %v3479_v24  ;;  %v1871_v34 = vadd.f32 %v1772_v30, %v1771_v28  ;;  %v1043_v51 = vmax.f32 %v730_v18, 0.0  ;;  %v2853_v5 = vsel %vm2852_vm11, %v2851_v46, %v3881_v11  ;;  %v2564_v28 = vmul.f32 0.00390625, %v2386_v42 }
 0x18a   :  { %v1044_v25 = vmax.f32 %v899_v23, 0.0  ;;  %v2857_v22 = vsel %vm4447_vm12, %v2855_v60, %v2853_v5  ;;  %v2987_v30 = vsel %vm2852_vm11, %v2986_v47, %v3901_v61  ;;  %v2502_v26 = vmul.f32 0.00390625, %v2262_v0 }
 0x18b   :  { %2289 = vadd.xlane.f32.xlu2 %v1140_v33  ;;  %2415 = vadd.xlane.f32.xlu0 %v1871_v34  ;;  %v2861_v6 = vsel %vm2860_vm13, %v2859_v3, %v2857_v22  ;;  %v3976_v34 = vld [vmem:[#allocation3 + $0x200] sm:$0xff]  ;;  %v2867_v42 = vperm.slane %v2501_v21, %v3951_v50  ;;  %v2992_v46 = vperm.slane %v2564_v28, %v3948_v62 }
 0x18c   :  { %v1458_v58 = vpop.f32.mrf.mxu2  ;;  %v1627_v59 = vpop.f32.mrf.mxu3  ;;  %v1141_v35 = vadd.f32 %v1044_v25, %v1043_v51  ;;  %v3980_v51 = vld [vmem:[#allocation3 + $0x208] sm:$0xff]  ;;  %v3480_v25 = vld [vmem:[%s4442_s1 + $0xc0] sm:$0xff]  ;;  %v2871_v0 = vperm.slane %v2502_v26, %v3971_v16  ;;  %v2865_v5 = vsel %vm2864_vm14, %v2863_v15, %v2861_v6  ;;  %v2657_v6 = vld [vmem:[#allocation6 + $0x150] sm:$0xff] }
 0x18d   :  { %v1459_v32 = vadd.f32 %v1458_v58, %v3914_v54  ;;  %v1628_v45 = vadd.f32 %v1627_v59, %v309_v63  ;;  %3145 = vmatpush.msrb.mxu2 %v2657_v6 }
 0x18e   :  { %v731_v38 = vpop.f32.mrf.mxu0  ;;  %v2388_v4 = vpop.xlane.xlu2 %2387 }
 0x18f   :  { %v1773_v54 = vmax.f32 %v1459_v32, 0.0  ;;  %v1774_v63 = vmax.f32 %v1628_v45, 0.0  ;;  %v900_v55 = vpop.f32.mrf.mxu1  ;;  %v732_v14 = vadd.f32 %v731_v38, %v3953_v1  ;;  %v2565_v11 = vmul.f32 0.00390625, %v2388_v4 }
 0x190   :  { %v901_v8 = vadd.f32 %v900_v55, %v3955_v2  ;;  %v2264_v18 = vpop.xlane.xlu1 %2263 }
 0x191   :  { %3415 = vmatmul.msk.bf16.gmra.mxu2 %vm543_vm1, %v3479_v24  ;;  %3447 = vmatmul.msk.bf16.gmra.mxu3 %vm543_vm1, %v3479_v24  ;;  %v1872_v20 = vadd.f32 %v1774_v63, %v1773_v54  ;;  %v2989_v24 = vsel %vm4447_vm12, %v2988_v7, %v2987_v30  ;;  %v1045_v61 = vmax.f32 %v732_v14, 0.0  ;;  %v2994_v53 = vperm.slane %v2565_v11, %v3951_v50  ;;  %v4003_v11 = vld [vmem:[#allocation3 + $0x210] sm:$0xff] }
 0x192   :  { %v1046_v40 = vmax.f32 %v901_v8, 0.0  ;;  %vm4448_vm12 = vcmask 1041409   ;;  %v2991_v47 = vsel %vm2860_vm13, %v2990_v27, %v2989_v24  ;;  %v2869_v14 = vsel %vm2868_vm15, %v2867_v42, %v2865_v5 }
 0x193   :  { %2417 = vadd.xlane.f32.xlu1 %v1872_v20  ;;  %2291 = vadd.xlane.f32.xlu0 %v1141_v35  ;;  %v2993_v7 = vsel %vm2864_vm14, %v2992_v46, %v2991_v47  ;;  %v2641_v47 = vld [vmem:[#allocation6 + $0xd0] sm:$0xff] }
 0x194   :  { %v1461_v23 = vpop.f32.mrf.mxu2  ;;  %v1630_v33 = vpop.f32.mrf.mxu3  ;;  %v1142_v4 = vadd.f32 %v1046_v40, %v1045_v61  ;;  %v2995_v8 = vsel %vm2868_vm15, %v2994_v53, %v2993_v7  ;;  %v2625_v53 = vld [vmem:[#allocation6 + $0x50] sm:$0xff]  ;;  %3125 = vmatpush.msrb.mxu1 %v2641_v47 }
 0x195   :  { %v1462_v43 = vadd.f32 %v1461_v23, %v3921_v13  ;;  %v1631_v37 = vadd.f32 %v1630_v33, %v3923_v12  ;;  %v2503_v12 = vmul.f32 0.00390625, %v2264_v18  ;;  %v2873_v18 = vsel %vm2872_vm0, %v2871_v0, %v2869_v14  ;;  %v317_v23 = vld [vmem:[#allocation3 + $0x218] sm:$0xff]  ;;  %3105 = vmatpush.msrb.mxu0 %v2625_v53 }
 0x196   :  { %v734_v58 = vpop.f32.mrf.mxu0  ;;  %v2390_v60 = vpop.xlane.xlu0 %2389 }
 0x197   :  { %v1775_v59 = vmax.f32 %v1462_v43, 0.0  ;;  %v1776_v32 = vmax.f32 %v1631_v37, 0.0  ;;  %v735_v13 = vadd.f32 %v734_v58, %v3976_v34  ;;  %v903_v45 = vpop.f32.mrf.mxu1  ;;  %v2566_v3 = vmul.f32 0.00390625, %v2390_v60  ;;  %v2673_v58 = vld [vmem:[#allocation6 + $0x1d0] sm:$0xff]  ;;  %v318_v60 = vld [vmem:[#allocation3 + $0x220] sm:$0xff] }
 0x198   :  { %v904_v38 = vadd.f32 %v903_v45, %v3980_v51  ;;  %v2266_v54 = vpop.xlane.xlu2 %2265  ;;  %v2874_v20 = vperm.slane %v2503_v12, %v3739_v17  ;;  %3165 = vmatpush.msrb.mxu3 %v2673_v58 }
 0x199   :  { %v1047_v63 = vmax.f32 %v735_v13, 0.0  ;;  %v2504_v55 = vmul.f32 0.00390625, %v2266_v54  ;;  %3351 = vmatmul.msk.bf16.gmra.mxu0 %vm543_vm1, %v3480_v25  ;;  %3383 = vmatmul.msk.bf16.gmra.mxu1 %vm543_vm1, %v3480_v25  ;;  %v3994_v35 = vadd.f32 %v1776_v32, %v1775_v59  ;;  %v2996_v10 = vperm.slane %v2566_v3, %v3971_v16  ;;  %v319_v54 = vld [vmem:[#allocation3 + $0x228] sm:$0xff] }
 0x19a   :  { %v1048_v9 = vmax.f32 %v904_v38, 0.0 }
 0x19b   :  { %v2875_v22 = vperm.slane %v2504_v55, %v3749_v29  ;;  %2293 = vadd.xlane.f32.xlu1 %v1142_v4  ;;  %v2997_v24 = vsel %vm2872_vm0, %v2996_v10, %v2995_v8 }
 0x19c   :  { %v1463_v21 = vpop.f32.mrf.mxu2  ;;  %v1632_v28 = vpop.f32.mrf.mxu3  ;;  %v1143_v30 = vadd.f32 %v1048_v9, %v1047_v63  ;;  %v4011_v33 = vsel %vm4448_vm12, %v2997_v24, %v2873_v18  ;;  %v3481_v63 = vld [vmem:[%s4442_s1 + $0xc8] sm:$0xff]  ;;  %vm4449_vm12 = vcmask 786112  }
 0x19d   :  { %v2876_v15 = vsel %vm2816_vm2, %v2875_v22, %v2874_v20  ;;  %v1464_v27 = vadd.f32 %v1463_v21, %v3953_v1  ;;  %v1633_v26 = vadd.f32 %v1632_v28, %v3955_v2 }
 0x19e   :  { %v736_v61 = vpop.f32.mrf.mxu0  ;;  %2295 = vadd.xlane.f32.xlu2 %v1143_v30  ;;  %v2392_v46 = vpop.xlane.xlu0 %2391 }
 0x19f   :  { %v1777_v40 = vmax.f32 %v1464_v27, 0.0  ;;  %v1778_v43 = vmax.f32 %v1633_v26, 0.0  ;;  %v737_v37 = vadd.f32 %v736_v61, %v4003_v11  ;;  %v905_v42 = vpop.f32.mrf.mxu1  ;;  %v2567_v0 = vmul.f32 0.00390625, %v2392_v46  ;;  %v320_v61 = vld [vmem:[#allocation3 + $0x230] sm:$0xff] }
 0x1a0   :  { %v906_v59 = vadd.f32 %v905_v42, %v317_v23 }
 0x1a1   :  { %v1049_v1 = vmax.f32 %v737_v37, 0.0  ;;  %3416 = vmatmul.msk.bf16.gmra.mxu2 %vm543_vm1, %v3480_v25  ;;  %3448 = vmatmul.msk.bf16.gmra.mxu3 %vm543_vm1, %v3480_v25  ;;  %v4016_v2 = vadd.f32 %v1778_v43, %v1777_v40  ;;  %v321_v37 = vld [vmem:[#allocation3 + $0x238] sm:$0xff] }
 0x1a2   :  { %v1050_v32 = vmax.f32 %v906_v59, 0.0 }
 0x1a4   :  { %v1466_v13 = vpop.f32.mrf.mxu2  ;;  %v1635_v45 = vpop.f32.mrf.mxu3  ;;  %v1144_v12 = vadd.f32 %v1050_v32, %v1049_v1 }
 0x1a5   :  { %v1467_v38 = vadd.f32 %v1466_v13, %v3976_v34  ;;  %v1636_v3 = vadd.f32 %v1635_v45, %v3980_v51  ;;  %v2998_v34 = vperm.slane %v2567_v0, %v3739_v17 }
 0x1a6   :  { %2297 = vadd.xlane.f32.xlu0 %v1144_v12  ;;  %v739_v25 = vpop.f32.mrf.mxu0  ;;  %v2394_v55 = vpop.xlane.xlu1 %2393 }
 0x1a7   :  { %v740_v4 = vadd.f32 %v739_v25, %v318_v60  ;;  %v908_v5 = vpop.f32.mrf.mxu1  ;;  %v2568_v7 = vmul.f32 0.00390625, %v2394_v55  ;;  %v2268_v9 = vpop.xlane.xlu0 %2267  ;;  %v1779_v10 = vmax.f32 %v1467_v38, 0.0  ;;  %v1780_v14 = vmax.f32 %v1636_v3, 0.0 }
 0x1a8   :  { %v909_v8 = vadd.f32 %v908_v5, %v319_v54  ;;  %v2505_v20 = vmul.f32 0.00390625, %v2268_v9  ;;  %v4037_v5 = vld [vmem:[#allocation3 + $0x240] sm:$0xff] }
 0x1a9   :  { %v1051_v51 = vmax.f32 %v740_v4, 0.0  ;;  %v2999_v22 = vperm.slane %v2568_v7, %v3749_v29  ;;  %3352 = vmatmul.msk.bf16.gmra.mxu0 %vm543_vm1, %v3481_v63  ;;  %3384 = vmatmul.msk.bf16.gmra.mxu1 %vm543_vm1, %v3481_v63  ;;  %v1875_v26 = vadd.f32 %v1780_v14, %v1779_v10  ;;  %v4039_v10 = vld [vmem:[#allocation3 + $0x248] sm:$0xff] }
 0x1aa   :  { %v1052_v21 = vmax.f32 %v909_v8, 0.0  ;;  %v2877_v28 = vperm.slane %v2505_v20, %v3759_v52 }
 0x1ab   :  { %v3000_v30 = vsel %vm2816_vm2, %v2999_v22, %v2998_v34 }
 0x1ac   :  { %v2878_v6 = vsel %vm2820_vm3, %v2877_v28, %v2876_v15  ;;  %v1468_v18 = vpop.f32.mrf.mxu2  ;;  %v1637_v24 = vpop.f32.mrf.mxu3  ;;  %v1145_v27 = vadd.f32 %v1052_v21, %v1051_v51 }
 0x1ad   :  { %v1469_v40 = vadd.f32 %v1468_v18, %v4003_v11  ;;  %v1638_v43 = vadd.f32 %v1637_v24, %v317_v23 }
 0x1ae   :  { %2299 = vadd.xlane.f32.xlu1 %v1145_v27  ;;  %2423 = vadd.xlane.f32.xlu0 %v1875_v26  ;;  %v741_v42 = vpop.f32.mrf.mxu0  ;;  %v2396_v46 = vpop.xlane.xlu2 %2395 }
 0x1af   :  { %v742_v53 = vadd.f32 %v741_v42, %v320_v61  ;;  %v910_v58 = vpop.f32.mrf.mxu1  ;;  %v2569_v59 = vmul.f32 0.00390625, %v2396_v46  ;;  %v2270_v1 = vpop.xlane.xlu1 %2269  ;;  %v1781_v32 = vmax.f32 %v1469_v40, 0.0  ;;  %v1782_v13 = vmax.f32 %v1638_v43, 0.0 }
 0x1b0   :  { %v911_v15 = vadd.f32 %v910_v58, %v321_v37  ;;  %v2506_v45 = vmul.f32 0.00390625, %v2270_v1  ;;  %v2656_v58 = vld [vmem:[#allocation6 + $0x148] sm:$0xff] }
 0x1b1   :  { %v1053_v12 = vmax.f32 %v742_v53, 0.0  ;;  %v3001_v47 = vperm.slane %v2569_v59, %v3759_v52  ;;  %3417 = vmatmul.msk.bf16.gmra.mxu2 %vm543_vm1, %v3481_v63  ;;  %3449 = vmatmul.msk.bf16.gmra.mxu3 %vm543_vm1, %v3481_v63  ;;  %v1876_v4 = vadd.f32 %v1782_v13, %v1781_v32  ;;  %v3482_v63 = vld [vmem:[%s4442_s1 + $0xd0] sm:$0xff]  ;;  %v4052_v53 = vld [vmem:[#allocation3 + $0x250] sm:$0xff]  ;;  %v4054_v32 = vld [vmem:[#allocation3 + $0x258] sm:$0xff] }
 0x1b2   :  { %v1054_v11 = vmax.f32 %v911_v15, 0.0  ;;  %v2879_v23 = vperm.slane %v2506_v45, %v3776_v41  ;;  %3146 = vmatpush.msrb.mxu2 %v2656_v58 }
 0x1b3   :  { %v3002_v0 = vsel %vm2820_vm3, %v3001_v47, %v3000_v30 }
 0x1b4   :  { %v2880_v38 = vsel %vm2824_vm4, %v2879_v23, %v2878_v6  ;;  %v1471_v3 = vpop.f32.mrf.mxu2  ;;  %v1640_v25 = vpop.f32.mrf.mxu3  ;;  %v1146_v55 = vadd.f32 %v1054_v11, %v1053_v12  ;;  %v2624_v23 = vld [vmem:[#allocation6 + $0x48] sm:$0xff] }
 0x1b5   :  { %v1472_v7 = vadd.f32 %v1471_v3, %v318_v60  ;;  %v1641_v9 = vadd.f32 %v1640_v25, %v319_v54  ;;  %3106 = vmatpush.msrb.mxu0 %v2624_v23 }
 0x1b6   :  { %2301 = vadd.xlane.f32.xlu2 %v1146_v55  ;;  %2425 = vadd.xlane.f32.xlu1 %v1876_v4  ;;  %v744_v14 = vpop.f32.mrf.mxu0  ;;  %v2272_v8 = vpop.xlane.xlu2 %2271 }
 0x1b7   :  { %v745_v20 = vadd.f32 %v744_v14, %v4037_v5  ;;  %v913_v34 = vpop.f32.mrf.mxu1  ;;  %v2507_v51 = vmul.f32 0.00390625, %v2272_v8  ;;  %v2398_v22 = vpop.xlane.xlu0 %2397  ;;  %v1783_v21 = vmax.f32 %v1472_v7, 0.0  ;;  %v1784_v28 = vmax.f32 %v1641_v9, 0.0 }
 0x1b8   :  { %v914_v60 = vadd.f32 %v913_v34, %v4039_v10  ;;  %v2570_v54 = vmul.f32 0.00390625, %v2398_v22  ;;  %v326_v22 = vld [vmem:[#allocation3 + $0x260] sm:$0xff] }
 0x1b9   :  { %v1055_v30 = vmax.f32 %v745_v20, 0.0  ;;  %v2881_v6 = vperm.slane %v2507_v51, %v3788_v56  ;;  %3353 = vmatmul.msk.bf16.gmra.mxu0 %vm543_vm1, %v3482_v63  ;;  %3385 = vmatmul.msk.bf16.gmra.mxu1 %vm543_vm1, %v3482_v63  ;;  %v1877_v42 = vadd.f32 %v1784_v28, %v1783_v21  ;;  %v2640_v21 = vld [vmem:[#allocation6 + $0xc8] sm:$0xff] }
 0x1ba   :  { %v1056_v18 = vmax.f32 %v914_v60, 0.0  ;;  %v3003_v24 = vperm.slane %v2570_v54, %v3776_v41  ;;  %v327_v54 = vld [vmem:[#allocation3 + $0x268] sm:$0xff]  ;;  %3126 = vmatpush.msrb.mxu1 %v2640_v21 }
 0x1bb   :  { %v2882_v27 = vsel %vm2828_vm5, %v2881_v6, %v2880_v38 }
 0x1bc   :  { %v3004_v26 = vsel %vm2824_vm4, %v3003_v24, %v3002_v0  ;;  %v1473_v40 = vpop.f32.mrf.mxu2  ;;  %v1642_v43 = vpop.f32.mrf.mxu3  ;;  %v1147_v46 = vadd.f32 %v1056_v18, %v1055_v30  ;;  %v2672_v0 = vld [vmem:[#allocation6 + $0x1c8] sm:$0xff] }
 0x1bd   :  { %v1474_v59 = vadd.f32 %v1473_v40, %v320_v61  ;;  %v1643_v1 = vadd.f32 %v1642_v43, %v321_v37  ;;  %3166 = vmatpush.msrb.mxu3 %v2672_v0 }
 0x1be   :  { %2427 = vadd.xlane.f32.xlu2 %v1877_v42  ;;  %2303 = vadd.xlane.f32.xlu0 %v1147_v46  ;;  %v746_v13 = vpop.f32.mrf.mxu0  ;;  %v2400_v15 = vpop.xlane.xlu1 %2399 }
 0x1bf   :  { %v747_v45 = vadd.f32 %v746_v13, %v4052_v53  ;;  %v915_v12 = vpop.f32.mrf.mxu1  ;;  %v2571_v47 = vmul.f32 0.00390625, %v2400_v15  ;;  %v2274_v11 = vpop.xlane.xlu0 %2273  ;;  %v1785_v38 = vmax.f32 %v1474_v59, 0.0  ;;  %v1786_v3 = vmax.f32 %v1643_v1, 0.0 }
 0x1c0   :  { %v916_v25 = vadd.f32 %v915_v12, %v4054_v32  ;;  %v2508_v61 = vmul.f32 0.00390625, %v2274_v11  ;;  %v328_v11 = vld [vmem:[#allocation3 + $0x270] sm:$0xff] }
 0x1c1   :  { %v1057_v37 = vmax.f32 %v747_v45, 0.0  ;;  %v3005_v55 = vperm.slane %v2571_v47, %v3788_v56  ;;  %3418 = vmatmul.msk.bf16.gmra.mxu2 %vm543_vm1, %v3482_v63  ;;  %3450 = vmatmul.msk.bf16.gmra.mxu3 %vm543_vm1, %v3482_v63  ;;  %v1878_v34 = vadd.f32 %v1786_v3, %v1785_v38  ;;  %v3483_v63 = vld [vmem:[%s4442_s1 + $0xd8] sm:$0xff]  ;;  %v329_v38 = vld [vmem:[#allocation3 + $0x278] sm:$0xff] }
 0x1c2   :  { %v1058_v4 = vmax.f32 %v916_v25, 0.0  ;;  %v2883_v7 = vperm.slane %v2508_v61, %v3820_v48 }
 0x1c3   :  { %v3006_v9 = vsel %vm2828_vm5, %v3005_v55, %v3004_v26 }
 0x1c4   :  { %v2884_v14 = vsel %vm2832_vm6, %v2883_v7, %v2882_v27  ;;  %v1476_v8 = vpop.f32.mrf.mxu2  ;;  %v1645_v20 = vpop.f32.mrf.mxu3  ;;  %v1148_v51 = vadd.f32 %v1058_v4, %v1057_v37 }
 0x1c5   :  { %v1477_v28 = vadd.f32 %v1476_v8, %v4037_v5  ;;  %v1646_v60 = vadd.f32 %v1645_v20, %v4039_v10 }
 0x1c6   :  { %2429 = vadd.xlane.f32.xlu2 %v1878_v34  ;;  %2305 = vadd.xlane.f32.xlu1 %v1148_v51  ;;  %v749_v30 = vpop.f32.mrf.mxu0  ;;  %v2402_v6 = vpop.xlane.xlu2 %2401 }
 0x1c7   :  { %v1787_v18 = vmax.f32 %v1477_v28, 0.0  ;;  %v1788_v24 = vmax.f32 %v1646_v60, 0.0  ;;  %v750_v27 = vadd.f32 %v749_v30, %v326_v22  ;;  %v918_v26 = vpop.f32.mrf.mxu1  ;;  %v2572_v40 = vmul.f32 0.00390625, %v2402_v6  ;;  %v2276_v43 = vpop.xlane.xlu1 %2275 }
 0x1c8   :  { %v919_v42 = vadd.f32 %v918_v26, %v327_v54  ;;  %v2509_v5 = vmul.f32 0.00390625, %v2276_v43  ;;  %v4085_v26 = vld [vmem:[#allocation3 + $0x288] sm:$0xff] }
 0x1c9   :  { %v1059_v46 = vmax.f32 %v750_v27, 0.0  ;;  %v3007_v10 = vperm.slane %v2572_v40, %v3820_v48  ;;  %3354 = vmatmul.msk.bf16.gmra.mxu0 %vm543_vm1, %v3483_v63  ;;  %3386 = vmatmul.msk.bf16.gmra.mxu1 %vm543_vm1, %v3483_v63  ;;  %v1879_v58 = vadd.f32 %v1788_v24, %v1787_v18  ;;  %v4083_v18 = vld [vmem:[#allocation3 + $0x280] sm:$0xff] }
 0x1ca   :  { %v1060_v59 = vmax.f32 %v919_v42, 0.0  ;;  %v2885_v1 = vperm.slane %v2509_v5, %v3823_v49 }
 0x1cb   :  { %v3008_v13 = vsel %vm2832_vm6, %v3007_v10, %v3006_v9  ;;  %2431 = vadd.xlane.f32.xlu0 %v1879_v58 }
 0x1cc   :  { %v2886_v15 = vsel %vm2836_vm7, %v2885_v1, %v2884_v14  ;;  %v1478_v45 = vpop.f32.mrf.mxu2  ;;  %v1647_v12 = vpop.f32.mrf.mxu3  ;;  %v1149_v47 = vadd.f32 %v1060_v59, %v1059_v46 }
 0x1cd   :  { %v1479_v23 = vadd.f32 %v1478_v45, %v4052_v53  ;;  %v1648_v0 = vadd.f32 %v1647_v12, %v4054_v32 }
 0x1ce   :  { %2307 = vadd.xlane.f32.xlu2 %v1149_v47  ;;  %v751_v3 = vpop.f32.mrf.mxu0  ;;  %v2278_v25 = vpop.xlane.xlu2 %2277 }
 0x1cf   :  { %v752_v61 = vadd.f32 %v751_v3, %v328_v11  ;;  %v920_v37 = vpop.f32.mrf.mxu1  ;;  %v2510_v55 = vmul.f32 0.00390625, %v2278_v25  ;;  %v2404_v4 = vpop.xlane.xlu0 %2403  ;;  %v1789_v7 = vmax.f32 %v1479_v23, 0.0  ;;  %v1790_v9 = vmax.f32 %v1648_v0, 0.0 }
 0x1d0   :  { %v921_v8 = vadd.f32 %v920_v37, %v329_v38  ;;  %v2573_v14 = vmul.f32 0.00390625, %v2404_v4  ;;  %v2655_v37 = vld [vmem:[#allocation6 + $0x140] sm:$0xff] }
 0x1d1   :  { %v1061_v20 = vmax.f32 %v752_v61, 0.0  ;;  %v2887_v34 = vperm.slane %v2510_v55, %v3850_v31  ;;  %3419 = vmatmul.msk.bf16.gmra.mxu2 %vm543_vm1, %v3483_v63  ;;  %3451 = vmatmul.msk.bf16.gmra.mxu3 %vm543_vm1, %v3483_v63  ;;  %v1880_v30 = vadd.f32 %v1790_v9, %v1789_v7  ;;  %v3484_v63 = vld [vmem:[%s4442_s1 + $0xe0] sm:$0xff]  ;;  %v4098_v61 = vld [vmem:[#allocation3 + $0x290] sm:$0xff] }
 0x1d2   :  { %v1062_v53 = vmax.f32 %v921_v8, 0.0  ;;  %v3009_v32 = vperm.slane %v2573_v14, %v3823_v49  ;;  %v4100_v7 = vld [vmem:[#allocation3 + $0x298] sm:$0xff]  ;;  %3147 = vmatpush.msrb.mxu2 %v2655_v37 }
 0x1d3   :  { %v2888_v51 = vsel %vm2840_vm8, %v2887_v34, %v2886_v15 }
 0x1d4   :  { %v3010_v21 = vsel %vm2836_vm7, %v3009_v32, %v3008_v13  ;;  %v1481_v28 = vpop.f32.mrf.mxu2  ;;  %v1650_v60 = vpop.f32.mrf.mxu3  ;;  %v1150_v6 = vadd.f32 %v1062_v53, %v1061_v20  ;;  %v2623_v32 = vld [vmem:[#allocation6 + $0x40] sm:$0xff] }
 0x1d5   :  { %v1482_v24 = vadd.f32 %v1481_v28, %v326_v22  ;;  %v1651_v27 = vadd.f32 %v1650_v60, %v327_v54  ;;  %3107 = vmatpush.msrb.mxu0 %v2623_v32  ;;  %v4127_v32 = vld [vmem:[#allocation3 + $0x2b0] sm:$0xff] }
 0x1d6   :  { %2433 = vadd.xlane.f32.xlu2 %v1880_v30  ;;  %2309 = vadd.xlane.f32.xlu0 %v1150_v6  ;;  %v754_v40 = vpop.f32.mrf.mxu0  ;;  %v2406_v43 = vpop.xlane.xlu1 %2405 }
 0x1d7   :  { %v755_v42 = vadd.f32 %v754_v40, %v4083_v18  ;;  %v923_v5 = vpop.f32.mrf.mxu1  ;;  %v2574_v46 = vmul.f32 0.00390625, %v2406_v43  ;;  %v2280_v10 = vpop.xlane.xlu0 %2279  ;;  %v1791_v58 = vmax.f32 %v1482_v24, 0.0  ;;  %v1792_v59 = vmax.f32 %v1651_v27, 0.0 }
 0x1d8   :  { %v924_v22 = vadd.f32 %v923_v5, %v4085_v26  ;;  %v2511_v54 = vmul.f32 0.00390625, %v2280_v10  ;;  %v4110_v10 = vld [vmem:[#allocation3 + $0x2a0] sm:$0xff] }
 0x1d9   :  { %v1063_v1 = vmax.f32 %v755_v42, 0.0  ;;  %v3011_v13 = vperm.slane %v2574_v46, %v3850_v31  ;;  %3355 = vmatmul.msk.bf16.gmra.mxu0 %vm543_vm1, %v3484_v63  ;;  %3387 = vmatmul.msk.bf16.gmra.mxu1 %vm543_vm1, %v3484_v63  ;;  %v1881_v25 = vadd.f32 %v1792_v59, %v1791_v58  ;;  %v2639_v58 = vld [vmem:[#allocation6 + $0xc0] sm:$0xff] }
 0x1da   :  { %v1064_v15 = vmax.f32 %v924_v22, 0.0  ;;  %v2889_v45 = vperm.slane %v2511_v54, %v3860_v39  ;;  %v4114_v54 = vld [vmem:[#allocation3 + $0x2a8] sm:$0xff]  ;;  %3127 = vmatpush.msrb.mxu1 %v2639_v58 }
 0x1db   :  { %v3012_v12 = vsel %vm2840_vm8, %v3011_v13, %v3010_v21 }
 0x1dc   :  { %v2890_v47 = vsel %vm2844_vm9, %v2889_v45, %v2888_v51  ;;  %v1483_v23 = vpop.f32.mrf.mxu2  ;;  %v1652_v0 = vpop.f32.mrf.mxu3  ;;  %v1151_v3 = vadd.f32 %v1064_v15, %v1063_v1  ;;  %v2671_v51 = vld [vmem:[#allocation6 + $0x1c0] sm:$0xff] }
 0x1dd   :  { %v1484_v55 = vadd.f32 %v1483_v23, %v328_v11  ;;  %v1653_v4 = vadd.f32 %v1652_v0, %v329_v38  ;;  %3167 = vmatpush.msrb.mxu3 %v2671_v51  ;;  %v2621_v51 = vld [vmem:[#allocation6 + $0x30] sm:$0xff] }
 0x1de   :  { %2311 = vadd.xlane.f32.xlu1 %v1151_v3  ;;  %2435 = vadd.xlane.f32.xlu0 %v1881_v25  ;;  %v756_v9 = vpop.f32.mrf.mxu0  ;;  %v2408_v8 = vpop.xlane.xlu2 %2407 }
 0x1df   :  { %v757_v14 = vadd.f32 %v756_v9, %v4098_v61  ;;  %v925_v20 = vpop.f32.mrf.mxu1  ;;  %v2575_v34 = vmul.f32 0.00390625, %v2408_v8  ;;  %v2282_v53 = vpop.xlane.xlu1 %2281  ;;  %v1793_v21 = vmax.f32 %v1484_v55, 0.0  ;;  %v1794_v28 = vmax.f32 %v1653_v4, 0.0  ;;  %v2622_v4 = vld [vmem:[#allocation6 + $0x38] sm:$0xff] }
 0x1e0   :  { %v926_v60 = vadd.f32 %v925_v20, %v4100_v7  ;;  %v2512_v11 = vmul.f32 0.00390625, %v2282_v53  ;;  %3108 = vmatpush.msrb.mxu0 %v2622_v4 }
 0x1e1   :  { %v1065_v38 = vmax.f32 %v757_v14, 0.0  ;;  %v3013_v30 = vperm.slane %v2575_v34, %v3860_v39  ;;  %3420 = vmatmul.msk.bf16.gmra.mxu2 %vm543_vm1, %v3484_v63  ;;  %3452 = vmatmul.msk.bf16.gmra.mxu3 %vm543_vm1, %v3484_v63  ;;  %v1882_v46 = vadd.f32 %v1794_v28, %v1793_v21  ;;  %v3485_v63 = vld [vmem:[%s4442_s1 + $0xe8] sm:$0xff] }
 0x1e2   :  { %v1066_v6 = vmax.f32 %v926_v60, 0.0  ;;  %v2891_v24 = vperm.slane %v2512_v11, %v3870_v57  ;;  %v4131_v60 = vld [vmem:[#allocation3 + $0x2b8] sm:$0xff]  ;;  %3109 = vmatpush.msrb.mxu0 %v2621_v51 }
 0x1e3   :  { %v3014_v27 = vsel %vm2844_vm9, %v3013_v30, %v3012_v12  ;;  %v2620_v30 = vld [vmem:[#allocation6 + $0x28] sm:$0xff] }
 0x1e4   :  { %v2892_v40 = vsel %vm2848_vm10, %v2891_v24, %v2890_v47  ;;  %v1486_v43 = vpop.f32.mrf.mxu2  ;;  %v1655_v42 = vpop.f32.mrf.mxu3  ;;  %v1152_v5 = vadd.f32 %v1066_v6, %v1065_v38  ;;  %3110 = vmatpush.msrb.mxu0 %v2620_v30 }
 0x1e5   :  { %v1487_v59 = vadd.f32 %v1486_v43, %v4083_v18  ;;  %v1656_v22 = vadd.f32 %v1655_v42, %v4085_v26 }
 0x1e6   :  { %2313 = vadd.xlane.f32.xlu2 %v1152_v5  ;;  %2437 = vadd.xlane.f32.xlu1 %v1882_v46  ;;  %v759_v1 = vpop.f32.mrf.mxu0  ;;  %v2284_v13 = vpop.xlane.xlu2 %2283 }
 0x1e7   :  { %v760_v15 = vadd.f32 %v759_v1, %v4110_v10  ;;  %v928_v45 = vpop.f32.mrf.mxu1  ;;  %v2513_v12 = vmul.f32 0.00390625, %v2284_v13  ;;  %v2410_v47 = vpop.xlane.xlu0 %2409  ;;  %v1795_v23 = vmax.f32 %v1487_v59, 0.0  ;;  %v1796_v18 = vmax.f32 %v1656_v22, 0.0  ;;  %v2618_v1 = vld [vmem:[#allocation6 + $0x18] sm:$0xff] }
 0x1e8   :  { %v929_v26 = vadd.f32 %v928_v45, %v4114_v54  ;;  %v2576_v0 = vmul.f32 0.00390625, %v2410_v47 }
 0x1e9   :  { %v1067_v3 = vmax.f32 %v760_v15, 0.0  ;;  %v2893_v25 = vperm.slane %v2513_v12, %v3930_v19  ;;  %3356 = vmatmul.msk.bf16.gmra.mxu0 %vm543_vm1, %v3485_v63  ;;  %3388 = vmatmul.msk.bf16.gmra.mxu1 %vm543_vm1, %v3485_v63  ;;  %v1883_v34 = vadd.f32 %v1796_v18, %v1795_v23  ;;  %v4141_v18 = vld [vmem:[#allocation3 + $0x2c0] sm:$0xff] }
 0x1ea   :  { %v1068_v37 = vmax.f32 %v929_v26, 0.0  ;;  %v3015_v55 = vperm.slane %v2576_v0, %v3870_v57  ;;  %v2617_v26 = vld [vmem:[#allocation6 + $0x10] sm:$0xff] }
 0x1eb   :  { %v2894_v9 = vsel %vm2852_vm11, %v2893_v25, %v2892_v40  ;;  %v3486_v25 = vld [vmem:[%s4442_s1 + $0xf0] sm:$0xff] }
 0x1ec   :  { %v3016_v8 = vsel %vm2848_vm10, %v3015_v55, %v3014_v27  ;;  %v1488_v14 = vpop.f32.mrf.mxu2  ;;  %v1657_v20 = vpop.f32.mrf.mxu3  ;;  %v1153_v53 = vadd.f32 %v1068_v37, %v1067_v3  ;;  %v4145_v3 = vld [vmem:[#allocation3 + $0x2c8] sm:$0xff] }
 0x1ed   :  { %v1489_v21 = vadd.f32 %v1488_v14, %v4098_v61  ;;  %v1658_v28 = vadd.f32 %v1657_v20, %v4100_v7  ;;  %v2619_v7 = vld [vmem:[#allocation6 + $0x20] sm:$0xff]  ;;  %v2616_v20 = vld [vmem:[#allocation6 + $0x8] sm:$0xff] }
 0x1ee   :  { %2439 = vadd.xlane.f32.xlu2 %v1883_v34  ;;  %2315 = vadd.xlane.f32.xlu0 %v1153_v53  ;;  %v761_v11 = vpop.f32.mrf.mxu0  ;;  %v2412_v38 = vpop.xlane.xlu1 %2411 }
 0x1ef   :  { %v762_v6 = vadd.f32 %v761_v11, %v4127_v32  ;;  %v930_v24 = vpop.f32.mrf.mxu1  ;;  %v2577_v27 = vmul.f32 0.00390625, %v2412_v38  ;;  %v2286_v40 = vpop.xlane.xlu0 %2285  ;;  %v1797_v43 = vmax.f32 %v1489_v21, 0.0  ;;  %v1798_v42 = vmax.f32 %v1658_v28, 0.0  ;;  %3111 = vmatpush.msrb.mxu0 %v2619_v7  ;;  %v2615_v28 = vld [vmem:[#allocation6] sm:$0xff]  ;;  %v341_v7 = vld [vmem:[#allocation3 + $0x2d8] sm:$0xff] }
 0x1f0   :  { %v931_v61 = vadd.f32 %v930_v24, %v4131_v60  ;;  %v2514_v5 = vmul.f32 0.00390625, %v2286_v40 }
 0x1f1   :  { %v1069_v46 = vmax.f32 %v762_v6, 0.0  ;;  %v3017_v58 = vperm.slane %v2577_v27, %v3930_v19  ;;  %3421 = vmatmul.msk.bf16.gmra.mxu2 %vm543_vm1, %v3485_v63  ;;  %3453 = vmatmul.msk.bf16.gmra.mxu3 %vm543_vm1, %v3485_v63  ;;  %v1884_v23 = vadd.f32 %v1798_v42, %v1797_v43  ;;  %v4158_v42 = vld [vmem:[#allocation3 + $0x2d0] sm:$0xff] }
 0x1f2   :  { %v1070_v59 = vmax.f32 %v931_v61, 0.0  ;;  %v2895_v22 = vperm.slane %v2514_v5, %v3937_v36  ;;  %3112 = vmatpush.msrb.mxu0 %v2618_v1 }
 0x1f3   :  { %v3018_v13 = vsel %vm2852_vm11, %v3017_v58, %v3016_v8 }
 0x1f4   :  { %v2896_v15 = vsel %vm4449_vm12, %v2895_v22, %v2894_v9  ;;  %v1491_v45 = vpop.f32.mrf.mxu2  ;;  %v1660_v12 = vpop.f32.mrf.mxu3  ;;  %v1154_v47 = vadd.f32 %v1070_v59, %v1069_v46  ;;  %3113 = vmatpush.msrb.mxu0 %v2617_v26  ;;  %v2654_v59 = vld [vmem:[#allocation6 + $0x138] sm:$0xff] }
 0x1f5   :  { %v1492_v0 = vadd.f32 %v1491_v45, %v4110_v10  ;;  %v1661_v63 = vadd.f32 %v1660_v12, %v4114_v54  ;;  %3148 = vmatpush.msrb.mxu2 %v2654_v59  ;;  %v2670_v45 = vld [vmem:[#allocation6 + $0x1b8] sm:$0xff] }
 0x1f6   :  { %2317 = vadd.xlane.f32.xlu1 %v1154_v47  ;;  %2441 = vadd.xlane.f32.xlu0 %v1884_v23  ;;  %v764_v37 = vpop.f32.mrf.mxu0  ;;  %v2414_v55 = vpop.xlane.xlu2 %2413 }
 0x1f7   :  { %v765_v4 = vadd.f32 %v764_v37, %v4141_v18  ;;  %v933_v9 = vpop.f32.mrf.mxu1  ;;  %v2578_v8 = vmul.f32 0.00390625, %v2414_v55  ;;  %v2288_v14 = vpop.xlane.xlu1 %2287  ;;  %v1799_v10 = vmax.f32 %v1492_v0, 0.0  ;;  %v1800_v34 = vmax.f32 %v1661_v63, 0.0  ;;  %3114 = vmatpush.msrb.mxu0 %v2616_v20  ;;  %3168 = vmatpush.msrb.mxu3 %v2670_v45  ;;  %v2638_v37 = vld [vmem:[#allocation6 + $0xb8] sm:$0xff] }
 0x1f8   :  { %v934_v54 = vadd.f32 %v933_v9, %v4145_v3  ;;  %v2515_v53 = vmul.f32 0.00390625, %v2288_v14  ;;  %3128 = vmatpush.msrb.mxu1 %v2638_v37 }
 0x1f9   :  { %v1071_v51 = vmax.f32 %v765_v4, 0.0  ;;  %v3019_v21 = vperm.slane %v2578_v8, %v3937_v36  ;;  %3357 = vmatmul.msk.bf16.gmra.mxu0 %vm543_vm1, %v3486_v25  ;;  %3389 = vmatmul.msk.bf16.gmra.mxu1 %vm543_vm1, %v3486_v25  ;;  %v1885_v43 = vadd.f32 %v1800_v34, %v1799_v10  ;;  %v342_v10 = vld [vmem:[#allocation3 + $0x2e0] sm:$0xff] }
 0x1fa   :  { %v1072_v11 = vmax.f32 %v934_v54, 0.0  ;;  %v2897_v38 = vperm.slane %v2515_v53, %v3941_v44  ;;  %3115 = vmatpush.msrb.mxu0 %v2615_v28  ;;  %v343_v53 = vld [vmem:[#allocation3 + $0x2e8] sm:$0xff] }
 0x1fb   :  { %v3020_v30 = vsel %vm4449_vm12, %v3019_v21, %v3018_v13 }
 0x1fc   :  { %v2898_v6 = vsel %vm2860_vm13, %v2897_v38, %v2896_v15  ;;  %v1493_v24 = vpop.f32.mrf.mxu2  ;;  %v1662_v27 = vpop.f32.mrf.mxu3  ;;  %v1155_v40 = vadd.f32 %v1072_v11, %v1071_v51 }
 0x1fd   :  { %v1494_v61 = vadd.f32 %v1493_v24, %v4127_v32  ;;  %v1663_v5 = vadd.f32 %v1662_v27, %v4131_v60 }
 0x1fe   :  { %2319 = vadd.xlane.f32.xlu2 %v1155_v40  ;;  %2443 = vadd.xlane.f32.xlu1 %v1885_v43  ;;  %v766_v46 = vpop.f32.mrf.mxu0  ;;  %v2290_v58 = vpop.xlane.xlu2 %2289 }
 0x1ff   :  { %v767_v22 = vadd.f32 %v766_v46, %v4158_v42  ;;  %v935_v1 = vpop.f32.mrf.mxu1  ;;  %v2516_v13 = vmul.f32 0.00390625, %v2290_v58  ;;  %v2416_v15 = vpop.xlane.xlu0 %2415  ;;  %v1801_v12 = vmax.f32 %v1494_v61, 0.0  ;;  %v1802_v47 = vmax.f32 %v1663_v5, 0.0 }
 0x200   :  { %v936_v23 = vadd.f32 %v935_v1, %v341_v7  ;;  %v2579_v26 = vmul.f32 0.00390625, %v2416_v15 }
 0x201   :  { %v1073_v32 = vmax.f32 %v767_v22, 0.0  ;;  %v2899_v60 = vperm.slane %v2516_v13, %v3948_v62  ;;  %3422 = vmatmul.msk.bf16.gmra.mxu2 %vm543_vm1, %v3486_v25  ;;  %3454 = vmatmul.msk.bf16.gmra.mxu3 %vm543_vm1, %v3486_v25  ;;  %v1886_v14 = vadd.f32 %v1802_v47, %v1801_v12  ;;  %v3487_v25 = vld [vmem:[%s4442_s1 + $0xf8] sm:$0xff]  ;;  %v345_v12 = vld [vmem:[#allocation3 + $0x2f8] sm:$0xff] }
 0x202   :  { %v1074_v0 = vmax.f32 %v936_v23, 0.0  ;;  %v3021_v63 = vperm.slane %v2579_v26, %v3941_v44  ;;  %v344_v13 = vld [vmem:[#allocation3 + $0x2f0] sm:$0xff] }
 0x203   :  { %v2900_v55 = vsel %vm2864_vm14, %v2899_v60, %v2898_v6 }
 0x204   :  { %v3022_v4 = vsel %vm2860_vm13, %v3021_v63, %v3020_v30  ;;  %v1496_v9 = vpop.f32.mrf.mxu2  ;;  %v1665_v8 = vpop.f32.mrf.mxu3  ;;  %v1156_v20 = vadd.f32 %v1074_v0, %v1073_v32 }
 0x205   :  { %v1497_v34 = vadd.f32 %v1496_v9, %v4141_v18  ;;  %v1666_v54 = vadd.f32 %v1665_v8, %v4145_v3 }
 0x206   :  { %2445 = vadd.xlane.f32.xlu2 %v1886_v14  ;;  %2321 = vadd.xlane.f32.xlu0 %v1156_v20  ;;  %v769_v51 = vpop.f32.mrf.mxu0  ;;  %v2418_v21 = vpop.xlane.xlu1 %2417 }
 0x207   :  { %v770_v28 = vadd.f32 %v769_v51, %v342_v10  ;;  %v938_v11 = vpop.f32.mrf.mxu1  ;;  %v2580_v38 = vmul.f32 0.00390625, %v2418_v21  ;;  %v2292_v30 = vpop.xlane.xlu0 %2291  ;;  %v1803_v6 = vmax.f32 %v1497_v34, 0.0  ;;  %v1804_v24 = vmax.f32 %v1666_v54, 0.0  ;;  %v346_v34 = vld [vmem:[#allocation3 + $0x300] sm:$0xff]  ;;  %v347_v21 = vld [vmem:[#allocation3 + $0x308] sm:$0xff] }
 0x208   :  { %v939_v27 = vadd.f32 %v938_v11, %v343_v53  ;;  %v2517_v40 = vmul.f32 0.00390625, %v2292_v30 }
 0x209   :  { %v1075_v18 = vmax.f32 %v770_v28, 0.0  ;;  %v3023_v3 = vperm.slane %v2580_v38, %v3948_v62  ;;  %3358 = vmatmul.msk.bf16.gmra.mxu0 %vm543_vm1, %v3487_v25  ;;  %3390 = vmatmul.msk.bf16.gmra.mxu1 %vm543_vm1, %v3487_v25  ;;  %v1887_v1 = vadd.f32 %v1804_v24, %v1803_v6 }
 0x20a   :  { %v1076_v43 = vmax.f32 %v939_v27, 0.0  ;;  %v2901_v61 = vperm.slane %v2517_v40, %v3951_v50 }
 0x20b   :  { %v4179_v5 = vsel %vm2864_vm14, %v3023_v3, %v3022_v4 }
 0x20c   :  { %v2902_v46 = vsel %vm2868_vm15, %v2901_v61, %v2900_v55  ;;  %v1498_v58 = vpop.f32.mrf.mxu2  ;;  %v1667_v59 = vpop.f32.mrf.mxu3  ;;  %v1157_v22 = vadd.f32 %v1076_v43, %v1075_v18 }
 0x20d   :  { %v1499_v15 = vadd.f32 %v1498_v58, %v4158_v42  ;;  %v1668_v45 = vadd.f32 %v1667_v59, %v341_v7 }
 0x20e   :  { %2323 = vadd.xlane.f32.xlu1 %v1157_v22  ;;  %2447 = vadd.xlane.f32.xlu0 %v1887_v1  ;;  %v771_v47 = vpop.f32.mrf.mxu0  ;;  %v2294_v23 = vpop.xlane.xlu1 %2293  ;;  %v348_v22 = vld [vmem:[#allocation3 + $0x310] sm:$0xff] }
 0x20f   :  { %v772_v26 = vadd.f32 %v771_v47, %v344_v13  ;;  %v940_v32 = vpop.f32.mrf.mxu1  ;;  %v2518_v60 = vmul.f32 0.00390625, %v2294_v23  ;;  %v1805_v0 = vmax.f32 %v1499_v15, 0.0  ;;  %v1806_v63 = vmax.f32 %v1668_v45, 0.0  ;;  %v349_v45 = vld [vmem:[#allocation3 + $0x318] sm:$0xff] }
 0x210   :  { %v941_v37 = vadd.f32 %v940_v32, %v345_v12 }
 0x211   :  { %v1077_v55 = vmax.f32 %v772_v26, 0.0  ;;  %v2903_v4 = vperm.slane %v2518_v60, %v3971_v16  ;;  %3423 = vmatmul.msk.bf16.gmra.mxu2 %vm543_vm1, %v3487_v25  ;;  %3455 = vmatmul.msk.bf16.gmra.mxu3 %vm543_vm1, %v3487_v25  ;;  %v1888_v20 = vadd.f32 %v1806_v63, %v1805_v0  ;;  %v2296_v28 = vpop.xlane.xlu2 %2295  ;;  %v2669_v60 = vld [vmem:[#allocation6 + $0x1b0] sm:$0xff]  ;;  %vm4450_vm1 = vmmov %vm4449_vm12 }
 0x212   :  { %v1078_v42 = vmax.f32 %v941_v37, 0.0  ;;  %v2519_v27 = vmul.f32 0.00390625, %v2296_v28  ;;  %3169 = vmatpush.msrb.mxu3 %v2669_v60  ;;  %vm4451_vm12 = vmmov %vm4450_vm1 }
 0x213   :  { %v4187_v7 = vsel %vm2872_vm0, %v2903_v4, %v2902_v46 }
 0x214   :  { %v1501_v9 = vpop.f32.mrf.mxu2  ;;  %v1670_v8 = vpop.f32.mrf.mxu3  ;;  %v1158_v14 = vadd.f32 %v1078_v42, %v1077_v55 }
 0x215   :  { %v1502_v54 = vadd.f32 %v1501_v9, %v342_v10  ;;  %v1671_v51 = vadd.f32 %v1670_v8, %v343_v53  ;;  %v2905_v10 = vperm.slane %v2519_v27, %v3739_v17 }
 0x216   :  { %2325 = vadd.xlane.f32.xlu2 %v1158_v14  ;;  %2449 = vadd.xlane.f32.xlu1 %v1888_v20  ;;  %v774_v11 = vpop.f32.mrf.mxu0  ;;  %v350_v20 = vld [vmem:[#allocation3 + $0x320] sm:$0xff] }
 0x217   :  { %v775_v38 = vadd.f32 %v774_v11, %v346_v34  ;;  %v943_v30 = vpop.f32.mrf.mxu1  ;;  %v1807_v6 = vmax.f32 %v1502_v54, 0.0  ;;  %v1808_v25 = vmax.f32 %v1671_v51, 0.0  ;;  %v351_v11 = vld [vmem:[#allocation3 + $0x328] sm:$0xff] }
 0x218   :  { %v944_v24 = vadd.f32 %v943_v30, %v347_v21 }
 0x219   :  { %v1079_v40 = vmax.f32 %v775_v38, 0.0  ;;  %v2298_v18 = vpop.xlane.xlu0 %2297  ;;  %3116 = vmatmul.f32.vlgmr.msrb.gmra.mxu0 %v4011_v33  ;;  %v1889_v58 = vadd.f32 %v1808_v25, %v1807_v6  ;;  %v2653_v33 = vld [vmem:[#allocation6 + $0x130] sm:$0xff] }
 0x21a   :  { %v1080_v3 = vmax.f32 %v944_v24, 0.0  ;;  %v2520_v43 = vmul.f32 0.00390625, %v2298_v18  ;;  %3149 = vmatpush.msrb.mxu2 %v2653_v33 }
 0x21c   :  { %v2906_v53 = vperm.slane %v2520_v43, %v3749_v29  ;;  %v1503_v61 = vpop.f32.mrf.mxu2  ;;  %v1672_v46 = vpop.f32.mrf.mxu3  ;;  %v1159_v59 = vadd.f32 %v1080_v3, %v1079_v40 }
 0x21d   :  { %v1504_v1 = vadd.f32 %v1503_v61, %v344_v13  ;;  %v1673_v15 = vadd.f32 %v1672_v46, %v345_v12  ;;  %v2637_v13 = vld [vmem:[#allocation6 + $0xb0] sm:$0xff] }
 0x21e   :  { %v2907_v47 = vsel %vm2816_vm2, %v2906_v53, %v2905_v10  ;;  %2451 = vadd.xlane.f32.xlu2 %v1889_v58  ;;  %2327 = vadd.xlane.f32.xlu0 %v1159_v59  ;;  %v776_v23 = vpop.f32.mrf.mxu0  ;;  %v352_v58 = vld [vmem:[#allocation3 + $0x330] sm:$0xff] }
 0x21f   :  { %v777_v26 = vadd.f32 %v776_v23, %v348_v22  ;;  %v945_v32 = vpop.f32.mrf.mxu1  ;;  %v1809_v0 = vmax.f32 %v1504_v1, 0.0  ;;  %v1810_v63 = vmax.f32 %v1673_v15, 0.0  ;;  %3129 = vmatpush.msrb.mxu1 %v2637_v13  ;;  %v353_v23 = vld [vmem:[#allocation3 + $0x338] sm:$0xff] }
 0x220   :  { %v946_v37 = vadd.f32 %v945_v32, %v349_v45 }
 0x221   :  { %v1081_v55 = vmax.f32 %v777_v26, 0.0  ;;  %v2300_v42 = vpop.xlane.xlu1 %2299  ;;  %v1890_v14 = vadd.f32 %v1810_v63, %v1809_v0 }
 0x222   :  { %v1082_v4 = vmax.f32 %v946_v37, 0.0  ;;  %v2521_v54 = vmul.f32 0.00390625, %v2300_v42 }
 0x224   :  { %v1506_v12 = vpop.f32.mrf.mxu2  ;;  %v1675_v9 = vpop.f32.mrf.mxu3  ;;  %v1160_v8 = vadd.f32 %v1082_v4, %v1081_v55  ;;  %v2908_v40 = vperm.slane %v2521_v54, %v3759_v52 }
 0x225   :  { %v1507_v51 = vadd.f32 %v1506_v12, %v346_v34  ;;  %v1676_v28 = vadd.f32 %v1675_v9, %v347_v21 }
 0x226   :  { %2329 = vadd.xlane.f32.xlu1 %v1160_v8  ;;  %2453 = vadd.xlane.f32.xlu0 %v1890_v14  ;;  %v779_v38 = vpop.f32.mrf.mxu0  ;;  %v2909_v59 = vsel %vm2820_vm3, %v2908_v40, %v2907_v47  ;;  %v355_v8 = vld [vmem:[#allocation3 + $0x348] sm:$0xff] }
 0x227   :  { %v780_v30 = vadd.f32 %v779_v38, %v350_v20  ;;  %v948_v6 = vpop.f32.mrf.mxu1  ;;  %v1811_v25 = vmax.f32 %v1507_v51, 0.0  ;;  %v1812_v24 = vmax.f32 %v1676_v28, 0.0 }
 0x228   :  { %v949_v27 = vadd.f32 %v948_v6, %v351_v11 }
 0x229   :  { %v1083_v18 = vmax.f32 %v780_v30, 0.0  ;;  %v2302_v3 = vpop.xlane.xlu2 %2301  ;;  %v1891_v46 = vadd.f32 %v1812_v24, %v1811_v25 }
 0x22a   :  { %v1084_v43 = vmax.f32 %v949_v27, 0.0  ;;  %v2522_v10 = vmul.f32 0.00390625, %v2302_v3 }
 0x22c   :  { %v2910_v53 = vperm.slane %v2522_v10, %v3776_v41  ;;  %v1508_v61 = vpop.f32.mrf.mxu2  ;;  %v1677_v34 = vpop.f32.mrf.mxu3  ;;  %v1161_v21 = vadd.f32 %v1084_v43, %v1083_v18  ;;  %v356_v18 = vld [vmem:[#allocation3 + $0x350] sm:$0xff]  ;;  %v357_v10 = vld [vmem:[#allocation3 + $0x358] sm:$0xff] }
 0x22d   :  { %v1509_v1 = vadd.f32 %v1508_v61, %v348_v22  ;;  %v1678_v15 = vadd.f32 %v1677_v34, %v349_v45  ;;  %v354_v45 = vld [vmem:[#allocation3 + $0x340] sm:$0xff] }
 0x22e   :  { %v4197_v33 = vsel %vm2824_vm4, %v2910_v53, %v2909_v59  ;;  %2331 = vadd.xlane.f32.xlu2 %v1161_v21  ;;  %2455 = vadd.xlane.f32.xlu0 %v1891_v46  ;;  %v781_v26 = vpop.f32.mrf.mxu0 }
 0x22f   :  { %v1813_v32 = vmax.f32 %v1509_v1, 0.0  ;;  %v1814_v60 = vmax.f32 %v1678_v15, 0.0  ;;  %v782_v0 = vadd.f32 %v781_v26, %v352_v58  ;;  %v950_v63 = vpop.f32.mrf.mxu1  ;;  %v2668_v1 = vld [vmem:[#allocation6 + $0x1a8] sm:$0xff]  ;;  %v4201_v26 = vpop.xlane.xlu0 %2423 }
 0x230   :  { %v951_v37 = vadd.f32 %v950_v63, %v353_v23  ;;  %3170 = vmatpush.msrb.mxu3 %v2668_v1 }
 0x231   :  { %v1085_v55 = vmax.f32 %v782_v0, 0.0  ;;  %v1892_v4 = vadd.f32 %v1814_v60, %v1813_v32  ;;  %v4199_v53 = vpop.xlane.xlu2 %2427 }
 0x232   :  { %v1086_v42 = vmax.f32 %v951_v37, 0.0 }
 0x233   :  { %2457 = vadd.xlane.f32.xlu1 %v1892_v4 }
 0x234   :  { %v1511_v13 = vpop.f32.mrf.mxu2  ;;  %v1680_v47 = vpop.f32.mrf.mxu3  ;;  %v1162_v22 = vadd.f32 %v1086_v42, %v1085_v55  ;;  %v358_v55 = vld [vmem:[#allocation3 + $0x360] sm:$0xff] }
 0x235   :  { %v1512_v12 = vadd.f32 %v1511_v13, %v350_v20  ;;  %v1681_v9 = vadd.f32 %v1680_v47, %v351_v11  ;;  %v2652_v11 = vld [vmem:[#allocation6 + $0x128] sm:$0xff] }
 0x236   :  { %2333 = vadd.xlane.f32.xlu0 %v1162_v22  ;;  %v784_v14 = vpop.f32.mrf.mxu0  ;;  %3150 = vmatpush.msrb.mxu2 %v2652_v11  ;;  %v359_v13 = vld [vmem:[#allocation3 + $0x368] sm:$0xff] }
 0x237   :  { %v1815_v54 = vmax.f32 %v1512_v12, 0.0  ;;  %v1816_v51 = vmax.f32 %v1681_v9, 0.0  ;;  %v785_v28 = vadd.f32 %v784_v14, %v354_v45  ;;  %v953_v38 = vpop.f32.mrf.mxu1 }
 0x238   :  { %v954_v30 = vadd.f32 %v953_v38, %v355_v8 }
 0x239   :  { %v1893_v6 = vadd.f32 %v1816_v51, %v1815_v54  ;;  %v1087_v25 = vmax.f32 %v785_v28, 0.0  ;;  %v4203_v51 = vpop.xlane.xlu0 %2303  ;;  %v4205_v28 = vpop.xlane.xlu2 %2429 }
 0x23a   :  { %v1088_v24 = vmax.f32 %v954_v30, 0.0 }
 0x23b   :  { %2459 = vadd.xlane.f32.xlu1 %v1893_v6 }
 0x23c   :  { %v1513_v27 = vpop.f32.mrf.mxu2  ;;  %v1682_v40 = vpop.f32.mrf.mxu3  ;;  %v1163_v59 = vadd.f32 %v1088_v24, %v1087_v25 }
 0x23d   :  { %v1514_v3 = vadd.f32 %v1513_v27, %v352_v58  ;;  %v1683_v43 = vadd.f32 %v1682_v40, %v353_v23  ;;  %v2636_v23 = vld [vmem:[#allocation6 + $0xa8] sm:$0xff] }
 0x23e   :  { %v786_v20 = vpop.f32.mrf.mxu0  ;;  %3130 = vmatpush.msrb.mxu1 %v2636_v23  ;;  %v362_v23 = vld [vmem:[#allocation3 + $0x380] sm:$0xff] }
 0x23f   :  { %v1817_v61 = vmax.f32 %v1514_v3, 0.0  ;;  %v1818_v34 = vmax.f32 %v1683_v43, 0.0  ;;  %v787_v21 = vadd.f32 %v786_v20, %v356_v18  ;;  %v955_v46 = vpop.f32.mrf.mxu1  ;;  %v361_v3 = vld [vmem:[#allocation3 + $0x378] sm:$0xff] }
 0x240   :  { %v956_v15 = vadd.f32 %v955_v46, %v357_v10  ;;  %v4207_v46 = vpop.xlane.xlu1 %2425 }
 0x241   :  { %v1089_v32 = vmax.f32 %v787_v21, 0.0  ;;  %v1894_v60 = vadd.f32 %v1818_v34, %v1817_v61 }
 0x242   :  { %v1090_v58 = vmax.f32 %v956_v15, 0.0 }
 0x243   :  { %2335 = vadd.xlane.f32.xlu1 %v1163_v59  ;;  %2461 = vadd.xlane.f32.xlu0 %v1894_v60  ;;  %v4209_v59 = vpop.xlane.xlu0 %2431  ;;  %v4211_v60 = vpop.xlane.xlu2 %2307 }
 0x244   :  { %v1516_v0 = vpop.f32.mrf.mxu2  ;;  %v1685_v63 = vpop.f32.mrf.mxu3  ;;  %v1164_v37 = vadd.f32 %v1090_v58, %v1089_v32 }
 0x245   :  { %v1517_v4 = vadd.f32 %v1516_v0, %v354_v45  ;;  %v1686_v42 = vadd.f32 %v1685_v63, %v355_v8  ;;  %v360_v8 = vld [vmem:[#allocation3 + $0x370] sm:$0xff] }
 0x246   :  { %2337 = vadd.xlane.f32.xlu2 %v1164_v37  ;;  %v789_v47 = vpop.f32.mrf.mxu0  ;;  %v363_v37 = vld [vmem:[#allocation3 + $0x388] sm:$0xff] }
 0x247   :  { %v1819_v22 = vmax.f32 %v1517_v4, 0.0  ;;  %v1820_v12 = vmax.f32 %v1686_v42, 0.0  ;;  %v790_v9 = vadd.f32 %v789_v47, %v358_v55  ;;  %v958_v14 = vpop.f32.mrf.mxu1 }
 0x248   :  { %v959_v54 = vadd.f32 %v958_v14, %v359_v13  ;;  %v4213_v14 = vpop.xlane.xlu1 %2305 }
 0x249   :  { %v1091_v38 = vmax.f32 %v790_v9, 0.0  ;;  %v1895_v30 = vadd.f32 %v1820_v12, %v1819_v22 }
 0x24a   :  { %v1092_v6 = vmax.f32 %v959_v54, 0.0 }
 0x24b   :  { %2463 = vadd.xlane.f32.xlu1 %v1895_v30  ;;  %v4215_v54 = vpop.xlane.xlu0 %2309 }
 0x24c   :  { %v1518_v25 = vpop.f32.mrf.mxu2  ;;  %v1687_v24 = vpop.f32.mrf.mxu3  ;;  %v1165_v45 = vadd.f32 %v1092_v6, %v1091_v38 }
 0x24d   :  { %v1519_v27 = vadd.f32 %v1518_v25, %v356_v18  ;;  %v1688_v40 = vadd.f32 %v1687_v24, %v357_v10 }
 0x24e   :  { %2339 = vadd.xlane.f32.xlu0 %v1165_v45  ;;  %v791_v43 = vpop.f32.mrf.mxu0  ;;  %v4217_v45 = vpop.xlane.xlu2 %2433 }
 0x24f   :  { %v1821_v20 = vmax.f32 %v1519_v27, 0.0  ;;  %v1822_v11 = vmax.f32 %v1688_v40, 0.0  ;;  %v792_v61 = vadd.f32 %v791_v43, %v360_v8  ;;  %v960_v34 = vpop.f32.mrf.mxu1  ;;  %v365_v43 = vld [vmem:[#allocation3 + $0x398] sm:$0xff] }
 0x250   :  { %v961_v21 = vadd.f32 %v960_v34, %v361_v3 }
 0x251   :  { %v1093_v1 = vmax.f32 %v792_v61, 0.0  ;;  %v1896_v15 = vadd.f32 %v1822_v11, %v1821_v20  ;;  %v2651_v11 = vld [vmem:[#allocation6 + $0x120] sm:$0xff] }
 0x252   :  { %v1094_v32 = vmax.f32 %v961_v21, 0.0  ;;  %3151 = vmatpush.msrb.mxu2 %v2651_v11 }
 0x253   :  { %2465 = vadd.xlane.f32.xlu2 %v1896_v15  ;;  %v2667_v15 = vld [vmem:[#allocation6 + $0x1a0] sm:$0xff] }
 0x254   :  { %v1521_v18 = vpop.f32.mrf.mxu2  ;;  %v1690_v10 = vpop.f32.mrf.mxu3  ;;  %v1166_v58 = vadd.f32 %v1094_v32, %v1093_v1  ;;  %3171 = vmatpush.msrb.mxu3 %v2667_v15 }
 0x255   :  { %v1522_v0 = vadd.f32 %v1521_v18, %v358_v55  ;;  %v1691_v63 = vadd.f32 %v1690_v10, %v359_v13  ;;  %v364_v13 = vld [vmem:[#allocation3 + $0x390] sm:$0xff]  ;;  %v4219_v18 = vpop.xlane.xlu1 %2311 }
 0x256   :  { %2341 = vadd.xlane.f32.xlu1 %v1166_v58  ;;  %v794_v4 = vpop.f32.mrf.mxu0 }
 0x257   :  { %v1823_v42 = vmax.f32 %v1522_v0, 0.0  ;;  %v1824_v47 = vmax.f32 %v1691_v63, 0.0  ;;  %v795_v22 = vadd.f32 %v794_v4, %v362_v23  ;;  %v963_v12 = vpop.f32.mrf.mxu1  ;;  %v2635_v63 = vld [vmem:[#allocation6 + $0xa0] sm:$0xff] }
 0x258   :  { %v964_v9 = vadd.f32 %v963_v12, %v363_v37  ;;  %3131 = vmatpush.msrb.mxu1 %v2635_v63 }
 0x259   :  { %v1095_v38 = vmax.f32 %v795_v22, 0.0  ;;  %v1897_v30 = vadd.f32 %v1824_v47, %v1823_v42  ;;  %v366_v47 = vld [vmem:[#allocation3 + $0x3a0] sm:$0xff]  ;;  %v4223_v22 = vpop.xlane.xlu2 %2313 }
 0x25a   :  { %v1096_v6 = vmax.f32 %v964_v9, 0.0 }
 0x25b   :  { %2467 = vadd.xlane.f32.xlu0 %v1897_v30 }
 0x25c   :  { %v1523_v25 = vpop.f32.mrf.mxu2  ;;  %v1692_v24 = vpop.f32.mrf.mxu3  ;;  %v1167_v55 = vadd.f32 %v1096_v6, %v1095_v38  ;;  %v367_v38 = vld [vmem:[#allocation3 + $0x3a8] sm:$0xff] }
 0x25d   :  { %v1524_v27 = vadd.f32 %v1523_v25, %v360_v8  ;;  %v1693_v40 = vadd.f32 %v1692_v24, %v361_v3  ;;  %v4221_v8 = vpop.xlane.xlu0 %2435 }
 0x25e   :  { %2343 = vadd.xlane.f32.xlu2 %v1167_v55  ;;  %v796_v20 = vpop.f32.mrf.mxu0 }
 0x25f   :  { %v1825_v61 = vmax.f32 %v1524_v27, 0.0  ;;  %v1826_v34 = vmax.f32 %v1693_v40, 0.0  ;;  %v797_v21 = vadd.f32 %v796_v20, %v364_v13  ;;  %v965_v1 = vpop.f32.mrf.mxu1 }
 0x260   :  { %v966_v32 = vadd.f32 %v965_v1, %v365_v43 }
 0x261   :  { %v1097_v10 = vmax.f32 %v797_v21, 0.0  ;;  %v1898_v58 = vadd.f32 %v1826_v34, %v1825_v61  ;;  %v4225_v61 = vpop.xlane.xlu1 %2437 }
 0x262   :  { %v1098_v0 = vmax.f32 %v966_v32, 0.0 }
 0x263   :  { %2469 = vadd.xlane.f32.xlu1 %v1898_v58 }
 0x264   :  { %v1526_v3 = vpop.f32.mrf.mxu2  ;;  %v1695_v4 = vpop.f32.mrf.mxu3  ;;  %v1168_v42 = vadd.f32 %v1098_v0, %v1097_v10  ;;  %v369_v10 = vld [vmem:[#allocation3 + $0x3b8] sm:$0xff] }
 0x265   :  { %v1527_v12 = vadd.f32 %v1526_v3, %v362_v23  ;;  %v1696_v9 = vadd.f32 %v1695_v4, %v363_v37  ;;  %v4227_v34 = vpop.xlane.xlu0 %2315  ;;  %v368_v37 = vld [vmem:[#allocation3 + $0x3b0] sm:$0xff]  ;;  %v4229_v0 = vpop.xlane.xlu2 %2439 }
 0x266   :  { %2345 = vadd.xlane.f32.xlu0 %v1168_v42  ;;  %v799_v30 = vpop.f32.mrf.mxu0 }
 0x267   :  { %v1827_v6 = vmax.f32 %v1527_v12, 0.0  ;;  %v1828_v25 = vmax.f32 %v1696_v9, 0.0  ;;  %v800_v24 = vadd.f32 %v799_v30, %v366_v47  ;;  %v968_v55 = vpop.f32.mrf.mxu1 }
 0x268   :  { %v969_v27 = vadd.f32 %v968_v55, %v367_v38 }
 0x269   :  { %v1099_v40 = vmax.f32 %v800_v24, 0.0  ;;  %v1899_v20 = vadd.f32 %v1828_v25, %v1827_v6  ;;  %v4231_v25 = vpop.xlane.xlu1 %2317 }
 0x26a   :  { %v1100_v11 = vmax.f32 %v969_v27, 0.0 }
 0x26b   :  { %2471 = vadd.xlane.f32.xlu2 %v1899_v20  ;;  %v4235_v20 = vld [vmem:[#allocation3 + $0x3c8] sm:$0xff] }
 0x26c   :  { %v1528_v21 = vpop.f32.mrf.mxu2  ;;  %v1697_v1 = vpop.f32.mrf.mxu3  ;;  %v1169_v23 = vadd.f32 %v1100_v11, %v1099_v40 }
 0x26d   :  { %v1529_v15 = vadd.f32 %v1528_v21, %v364_v13  ;;  %v1698_v32 = vadd.f32 %v1697_v1, %v365_v43  ;;  %v4233_v43 = vld [vmem:[#allocation3 + $0x3c0] sm:$0xff]  ;;  %v4237_v11 = vpop.xlane.xlu0 %2441 }
 0x26e   :  { %2347 = vadd.xlane.f32.xlu1 %v1169_v23  ;;  %v801_v58 = vpop.f32.mrf.mxu0 }
 0x26f   :  { %v1829_v63 = vmax.f32 %v1529_v15, 0.0  ;;  %v1830_v3 = vmax.f32 %v1698_v32, 0.0  ;;  %v802_v4 = vadd.f32 %v801_v58, %v368_v37  ;;  %v970_v42 = vpop.f32.mrf.mxu1 }
 0x270   :  { %v971_v12 = vadd.f32 %v970_v42, %v369_v10  ;;  %v2649_v42 = vld [vmem:[#allocation6 + $0x110] sm:$0xff] }
 0x271   :  { %v1101_v9 = vmax.f32 %v802_v4, 0.0  ;;  %v1900_v30 = vadd.f32 %v1830_v3, %v1829_v63  ;;  %v4239_v1 = vpop.xlane.xlu2 %2319  ;;  %v2650_v63 = vld [vmem:[#allocation6 + $0x118] sm:$0xff] }
 0x272   :  { %v1102_v6 = vmax.f32 %v971_v12, 0.0  ;;  %3152 = vmatpush.msrb.mxu2 %v2650_v63  ;;  %v2583_v12 = vmul.f32 0.00390625, %v4201_v26  ;;  %v4252_v26 = vpop.xlane.xlu1 %2443 }
 0x273   :  { %2473 = vadd.xlane.f32.xlu0 %v1900_v30 }
 0x274   :  { %v1531_v24 = vpop.f32.mrf.mxu2  ;;  %v1700_v55 = vpop.f32.mrf.mxu3  ;;  %v1170_v13 = vadd.f32 %v1102_v6, %v1101_v9  ;;  %3153 = vmatpush.msrb.mxu2 %v2649_v42  ;;  %v2584_v9 = vmul.f32 0.00390625, %v4207_v46 }
 0x275   :  { %v1532_v27 = vadd.f32 %v1531_v24, %v366_v47  ;;  %v1701_v40 = vadd.f32 %v1700_v55, %v367_v38  ;;  %v4245_v55 = vld [vmem:[#allocation3 + $0x3d0] sm:$0xff] }
 0x276   :  { %2349 = vadd.xlane.f32.xlu2 %v1170_v13  ;;  %v804_v21 = vpop.f32.mrf.mxu0  ;;  %v2648_v13 = vld [vmem:[#allocation6 + $0x108] sm:$0xff] }
 0x277   :  { %v1831_v23 = vmax.f32 %v1532_v27, 0.0  ;;  %v1832_v15 = vmax.f32 %v1701_v40, 0.0  ;;  %v805_v32 = vadd.f32 %v804_v21, %v4233_v43  ;;  %v973_v58 = vpop.f32.mrf.mxu1  ;;  %v2585_v27 = vmul.f32 0.00390625, %v4199_v53  ;;  %3154 = vmatpush.msrb.mxu2 %v2648_v13 }
 0x278   :  { %v974_v3 = vadd.f32 %v973_v58, %v4235_v20  ;;  %v2523_v40 = vmul.f32 0.00390625, %v4203_v51  ;;  %v2647_v58 = vld [vmem:[#allocation6 + $0x100] sm:$0xff]  ;;  %v2666_v51 = vld [vmem:[#allocation6 + $0x198] sm:$0xff] }
 0x279   :  { %v1103_v4 = vmax.f32 %v805_v32, 0.0  ;;  %v1901_v47 = vadd.f32 %v1832_v15, %v1831_v23  ;;  %v4249_v15 = vld [vmem:[#allocation3 + $0x3d8] sm:$0xff]  ;;  %v2586_v32 = vmul.f32 0.00390625, %v4205_v28  ;;  %v4254_v63 = vpop.xlane.xlu0 %2321  ;;  %3155 = vmatpush.msrb.mxu2 %v2647_v58  ;;  %3172 = vmatpush.msrb.mxu3 %v2666_v51  ;;  %v3032_v42 = vperm.slane %v2585_v27, %v3759_v52 }
 0x27a   :  { %v1104_v38 = vmax.f32 %v974_v3, 0.0  ;;  %v2588_v27 = vmul.f32 0.00390625, %v4217_v45 }
 0x27b   :  { %2475 = vadd.xlane.f32.xlu1 %v1901_v47 }
 0x27c   :  { %v1533_v30 = vpop.f32.mrf.mxu2  ;;  %v1702_v6 = vpop.f32.mrf.mxu3  ;;  %v1171_v24 = vadd.f32 %v1104_v38, %v1103_v4  ;;  %v3030_v38 = vperm.slane %v2584_v9, %v3749_v29  ;;  %v2525_v9 = vmul.f32 0.00390625, %v4211_v60 }
 0x27d   :  { %v1534_v21 = vadd.f32 %v1533_v30, %v368_v37  ;;  %v1703_v23 = vadd.f32 %v1702_v6, %v369_v10  ;;  %v2634_v37 = vld [vmem:[#allocation6 + $0x98] sm:$0xff]  ;;  %v3029_v10 = vperm.slane %v2583_v12, %v3739_v17  ;;  %v2912_v30 = vperm.slane %v2523_v40, %v3788_v56  ;;  %v4262_v6 = vpop.xlane.xlu2 %2445 }
 0x27e   :  { %2351 = vadd.xlane.f32.xlu0 %v1171_v24  ;;  %v806_v46 = vpop.f32.mrf.mxu0  ;;  %3132 = vmatpush.msrb.mxu1 %v2634_v37  ;;  %v2587_v12 = vmul.f32 0.00390625, %v4209_v59  ;;  %v2526_v40 = vmul.f32 0.00390625, %v4215_v54 }
 0x27f   :  { %v1833_v3 = vmax.f32 %v1534_v21, 0.0  ;;  %v1834_v4 = vmax.f32 %v1703_v23, 0.0  ;;  %v807_v53 = vadd.f32 %v806_v46, %v4245_v55  ;;  %v975_v47 = vpop.f32.mrf.mxu1  ;;  %v3034_v21 = vperm.slane %v2586_v32, %v3776_v41 }
 0x280   :  { %v976_v28 = vadd.f32 %v975_v47, %v4249_v15  ;;  %v2524_v23 = vmul.f32 0.00390625, %v4213_v14  ;;  %v3031_v58 = vsel %vm2816_vm2, %v3030_v38, %v3029_v10  ;;  %v2913_v59 = vsel %vm2828_vm5, %v2912_v30, %v4197_v33 }
 0x281   :  { %v1105_v24 = vmax.f32 %v807_v53, 0.0  ;;  %v1902_v13 = vadd.f32 %v1834_v4, %v1833_v3  ;;  %v4271_v3 = vld [vmem:[#allocation3 + $0x3e0] sm:$0xff]  ;;  %v3033_v32 = vsel %vm2820_vm3, %v3032_v42, %v3031_v58  ;;  %v4278_v4 = vld [vmem:[#allocation3 + $0x3e8] sm:$0xff]  ;;  %v3036_v37 = vperm.slane %v2587_v12, %v3788_v56  ;;  %v4285_v42 = vpop.xlane.xlu1 %2323 }
 0x282   :  { %v1106_v46 = vmax.f32 %v976_v28, 0.0  ;;  %v3035_v45 = vsel %vm2824_vm4, %v3034_v21, %v3033_v32  ;;  %v2914_v54 = vperm.slane %v2524_v23, %v3820_v48  ;;  %v2527_v10 = vmul.f32 0.00390625, %v4219_v18 }
 0x283   :  { %2477 = vadd.xlane.f32.xlu2 %v1902_v13  ;;  %v2916_v28 = vperm.slane %v2525_v9, %v3823_v49  ;;  %v2918_v13 = vperm.slane %v2526_v40, %v3850_v31  ;;  %v2589_v21 = vmul.f32 0.00390625, %v4221_v8  ;;  %v2528_v18 = vmul.f32 0.00390625, %v4223_v22 }
 0x284   :  { %v1536_v47 = vpop.f32.mrf.mxu2  ;;  %v1705_v51 = vpop.f32.mrf.mxu3  ;;  %v1172_v53 = vadd.f32 %v1106_v46, %v1105_v24  ;;  %v3038_v24 = vperm.slane %v2588_v27, %v3820_v48  ;;  %v2590_v12 = vmul.f32 0.00390625, %v4225_v61  ;;  %v2529_v27 = vmul.f32 0.00390625, %v4227_v34 }
 0x285   :  { %v1537_v14 = vadd.f32 %v1536_v47, %v4233_v43  ;;  %v1706_v60 = vadd.f32 %v1705_v51, %v4235_v20  ;;  %v2448_v46 = vpop.xlane.xlu0 %2447  ;;  %v2915_v51 = vsel %vm2832_vm6, %v2914_v54, %v2913_v59  ;;  %v3037_v8 = vsel %vm2828_vm5, %v3036_v37, %v3035_v45  ;;  %v4304_v59 = vld [vmem:[#allocation3 + $0x3f0] sm:$0xff] }
 0x286   :  { %2353 = vadd.xlane.f32.xlu1 %v1172_v53  ;;  %v809_v38 = vpop.f32.mrf.mxu0  ;;  %v2920_v53 = vperm.slane %v2527_v10, %v3860_v39  ;;  %v2917_v32 = vsel %vm2836_vm7, %v2916_v28, %v2915_v51  ;;  %v3039_v22 = vsel %vm2832_vm6, %v3038_v24, %v3037_v8  ;;  %v2922_v54 = vperm.slane %v2528_v18, %v3870_v57  ;;  %v4310_v10 = vld [vmem:[#allocation3 + $0x3f8] sm:$0xff] }
 0x287   :  { %v1835_v33 = vmax.f32 %v1537_v14, 0.0  ;;  %v1836_v43 = vmax.f32 %v1706_v60, 0.0  ;;  %v810_v20 = vadd.f32 %v809_v38, %v4271_v3  ;;  %v978_v30 = vpop.f32.mrf.mxu1  ;;  %v2919_v61 = vsel %vm2840_vm8, %v2918_v13, %v2917_v32 }
 0x288   :  { %v979_v23 = vadd.f32 %v978_v30, %v4278_v4  ;;  %v3040_v14 = vperm.slane %v2589_v21, %v3823_v49  ;;  %v3042_v34 = vperm.slane %v2590_v12, %v3850_v31  ;;  %v2921_v28 = vsel %vm2844_vm9, %v2920_v53, %v2919_v61 }
 0x289   :  { %v1107_v9 = vmax.f32 %v810_v20, 0.0  ;;  %v4294_v58 = vpop.xlane.xlu2 %2325  ;;  %v1903_v47 = vadd.f32 %v1836_v43, %v1835_v33  ;;  %v2591_v43 = vmul.f32 0.00390625, %v4229_v0  ;;  %v2924_v20 = vperm.slane %v2529_v27, %v3930_v19  ;;  %v2450_v51 = vpop.xlane.xlu1 %2449 }
 0x28a   :  { %v1108_v40 = vmax.f32 %v979_v23, 0.0  ;;  %v2530_v30 = vmul.f32 0.00390625, %v4231_v25  ;;  %v2592_v13 = vmul.f32 0.00390625, %v4237_v11  ;;  %v2531_v12 = vmul.f32 0.00390625, %v4239_v1 }
 0x28b   :  { %2479 = vadd.xlane.f32.xlu0 %v1903_v47  ;;  %v2923_v47 = vsel %vm2848_vm10, %v2922_v54, %v2921_v28  ;;  %v2594_v32 = vmul.f32 0.00390625, %v4262_v6  ;;  %v2596_v54 = vmul.f32 0.00390625, %v2450_v51 }
 0x28c   :  { %v1538_v60 = vpop.f32.mrf.mxu2  ;;  %v1707_v38 = vpop.f32.mrf.mxu3  ;;  %v1173_v33 = vadd.f32 %v1108_v40, %v1107_v9  ;;  %v2593_v9 = vmul.f32 0.00390625, %v4252_v26  ;;  %v3044_v40 = vperm.slane %v2591_v43, %v3860_v39  ;;  %v2926_v8 = vperm.slane %v2530_v30, %v3937_v36 }
 0x28d   :  { %v1539_v45 = vadd.f32 %v1538_v60, %v4245_v55  ;;  %v1708_v37 = vadd.f32 %v1707_v38, %v4249_v15  ;;  %v3041_v15 = vsel %vm2836_vm7, %v3040_v14, %v3039_v22  ;;  %v2925_v26 = vsel %vm2852_vm11, %v2924_v20, %v2923_v47 }
 0x28e   :  { %2355 = vadd.xlane.f32.xlu2 %v1173_v33  ;;  %v811_v24 = vpop.f32.mrf.mxu0  ;;  %v3043_v25 = vsel %vm2840_vm8, %v3042_v34, %v3041_v15  ;;  %v3046_v61 = vperm.slane %v2592_v13, %v3870_v57  ;;  %v2532_v14 = vmul.f32 0.00390625, %v4254_v63  ;;  %v2595_v60 = vmul.f32 0.00390625, %v2448_v46 }
 0x28f   :  { %v1837_v21 = vmax.f32 %v1539_v45, 0.0  ;;  %v1838_v23 = vmax.f32 %v1708_v37, 0.0  ;;  %v812_v55 = vadd.f32 %v811_v24, %v4304_v59  ;;  %v980_v18 = vpop.f32.mrf.mxu1  ;;  %v2928_v38 = vperm.slane %v2531_v12, %v3941_v44 }
 0x290   :  { %v981_v0 = vadd.f32 %v980_v18, %v4310_v10  ;;  %v3048_v33 = vperm.slane %v2593_v9, %v3930_v19  ;;  %v2533_v37 = vmul.f32 0.00390625, %v4285_v42  ;;  %v3045_v63 = vsel %vm2844_vm9, %v3044_v40, %v3043_v25 }
 0x291   :  { %v1109_v53 = vmax.f32 %v812_v55, 0.0  ;;  %v2328_v11 = vpop.xlane.xlu0 %2327  ;;  %v1904_v27 = vadd.f32 %v1838_v23, %v1837_v21  ;;  %v2452_v1 = vpop.xlane.xlu2 %2451  ;;  %v2927_v46 = vsel %vm4450_vm1, %v2926_v8, %v2925_v26  ;;  %v2534_v30 = vmul.f32 0.00390625, %v4294_v58 }
 0x292   :  { %v1110_v22 = vmax.f32 %v981_v0, 0.0  ;;  %v2597_v28 = vmul.f32 0.00390625, %v2452_v1  ;;  %v2930_v24 = vperm.slane %v2532_v14, %v3948_v62  ;;  %v3052_v13 = vperm.slane %v2595_v60, %v3941_v44 }
 0x293   :  { %2481 = vadd.xlane.f32.xlu1 %v1904_v27  ;;  %2419 = vadd.xlane.f32.xlu0 %v3994_v35  ;;  %v3050_v35 = vperm.slane %v2594_v32, %v3937_v36  ;;  %v3047_v23 = vsel %vm2848_vm10, %v3046_v61, %v3045_v63  ;;  %v2535_v55 = vmul.f32 0.00390625, %v2328_v11  ;;  %v2932_v15 = vperm.slane %v2533_v37, %v3951_v50 }
 0x294   :  { %v1541_v34 = vpop.f32.mrf.mxu2  ;;  %v1710_v45 = vpop.f32.mrf.mxu3  ;;  %v1174_v6 = vadd.f32 %v1110_v22, %v1109_v53  ;;  %v3049_v18 = vsel %vm2852_vm11, %v3048_v33, %v3047_v23  ;;  %v3056_v58 = vperm.slane %v2597_v28, %v3951_v50  ;;  %v2934_v25 = vperm.slane %v2534_v30, %v3971_v16 }
 0x295   :  { %v1542_v43 = vadd.f32 %v1541_v34, %v4271_v3  ;;  %v1711_v20 = vadd.f32 %v1710_v45, %v4278_v4  ;;  %v2929_v3 = vsel %vm2860_vm13, %v2928_v38, %v2927_v46  ;;  %v3054_v4 = vperm.slane %v2596_v54, %v3948_v62  ;;  %v2665_v45 = vld [vmem:[#allocation6 + $0x190] sm:$0xff] }
 0x296   :  { %2357 = vadd.xlane.f32.xlu2 %v1174_v6  ;;  %v3051_v47 = vsel %vm4451_vm12, %v3050_v35, %v3049_v18  ;;  %v2931_v27 = vsel %vm2864_vm14, %v2930_v24, %v2929_v3  ;;  %v2936_v8 = vperm.slane %v2535_v55, %v3739_v17  ;;  %vm4452_vm1 = vcmask 1041409   ;;  %3173 = vmatpush.msrb.mxu3 %v2665_v45  ;;  %v2664_v3 = vld [vmem:[#allocation6 + $0x188] sm:$0xff] }
 0x297   :  { %v1839_v21 = vmax.f32 %v1542_v43, 0.0  ;;  %v1840_v42 = vmax.f32 %v1711_v20, 0.0  ;;  %v3053_v40 = vsel %vm2860_vm13, %v3052_v13, %v3051_v47  ;;  %v2933_v61 = vsel %vm2868_vm15, %v2932_v15, %v2931_v27  ;;  %v2631_v47 = vld [vmem:[#allocation6 + $0x80] sm:$0xff] }
 0x298   :  { %v3055_v11 = vsel %vm2864_vm14, %v3054_v4, %v3053_v40  ;;  %v2935_v54 = vsel %vm2872_vm0, %v2934_v25, %v2933_v61  ;;  %3174 = vmatpush.msrb.mxu3 %v2664_v3 }
 0x299   :  { %v2330_v12 = vpop.xlane.xlu1 %2329  ;;  %v2454_v9 = vpop.xlane.xlu0 %2453  ;;  %v1905_v0 = vadd.f32 %v1840_v42, %v1839_v21  ;;  %v3057_v14 = vsel %vm2868_vm15, %v3056_v58, %v3055_v11 }
 0x29a   :  { %v2536_v51 = vmul.f32 0.00390625, %v2330_v12  ;;  %v2598_v53 = vmul.f32 0.00390625, %v2454_v9 }
 0x29b   :  { %2483 = vadd.xlane.f32.xlu1 %v1905_v0 }
 0x29c   :  { %v2937_v32 = vperm.slane %v2536_v51, %v3749_v29  ;;  %v3058_v22 = vperm.slane %v2598_v53, %v3971_v16  ;;  %v1543_v1 = vpop.f32.mrf.mxu2  ;;  %v1712_v26 = vpop.f32.mrf.mxu3 }
 0x29d   :  { %v1544_v60 = vadd.f32 %v1543_v1, %v4304_v59  ;;  %v1713_v38 = vadd.f32 %v1712_v26, %v4310_v10  ;;  %v2633_v59 = vld [vmem:[#allocation6 + $0x90] sm:$0xff] }
 0x29e   :  { %v4361_v33 = vsel %vm2816_vm2, %v2937_v32, %v2936_v8  ;;  %v3059_v34 = vsel %vm2872_vm0, %v3058_v22, %v3057_v14  ;;  %3133 = vmatpush.msrb.mxu1 %v2633_v59 }
 0x29f   :  { %v1841_v6 = vmax.f32 %v1544_v60, 0.0  ;;  %v1842_v37 = vmax.f32 %v1713_v38, 0.0  ;;  %v3094_v28 = vsel %vm4452_vm1, %v3059_v34, %v2935_v54 }
 0x2a0   :  { %3156 = vmatmul.f32.vlgmr.msrb.gmra.mxu2 %v3094_v28 }
 0x2a1   :  { %v1906_v43 = vadd.f32 %v1842_v37, %v1841_v6  ;;  %v2456_v20 = vpop.xlane.xlu0 %2455  ;;  %v2332_v4 = vpop.xlane.xlu2 %2331 }
 0x2a2   :  { %v2599_v46 = vmul.f32 0.00390625, %v2456_v20  ;;  %v2537_v14 = vmul.f32 0.00390625, %v2332_v4 }
 0x2a3   :  { %2485 = vadd.xlane.f32.xlu2 %v1906_v43  ;;  %2421 = vadd.xlane.f32.xlu1 %v4016_v2  ;;  %v2632_v2 = vld [vmem:[#allocation6 + $0x88] sm:$0xff] }
 0x2a4   :  { %v3060_v13 = vperm.slane %v2599_v46, %v3739_v17  ;;  %3134 = vmatpush.msrb.mxu1 %v2632_v2  ;;  %v2663_v17 = vld [vmem:[#allocation6 + $0x180] sm:$0xff]  ;;  %v2939_v54 = vperm.slane %v2537_v14, %v3759_v52 }
 0x2a5   :  { %3175 = vmatpush.msrb.mxu3 %v2663_v17 }
 0x2a6   :  { %v2458_v10 = vpop.xlane.xlu1 %2457  ;;  %3135 = vmatpush.msrb.mxu1 %v2631_v47 }
 0x2a7   :  { %v2600_v63 = vmul.f32 0.00390625, %v2458_v10 }
 0x2a9   :  { %v3061_v35 = vperm.slane %v2600_v63, %v3749_v29  ;;  %v2334_v18 = vpop.xlane.xlu0 %2333 }
 0x2aa   :  { %v2538_v60 = vmul.f32 0.00390625, %v2334_v18 }
 0x2ab   :  { %v3062_v42 = vsel %vm2816_vm2, %v3061_v35, %v3060_v13  ;;  %vm4453_vm2 = vmmov %vm4451_vm12 }
 0x2ac   :  { %v2941_v45 = vperm.slane %v2538_v60, %v3776_v41 }
 0x2ae   :  { %v2460_v30 = vpop.xlane.xlu1 %2459 }
 0x2af   :  { %v2601_v24 = vmul.f32 0.00390625, %v2460_v30  ;;  %v2940_v30 = vsel %vm2820_vm3, %v2939_v54, %v4361_v33 }
 0x2b0   :  { %v2942_v13 = vsel %vm2824_vm4, %v2941_v45, %v2940_v30 }
 0x2b1   :  { %v3063_v21 = vperm.slane %v2601_v24, %v3759_v52 }
 0x2b3   :  { %v3064_v23 = vsel %vm2820_vm3, %v3063_v21, %v3062_v42  ;;  %vm4454_vm3 = vmmov %vm4453_vm2 }
 0x2b6   :  { %v2336_v55 = vpop.xlane.xlu1 %2335  ;;  %v2462_v58 = vpop.xlane.xlu0 %2461 }
 0x2b7   :  { %v2539_v38 = vmul.f32 0.00390625, %v2336_v55  ;;  %v2602_v34 = vmul.f32 0.00390625, %v2462_v58 }
 0x2b9   :  { %v2338_v15 = vpop.xlane.xlu2 %2337  ;;  %v2943_v43 = vperm.slane %v2539_v38, %v3788_v56  ;;  %v3065_v24 = vperm.slane %v2602_v34, %v3776_v41 }
 0x2ba   :  { %v2540_v6 = vmul.f32 0.00390625, %v2338_v15 }
 0x2bb   :  { %v2944_v3 = vsel %vm2828_vm5, %v2943_v43, %v2942_v13  ;;  %v3066_v33 = vsel %vm2824_vm4, %v3065_v24, %v3064_v23  ;;  %vm4455_vm4 = vmmov %vm4452_vm1 }
 0x2bc   :  { %v2945_v21 = vperm.slane %v2540_v6, %v3820_v48 }
 0x2be   :  { %v2464_v29 = vpop.xlane.xlu1 %2463 }
 0x2bf   :  { %v2603_v37 = vmul.f32 0.00390625, %v2464_v29  ;;  %v2946_v29 = vsel %vm2832_vm6, %v2945_v21, %v2944_v3 }
 0x2c1   :  { %v2340_v9 = vpop.xlane.xlu0 %2339  ;;  %v3067_v42 = vperm.slane %v2603_v37, %v3788_v56 }
 0x2c2   :  { %v2541_v59 = vmul.f32 0.00390625, %v2340_v9 }
 0x2c3   :  { %v3068_v56 = vsel %vm2828_vm5, %v3067_v42, %v3066_v33  ;;  %vm4456_vm5 = vmmov %vm4452_vm1 }
 0x2c4   :  { %v2947_v2 = vperm.slane %v2541_v59, %v3823_v49 }
 0x2c6   :  { %v2466_v12 = vpop.xlane.xlu2 %2465 }
 0x2c7   :  { %v2604_v10 = vmul.f32 0.00390625, %v2466_v12 }
 0x2c9   :  { %v2342_v0 = vpop.xlane.xlu1 %2341  ;;  %v3069_v4 = vperm.slane %v2604_v10, %v3820_v48 }
 0x2ca   :  { %v2542_v63 = vmul.f32 0.00390625, %v2342_v0  ;;  %v2948_v0 = vsel %vm2836_vm7, %v2947_v2, %v2946_v29 }
 0x2cb   :  { %v3070_v48 = vsel %vm2832_vm6, %v3069_v4, %v3068_v56 }
 0x2cc   :  { %v2949_v55 = vperm.slane %v2542_v63, %v3850_v31 }
 0x2ce   :  { %v2468_v51 = vpop.xlane.xlu0 %2467 }
 0x2cf   :  { %v2605_v46 = vmul.f32 0.00390625, %v2468_v51 }
 0x2d1   :  { %v2344_v25 = vpop.xlane.xlu2 %2343  ;;  %v3071_v18 = vperm.slane %v2605_v46, %v3823_v49  ;;  %v2950_v49 = vsel %vm2840_vm8, %v2949_v55, %v2948_v0 }
 0x2d2   :  { %v2543_v52 = vmul.f32 0.00390625, %v2344_v25 }
 0x2d3   :  { %v3072_v23 = vsel %vm2836_vm7, %v3071_v18, %v3070_v48 }
 0x2d4   :  { %v2951_v41 = vperm.slane %v2543_v52, %v3860_v39 }
 0x2d6   :  { %v2470_v53 = vpop.xlane.xlu1 %2469 }
 0x2d7   :  { %v2606_v15 = vmul.f32 0.00390625, %v2470_v53 }
 0x2d9   :  { %v2346_v40 = vpop.xlane.xlu0 %2345  ;;  %v3073_v14 = vperm.slane %v2606_v15, %v3850_v31 }
 0x2da   :  { %v2544_v58 = vmul.f32 0.00390625, %v2346_v40  ;;  %v2952_v40 = vsel %vm2844_vm9, %v2951_v41, %v2950_v49 }
 0x2de   :  { %v2472_v27 = vpop.xlane.xlu2 %2471 }
 0x2df   :  { %v2607_v12 = vmul.f32 0.00390625, %v2472_v27  ;;  %v2953_v27 = vperm.slane %v2544_v58, %v3870_v57 }
 0x2e1   :  { %v2348_v11 = vpop.xlane.xlu1 %2347  ;;  %v3075_v38 = vperm.slane %v2607_v12, %v3860_v39  ;;  %v2954_v10 = vsel %vm2848_vm10, %v2953_v27, %v2952_v40 }
 0x2e2   :  { %v2545_v9 = vmul.f32 0.00390625, %v2348_v11 }
 0x2e6   :  { %v2474_v32 = vpop.xlane.xlu0 %2473 }
 0x2e7   :  { %v2608_v17 = vmul.f32 0.00390625, %v2474_v32  ;;  %v2955_v32 = vperm.slane %v2545_v9, %v3930_v19 }
 0x2e9   :  { %v2350_v8 = vpop.xlane.xlu2 %2349  ;;  %v3077_v34 = vperm.slane %v2608_v17, %v3870_v57  ;;  %v2956_v57 = vsel %vm2852_vm11, %v2955_v32, %v2954_v10 }
 0x2ea   :  { %v2546_v47 = vmul.f32 0.00390625, %v2350_v8 }
 0x2ee   :  { %v2476_v22 = vpop.xlane.xlu1 %2475 }
 0x2ef   :  { %v2609_v25 = vmul.f32 0.00390625, %v2476_v22  ;;  %v2957_v22 = vperm.slane %v2546_v47, %v3937_v36 }
 0x2f1   :  { %v2352_v26 = vpop.xlane.xlu0 %2351  ;;  %v3079_v37 = vperm.slane %v2609_v25, %v3930_v19 }
 0x2f2   :  { %v2547_v8 = vmul.f32 0.00390625, %v2352_v26 }
 0x2f6   :  { %v2478_v1 = vpop.xlane.xlu2 %2477 }
 0x2f7   :  { %v2610_v11 = vmul.f32 0.00390625, %v2478_v1  ;;  %v3074_v1 = vsel %vm2840_vm8, %v3073_v14, %v3072_v23 }
 0x2f8   :  { %v3076_v26 = vsel %vm2844_vm9, %v3075_v38, %v3074_v1 }
 0x2f9   :  { %v2354_v61 = vpop.xlane.xlu1 %2353  ;;  %v3081_v39 = vperm.slane %v2610_v11, %v3937_v36  ;;  %v3078_v19 = vsel %vm2848_vm10, %v3077_v34, %v3076_v26 }
 0x2fa   :  { %v2548_v45 = vmul.f32 0.00390625, %v2354_v61  ;;  %v3080_v30 = vsel %vm2852_vm11, %v3079_v37, %v3078_v19 }
 0x2fc   :  { %v2961_v46 = vperm.slane %v2548_v45, %v3948_v62 }
 0x2fe   :  { %v2480_v20 = vpop.xlane.xlu0 %2479 }
 0x2ff   :  { %v2611_v54 = vmul.f32 0.00390625, %v2480_v20  ;;  %v2959_v20 = vperm.slane %v2547_v8, %v3941_v44 }
 0x301   :  { %v2356_v28 = vpop.xlane.xlu2 %2355  ;;  %v3083_v61 = vperm.slane %v2611_v54, %v3941_v44  ;;  %v3082_v44 = vsel %vm4454_vm3, %v3081_v39, %v3080_v30 }
 0x302   :  { %v2549_v43 = vmul.f32 0.00390625, %v2356_v28  ;;  %v2958_v28 = vsel %vm4453_vm2, %v2957_v22, %v2956_v57 }
 0x303   :  { %v2960_v4 = vsel %vm2860_vm13, %v2959_v20, %v2958_v28 }
 0x304   :  { %v2963_v36 = vperm.slane %v2549_v43, %v3951_v50  ;;  %v2962_v55 = vsel %vm2864_vm14, %v2961_v46, %v2960_v4 }
 0x306   :  { %v2482_v35 = vpop.xlane.xlu1 %2481  ;;  %v2420_v60 = vpop.xlane.xlu0 %2419  ;;  %v2964_v41 = vsel %vm2868_vm15, %v2963_v36, %v2962_v55 }
 0x307   :  { %v2612_v6 = vmul.f32 0.00390625, %v2482_v35  ;;  %v2581_v31 = vmul.f32 0.00390625, %v2420_v60 }
 0x309   :  { %v2358_v51 = vpop.xlane.xlu2 %2357  ;;  %v3085_v35 = vperm.slane %v2612_v6, %v3948_v62  ;;  %v3025_v24 = vperm.slane %v2581_v31, %v3951_v50  ;;  %v3084_v62 = vsel %vm2860_vm13, %v3083_v61, %v3082_v44 }
 0x30a   :  { %v2550_v63 = vmul.f32 0.00390625, %v2358_v51 }
 0x30b   :  { %v3086_v18 = vsel %vm2864_vm14, %v3085_v35, %v3084_v62  ;;  %v3026_v15 = vsel %vm2868_vm15, %v3025_v24, %v4179_v5  ;;  %v3117_v5 = vpop.f32.mrf.mxu0 }
 0x30c   :  { %v2965_v42 = vperm.slane %v2550_v63, %v3971_v16 }
 0x30e   :  { %v2484_v53 = vpop.xlane.xlu1 %2483  ;;  %v2966_v56 = vsel %vm2872_vm0, %v2965_v42, %v2964_v41 }
 0x30f   :  { %v2613_v59 = vmul.f32 0.00390625, %v2484_v53 }
 0x311   :  { %v3087_v52 = vperm.slane %v2613_v59, %v3951_v50 }
 0x313   :  { %v3088_v58 = vsel %vm2868_vm15, %v3087_v52, %v3086_v18 }
 0x316   :  { %v2486_v13 = vpop.xlane.xlu2 %2485  ;;  %v2422_v21 = vpop.xlane.xlu1 %2421 }
 0x317   :  { %v2614_v3 = vmul.f32 0.00390625, %v2486_v13  ;;  %v2582_v2 = vmul.f32 0.00390625, %v2422_v21 }
 0x319   :  { %v3089_v33 = vperm.slane %v2614_v3, %v3971_v16  ;;  %v3027_v50 = vperm.slane %v2582_v2, %v3971_v16  ;;  %v3495_v16 = vld [vmem:[%s4445_s4] ss:$0 sm:$0xff] }
 0x31a   :  { %v3118_v48 = vadd.f32 %v3495_v16, %v3117_v5 }
 0x31b   :  { %v3028_v29 = vsel %vm2872_vm0, %v3027_v50, %v3026_v15  ;;  %v3090_v12 = vsel %vm2872_vm0, %v3089_v33, %v3088_v58 }
 0x31c   :  { %v3093_v9 = vsel %vm4455_vm4, %v3028_v29, %v4187_v7  ;;  %v3095_v0 = vsel %vm4456_vm5, %v3090_v12, %v2966_v56 }
 0x31d   :  { %3136 = vmatmul.f32.vlgmr.msrb.gmra.mxu1 %v3093_v9  ;;  %3176 = vmatmul.f32.vlgmr.msrb.gmra.mxu3 %v3095_v0 }
 0x323   :  { %v3157_v49 = vpop.f32.mrf.mxu2 }
 0x39a   :  { %v3137_v17 = vpop.f32.mrf.mxu1 }
 0x39b   :  { %v3138_v47 = vadd.f32 %v3137_v17, %v3118_v48 }
 0x39d   :  { %v3158_v7 = vadd.f32 %v3157_v49, %v3138_v47 }
 0x3a0   :  { %v3177_v23 = vpop.f32.mrf.mxu3 }
 0x3a1   :  { %v3178_v25 = vadd.f32 %v3177_v23, %v3158_v7 }
 0x3a3   :  { %3180 = vst [vmem:[#allocation8] sm:$0x3] %v3178_v25 }
 0x3a4   :  { %3191 = dma.vmem_to_hbm [thread:$0]  %s3187_s18, 32, %s3189_s21, [#allocation5]  }
 0x3a5   :  { %3572 = dma.done.wait [#allocation5], 32  }
 0x3a6   :  { %3573 = vsyncadd [#allocation5], 4294967264 }
 0x3a7   :  { %3196 = vsyncpa [#allocation4], 1 }
 0x3a8   :  { %3197 = vsyncpa [#allocation7], 1 }
 0x3a9   :  { %3198 = vsyncpa [#allocation5], 1 }

</bundles_post_ra>
